<compile_context>
chip_gen: v6e
topology: v6e:2x2x1
jax: 0.10.0
libtpu: 0.0.40
codegen_flags: <defaults>
</compile_context>

<pallas_src>
import math
import functools

import jax
import jax.numpy as jnp
from jax.experimental import pallas as pl
from jax.experimental.pallas import tpu as pltpu

DTYPE = jnp.float32
WEIGHT_DTYPE = jnp.bfloat16      # MXU-side weight storage (halves weight DMA)
NEG_INF = -1e9

_CompilerParams = getattr(pltpu, "CompilerParams", None) or getattr(
    pltpu, "TPUCompilerParams")
_HAS_BUFFERED = hasattr(pl, "Buffered")

_VMEM_LIMIT_CACHE = [None]


def _vmem_limit_bytes():
    """~75% of per-core physical VMEM (leaves headroom for compiler scratch):
    ~48 MiB on v7x, ~96 MiB on v5e/v6e; falls back to 96 MiB off-TPU."""
    if _VMEM_LIMIT_CACHE[0] is None:
        try:
            cap = int(pltpu.get_tpu_info().vmem_capacity_bytes)
        except Exception:
            cap = 128 * 1024 * 1024
        _VMEM_LIMIT_CACHE[0] = max(32 * 1024 * 1024, (cap * 3) // 4)
    return _VMEM_LIMIT_CACHE[0]


def _compiler_params(dimension_semantics):
    return _CompilerParams(dimension_semantics=dimension_semantics,
                           vmem_limit_bytes=_vmem_limit_bytes())


def _const_spec(shape, grid_rank):
    """BlockSpec for grid-invariant operands: request single buffering so the
    constant block does not consume 2x VMEM; fall back to the default if this
    JAX version has no pipeline_mode support."""
    n = len(shape)
    if grid_rank == 1:
        idx = lambda i, _n=n: (0,) * _n
    else:
        idx = lambda i, j, _n=n: (0,) * _n
    if _HAS_BUFFERED:
        try:
            return pl.BlockSpec(shape, idx, pipeline_mode=pl.Buffered(1))
        except TypeError:
            pass
    return pl.BlockSpec(shape, idx)


# --------------------------------------------------------------------------
# shared in-kernel helpers
# --------------------------------------------------------------------------

def _layernorm_f32(x, g, b):
    """Annotated-Transformer LayerNorm: unbiased std (d-1), eps added to std."""
    d = x.shape[-1]
    mean = jnp.mean(x, axis=-1, keepdims=True)
    c = x - mean
    var = jnp.sum(c * c, axis=-1, keepdims=True) / (d - 1)
    inv = pl.reciprocal(jnp.sqrt(var) + 1e-6, approx=False)   # exact, EUP path
    return g * c * inv + b


def _row_tiling(M, max_tm=512):
    """Pick a row-block size; pad M so the block divides it."""
    if M <= 2 * max_tm:
        return M, M
    Mp = ((M + max_tm - 1) // max_tm) * max_tm
    return max_tm, Mp


def _pick_tq(Sq):
    """Query-tile size for the MHA grid's second axis."""
    if Sq <= 256:
        return Sq
    for t in (256, 128, 64, 32, 16, 8):
        if Sq % t == 0:
            return t
    return Sq


# --------------------------------------------------------------------------
# fused multi-head-attention sublayer kernel
#   out = x + W_o( MHA( LN(x) , kv , kv ) ) + b_o      (kv = LN(x) if self-attn)
# --------------------------------------------------------------------------

def _mha_kernel(*refs, h, self_attn, shared_x):
    if shared_x:
        (xq_ref, g_ref, b_ref, wq_ref, bq_ref, wkv_ref, bkv_ref,
         wo_ref, bo_ref, bias_ref, o_ref) = refs
        kv_ref = xq_ref
    else:
        (xq_ref, kv_ref, g_ref, b_ref, wq_ref, bq_ref, wkv_ref, bkv_ref,
         wo_ref, bo_ref, bias_ref, o_ref) = refs

    x = xq_ref[0].astype(jnp.float32)                 # (tq, D) residual input
    tq, D = x.shape
    dk = D // h

    g = g_ref[...]
    bln = b_ref[...]

    # fused pre-norm of the query tile
    nq_bf = _layernorm_f32(x, g, bln).astype(jnp.bfloat16)

    if shared_x:
        nkv_bf = nq_bf                                # self-attn, single q tile
    elif self_attn:
        nkv_bf = _layernorm_f32(kv_ref[0].astype(jnp.float32),
                                g, bln).astype(jnp.bfloat16)
    else:
        nkv_bf = kv_ref[0].astype(jnp.bfloat16)       # encoder memory (no LN)

    # projections — 1/sqrt(dk) was folded into wq/bq at init time
    q = jnp.dot(nq_bf, wq_ref[...],
                preferred_element_type=jnp.float32) + bq_ref[...]       # (tq, D)
    kvp = jnp.dot(nkv_bf, wkv_ref[...],
                  preferred_element_type=jnp.float32) + bkv_ref[...]    # (Sk, 2D)
    k = kvp[:, :D]
    v = kvp[:, D:]

    bias = bias_ref[0]                                # (1|tq, Sk) f32 additive

    wo = wo_ref[...]                                  # (D, D) bf16
    acc = jnp.zeros((tq, D), jnp.float32)

    # per-head attention; heads accumulate straight into the output projection
    # (no context concatenate).
    # TODO(synk): for dk < 128 pre-permute the head layout (or use an Sk-tiled
    # online-softmax / flash variant) to avoid sub-128-lane slices at long Sk.
    for i in range(h):
        sl = slice(i * dk, (i + 1) * dk)
        s = jax.lax.dot_general(q[:, sl], k[:, sl],
                                dimension_numbers=(((1,), (1,)), ((), ())),
                                preferred_element_type=jnp.float32)   # (tq, Sk)
        s = s + bias                                  # hoisted additive mask
        s = s - jnp.max(s, axis=-1, keepdims=True)
        p = jnp.exp(s)
        p = p * pl.reciprocal(jnp.sum(p, axis=-1, keepdims=True), approx=True)
        ctx = jnp.dot(p.astype(jnp.bfloat16), v[:, sl].astype(jnp.bfloat16),
                      preferred_element_type=jnp.float32)             # (tq, dk)
        acc = acc + jnp.dot(ctx.astype(jnp.bfloat16), wo[sl, :],
                            preferred_element_type=jnp.float32)       # (tq, D)

    o_ref[0] = (x + acc + bo_ref[...]).astype(o_ref.dtype)   # fused residual add


def mha_block(p, x, kv, bias, *, h, self_attn):
    """x: (B,Sq,D) residual input; kv: (B,Sk,D) memory (cross-attn) or None;
    bias: (B, 1|Sq, Sk) f32 additive mask bias (0 / -1e9)."""
    B, Sq, D = x.shape
    Sk = Sq if self_attn else kv.shape[1]
    Mq = bias.shape[1]
    g, b = p["norm"]

    tq = _pick_tq(Sq)
    nq = Sq // tq
    shared_x = self_attn and nq == 1
    grid = (B, nq)

    in_arrays = [x]
    in_specs = [pl.BlockSpec((1, tq, D), lambda bi, qi: (bi, qi, 0))]
    if not shared_x:
        in_arrays.append(x if self_attn else kv)
        in_specs.append(pl.BlockSpec((1, Sk, D), lambda bi, qi: (bi, 0, 0)))
    in_arrays += [g.reshape(1, D), b.reshape(1, D),
                  p["wq"], p["bq"].reshape(1, D),
                  p["wkv"], p["bkv"].reshape(1, 2 * D),
                  p["wo"], p["bo"].reshape(1, D),
                  bias]
    if Mq == 1:
        bias_spec = pl.BlockSpec((1, 1, Sk), lambda bi, qi: (bi, 0, 0))
    else:
        bias_spec = pl.BlockSpec((1, tq, Sk), lambda bi, qi: (bi, qi, 0))
    in_specs += [_const_spec((1, D), 2), _const_spec((1, D), 2),
                 _const_spec((D, D), 2), _const_spec((1, D), 2),
                 _const_spec((D, 2 * D), 2), _const_spec((1, 2 * D), 2),
                 _const_spec((D, D), 2), _const_spec((1, D), 2),
                 bias_spec]

    flops = 2 * B * (Sq * D * D + Sk * D * 2 * D + 2 * Sq * Sk * D + Sq * D * D)
    bytes_accessed = (4 * B * Sq * D * 2 + 4 * B * Sk * D
                      + 2 * (4 * D * D) + 4 * (5 * D)
                      + 4 * B * Mq * Sk)
    cost = pl.CostEstimate(flops=flops, transcendentals=B * h * Sq * Sk,
                           bytes_accessed=bytes_accessed)

    # Only alias the residual buffer when x is passed exactly once.
    io_alias = {0: 0} if (shared_x or not self_attn) else {}

    kernel = functools.partial(_mha_kernel, h=h, self_attn=self_attn,
                               shared_x=shared_x)
    # TODO(synk): for Sq < 128 block multiple batch elements per grid step to
    # better fill the MXU M dimension of the two big projections.
    return pl.pallas_call(
        kernel,
        out_shape=jax.ShapeDtypeStruct((B, Sq, D), x.dtype),
        grid=grid,
        in_specs=in_specs,
        out_specs=pl.BlockSpec((1, tq, D), lambda bi, qi: (bi, qi, 0)),
        compiler_params=_compiler_params(("parallel", "arbitrary")),
        cost_estimate=cost,
        input_output_aliases=io_alias,
    )(*in_arrays)


# --------------------------------------------------------------------------
# fused feed-forward sublayer kernel:  out = x + W2 relu(W1 LN(x) + b1) + b2
# --------------------------------------------------------------------------

def _ffn_kernel(x_ref, g_ref, b_ref, w1_ref, b1_ref, w2_ref, b2_ref, o_ref):
    x = x_ref[...].astype(jnp.float32)                    # (tm, D)
    n = _layernorm_f32(x, g_ref[...], b_ref[...])
    h1 = jnp.dot(n.astype(jnp.bfloat16), w1_ref[...],
                 preferred_element_type=jnp.float32) + b1_ref[...]
    h1 = jnp.maximum(h1, 0.0)                             # ReLU (f32, v5e-safe)
    y = jnp.dot(h1.astype(jnp.bfloat16), w2_ref[...],
                preferred_element_type=jnp.float32) + b2_ref[...]
    o_ref[...] = (x + y).astype(o_ref.dtype)              # fused residual add


def ffn_block(p, x):
    B, S, D = x.shape
    M = B * S
    g, b = p["norm"]
    dff = p["w1"].shape[1]

    x2 = x.reshape(M, D)
    tm, Mp = _row_tiling(M)
    if Mp != M:
        # Zero padding: padded rows have var=0 (inv ~ 1/eps) but centered
        # values are exactly zero; the rows are sliced off below.
        x2 = jnp.pad(x2, ((0, Mp - M), (0, 0)))

    cost = pl.CostEstimate(
        flops=4 * Mp * D * dff,
        transcendentals=0,
        bytes_accessed=4 * Mp * D * 2 + 2 * 2 * D * dff + 4 * (dff + 3 * D))

    out = pl.pallas_call(
        _ffn_kernel,
        out_shape=jax.ShapeDtypeStruct((Mp, D), x.dtype),
        grid=(Mp // tm,),
        in_specs=[pl.BlockSpec((tm, D), lambda i: (i, 0)),
                  _const_spec((1, D), 1), _const_spec((1, D), 1),
                  _const_spec((D, dff), 1), _const_spec((1, dff), 1),
                  _const_spec((dff, D), 1), _const_spec((1, D), 1)],
        out_specs=pl.BlockSpec((tm, D), lambda i: (i, 0)),
        compiler_params=_compiler_params(("parallel",)),
        cost_estimate=cost,
        input_output_aliases={0: 0},
    )(x2, g.reshape(1, D), b.reshape(1, D),
      p["w1"], p["b1"].reshape(1, dff), p["w2"], p["b2"].reshape(1, D))
    if Mp != M:
        out = out[:M]
    return out.reshape(B, S, D)


# --------------------------------------------------------------------------
# standalone LayerNorm kernel (final encoder/decoder norms), row-tiled
# --------------------------------------------------------------------------

def _ln_kernel(x_ref, g_ref, b_ref, o_ref):
    x = x_ref[...].astype(jnp.float32)
    o_ref[...] = _layernorm_f32(x, g_ref[...], b_ref[...]).astype(o_ref.dtype)


def layer_norm_block(x, gb):
    g, b = gb
    B, S, D = x.shape
    M = B * S
    x2 = x.reshape(M, D)
    tm, Mp = _row_tiling(M)
    if Mp != M:
        x2 = jnp.pad(x2, ((0, Mp - M), (0, 0)))

    cost = pl.CostEstimate(flops=8 * Mp * D, transcendentals=Mp,
                           bytes_accessed=4 * Mp * D * 2 + 8 * D)

    out = pl.pallas_call(
        _ln_kernel,
        out_shape=jax.ShapeDtypeStruct((Mp, D), x.dtype),
        grid=(Mp // tm,),
        in_specs=[pl.BlockSpec((tm, D), lambda i: (i, 0)),
                  _const_spec((1, D), 1), _const_spec((1, D), 1)],
        out_specs=pl.BlockSpec((tm, D), lambda i: (i, 0)),
        compiler_params=_compiler_params(("parallel",)),
        cost_estimate=cost,
        input_output_aliases={0: 0},
    )(x2, g.reshape(1, D), b.reshape(1, D))
    if Mp != M:
        out = out[:M]
    return out.reshape(B, S, D)


# --------------------------------------------------------------------------
# model glue (embedding lookup / layer chaining) in plain JAX
# --------------------------------------------------------------------------

def encoder_layer(p, x, src_bias, h):
    x = mha_block(p["self_attn"], x, None, src_bias, h=h, self_attn=True)
    x = ffn_block(p["ff"], x)
    return x


def decoder_layer(p, x, memory, src_bias, tgt_bias, h):
    x = mha_block(p["self_attn"], x, None, tgt_bias, h=h, self_attn=True)
    x = mha_block(p["src_attn"], x, memory, src_bias, h=h, self_attn=False)
    x = ffn_block(p["ff"], x)
    return x


def positional_encoding(max_len, d_model):
    pos = jnp.arange(max_len, dtype=jnp.float32)[:, None]
    div = jnp.exp(jnp.arange(0, d_model, 2, dtype=jnp.float32)
                  * (-math.log(10000.0) / d_model))
    pe = jnp.zeros((max_len, d_model), DTYPE)
    pe = pe.at[:, 0::2].set(jnp.sin(pos * div))
    pe = pe.at[:, 1::2].set(jnp.cos(pos * div))
    return pe


def embed(lut, pe, tokens, d_model):
    # Data_Type.base path: Embedding lookup * sqrt(d_model), then add PE.
    # (The target_vec concat + linear path only applies to Data_Type.seq_esm.)
    S = tokens.shape[1]
    x = jnp.take(lut, tokens, axis=0) * math.sqrt(d_model)
    return x + pe[None, :S, :]


def encoder_decoder_forward(params, src, tgt, src_mask, tgt_mask, target_vec, *, h):
    del target_vec  # unused for Data_Type.base (kept for API parity)
    d_model = params["src_lut"].shape[1]
    pe = params["pe"]

    # masked_fill(mask==0, -1e9) as a pre-expanded f32 additive bias, computed
    # once and shared by every layer (no per-head compare/select in-kernel).
    # TODO(synk): pad Sk to a multiple of 128 here for lane-dense score tiles
    # at long sequence lengths.
    src_bias = jnp.where(src_mask == 0, NEG_INF, 0.0).astype(jnp.float32)
    tgt_bias = jnp.where(tgt_mask == 0, NEG_INF, 0.0).astype(jnp.float32)

    # encode
    x = embed(params["src_lut"], pe, src, d_model)
    for lp in params["enc_layers"]:
        x = encoder_layer(lp, x, src_bias, h)
    memory = layer_norm_block(x, params["enc_norm"])

    # decode
    y = embed(params["tgt_lut"], pe, tgt, d_model)
    for lp in params["dec_layers"]:
        y = decoder_layer(lp, y, memory, src_bias, tgt_bias, h)
    return layer_norm_block(y, params["dec_norm"])


# --------------------------------------------------------------------------
# deterministic parameter initialization (xavier_uniform on 2-D weights)
# --------------------------------------------------------------------------

def _xavier(key, shape):
    fan_in, fan_out = shape
    limit = math.sqrt(6.0 / (fan_in + fan_out))
    return jax.random.uniform(key, shape, DTYPE, minval=-limit, maxval=limit)


def _init_norm(d):
    return (jnp.ones((d,), DTYPE), jnp.zeros((d,), DTYPE))


def _init_attn(key, d, h):
    ks = jax.random.split(key, 4)
    scale = 1.0 / math.sqrt(d // h)           # 1/sqrt(dk) folded into Q weights
    wq = _xavier(ks[0], (d, d)) * scale
    wk, wv = _xavier(ks[1], (d, d)), _xavier(ks[2], (d, d))
    return {"wq": wq.astype(WEIGHT_DTYPE),
            "bq": (jnp.zeros((d,), DTYPE) * scale),
            "wkv": jnp.concatenate([wk, wv], axis=1).astype(WEIGHT_DTYPE),
            "bkv": jnp.zeros((2 * d,), DTYPE),
            "wo": _xavier(ks[3], (d, d)).astype(WEIGHT_DTYPE),
            "bo": jnp.zeros((d,), DTYPE),
            "norm": _init_norm(d)}


def _init_ff(key, d, dff):
    k1, k2 = jax.random.split(key)
    return {"w1": _xavier(k1, (d, dff)).astype(WEIGHT_DTYPE),
            "b1": jnp.zeros((dff,), DTYPE),
            "w2": _xavier(k2, (dff, d)).astype(WEIGHT_DTYPE),
            "b2": jnp.zeros((d,), DTYPE),
            "norm": _init_norm(d)}


def init_params(key, src_vocab, tgt_vocab, N, d_model, d_ff, h, max_len=64):
    keys = iter(jax.random.split(key, 5 * N + 4))
    enc_layers = [{"self_attn": _init_attn(next(keys), d_model, h),
                   "ff": _init_ff(next(keys), d_model, d_ff)} for _ in range(N)]
    dec_layers = [{"self_attn": _init_attn(next(keys), d_model, h),
                   "src_attn": _init_attn(next(keys), d_model, h),
                   "ff": _init_ff(next(keys), d_model, d_ff)} for _ in range(N)]
    return {
        "src_lut": _xavier(next(keys), (src_vocab, d_model)),
        "tgt_lut": _xavier(next(keys), (tgt_vocab, d_model)),
        "pe": positional_encoding(max_len, d_model),
        "enc_layers": enc_layers,
        "enc_norm": _init_norm(d_model),
        "dec_layers": dec_layers,
        "dec_norm": _init_norm(d_model),
    }
    # TODO(synk): Generator (final linear + log_softmax) and dropout are not part
    # of EncoderDecoder.forward / eval semantics and are intentionally omitted.


# --------------------------------------------------------------------------

if __name__ == "__main__":
    B, S_SRC, S_TGT = 2, 8, 8
    D_MODEL, D_FF, H, N_LAYERS = 32, 64, 4, 2
    VOCAB, ESM = 11, 16

    root = jax.random.PRNGKey(0)
    k_par, k_src, k_tgt, k_vec = jax.random.split(root, 4)

    params = init_params(k_par, VOCAB, VOCAB, N_LAYERS, D_MODEL, D_FF, H)

    src = jax.random.randint(k_src, (B, S_SRC), 0, VOCAB, dtype=jnp.int32)
    tgt = jax.random.randint(k_tgt, (B, S_TGT), 0, VOCAB, dtype=jnp.int32)
    src_mask = jnp.ones((B, 1, S_SRC), DTYPE)
    tgt_mask = jnp.broadcast_to(
        jnp.tril(jnp.ones((S_TGT, S_TGT), DTYPE))[None], (B, S_TGT, S_TGT))
    target_vec = jax.random.normal(k_vec, (B, ESM), DTYPE)  # unused (base type)

    fwd = jax.jit(functools.partial(encoder_decoder_forward, h=H))
    out = fwd(params, src, tgt, src_mask, tgt_mask, target_vec)
    out = jax.block_until_ready(out)

    assert out.shape == (B, S_TGT, D_MODEL)
    assert bool(jnp.all(jnp.isfinite(out)))
    print("KERNEL_OK")
</pallas_src>

<mosaic_0001>
module attributes {stable_mosaic.version = 11 : i64} {
  func.func @_ln_kernel(%arg0: i32, %arg1: memref<16x32xf32, #tpu.memory_space<vmem>>, %arg2: memref<1x32xf32, #tpu.memory_space<vmem>>, %arg3: memref<1x32xf32, #tpu.memory_space<vmem>>, %arg4: memref<16x32xf32, #tpu.memory_space<vmem>>) attributes {dimension_semantics = [#tpu.dimension_semantics<parallel>], iteration_bounds = array<i64: 1>, scalar_prefetch = 0 : i64, scratch_operands = 0 : i64, tpu.core_type = #tpu.core_type<tc>, window_params = [{transform_indices = @transform_0, window_bounds = array<i64: 16, 32>}, {pipeline_mode = #tpu.pipeline_mode<synchronous>, transform_indices = @transform_1, window_bounds = array<i64: 1, 32>}, {pipeline_mode = #tpu.pipeline_mode<synchronous>, transform_indices = @transform_2, window_bounds = array<i64: 1, 32>}, {transform_indices = @transform_3, window_bounds = array<i64: 16, 32>}]} {
    %c0 = arith.constant 0 : index
    %c0_0 = arith.constant 0 : index
    %0 = vector.load %arg1[%c0, %c0_0] : memref<16x32xf32, #tpu.memory_space<vmem>>, vector<16x32xf32>
    %c0_1 = arith.constant 0 : index
    %c0_2 = arith.constant 0 : index
    %1 = vector.load %arg2[%c0_1, %c0_2] : memref<1x32xf32, #tpu.memory_space<vmem>>, vector<1x32xf32>
    %c0_3 = arith.constant 0 : index
    %c0_4 = arith.constant 0 : index
    %2 = vector.load %arg3[%c0_3, %c0_4] : memref<1x32xf32, #tpu.memory_space<vmem>>, vector<1x32xf32>
    %cst = arith.constant dense<0.000000e+00> : vector<16xf32>
    %3 = vector.multi_reduction <add>, %0, %cst [1] : vector<16x32xf32> to vector<16xf32>
    %4 = vector.shape_cast %3 : vector<16xf32> to vector<16x1xf32>
    %cst_5 = arith.constant 3.200000e+01 : f32
    %5 = vector.broadcast %cst_5 : f32 to vector<16x1xf32>
    %6 = arith.divf %4, %5 : vector<16x1xf32>
    %7 = vector.broadcast %6 : vector<16x1xf32> to vector<16x32xf32>
    %8 = arith.subf %0, %7 : vector<16x32xf32>
    %9 = arith.mulf %8, %8 : vector<16x32xf32>
    %cst_6 = arith.constant dense<0.000000e+00> : vector<16xf32>
    %10 = vector.multi_reduction <add>, %9, %cst_6 [1] : vector<16x32xf32> to vector<16xf32>
    %11 = vector.shape_cast %10 : vector<16xf32> to vector<16x1xf32>
    %cst_7 = arith.constant 3.100000e+01 : f32
    %12 = vector.broadcast %cst_7 : f32 to vector<16x1xf32>
    %13 = arith.divf %11, %12 : vector<16x1xf32>
    %14 = math.sqrt %13 : vector<16x1xf32>
    %cst_8 = arith.constant 9.99999997E-7 : f32
    %15 = vector.broadcast %cst_8 : f32 to vector<16x1xf32>
    %16 = arith.addf %14, %15 : vector<16x1xf32>
    %17 = tpu.reciprocal %16 : vector<16x1xf32> -> vector<16x1xf32>
    %18 = vector.broadcast %1 : vector<1x32xf32> to vector<16x32xf32>
    %19 = arith.mulf %18, %8 : vector<16x32xf32>
    %20 = vector.broadcast %17 : vector<16x1xf32> to vector<16x32xf32>
    %21 = arith.mulf %19, %20 : vector<16x32xf32>
    %22 = vector.broadcast %2 : vector<1x32xf32> to vector<16x32xf32>
    %23 = arith.addf %21, %22 : vector<16x32xf32>
    %c0_9 = arith.constant 0 : index
    %c0_10 = arith.constant 0 : index
    %24 = vector.load %arg4[%c0_9, %c0_10] : memref<16x32xf32, #tpu.memory_space<vmem>>, vector<16x32xf32>
    tpu.vector_store %arg4[%c0_9, %c0_10], %23 {strides = array<i32>} : memref<16x32xf32, #tpu.memory_space<vmem>>, vector<16x32xf32>,
    return
  }
  func.func @transform_0(%arg0: i32) -> (i32, i32) {
    %c0_i32 = arith.constant 0 : i32
    %c0_i32_0 = arith.constant 0 : i32
    return %arg0, %c0_i32 : i32, i32
  }
  func.func @transform_1(%arg0: i32) -> (i32, i32) {
    %c0_i32 = arith.constant 0 : i32
    %c0_i32_0 = arith.constant 0 : i32
    %c0_i32_1 = arith.constant 0 : i32
    return %c0_i32, %c0_i32_0 : i32, i32
  }
  func.func @transform_2(%arg0: i32) -> (i32, i32) {
    %c0_i32 = arith.constant 0 : i32
    %c0_i32_0 = arith.constant 0 : i32
    %c0_i32_1 = arith.constant 0 : i32
    return %c0_i32, %c0_i32_0 : i32, i32
  }
  func.func @transform_3(%arg0: i32) -> (i32, i32) {
    %c0_i32 = arith.constant 0 : i32
    %c0_i32_0 = arith.constant 0 : i32
    return %arg0, %c0_i32 : i32, i32
  }
}

module attributes {stable_mosaic.version = 11 : i64} {
  func.func @_ffn_kernel(%arg0: i32, %arg1: memref<16x32xf32, #tpu.memory_space<vmem>>, %arg2: memref<1x32xf32, #tpu.memory_space<vmem>>, %arg3: memref<1x32xf32, #tpu.memory_space<vmem>>, %arg4: memref<32x64xbf16, #tpu.memory_space<vmem>>, %arg5: memref<1x64xf32, #tpu.memory_space<vmem>>, %arg6: memref<64x32xbf16, #tpu.memory_space<vmem>>, %arg7: memref<1x32xf32, #tpu.memory_space<vmem>>, %arg8: memref<16x32xf32, #tpu.memory_space<vmem>>) attributes {dimension_semantics = [#tpu.dimension_semantics<parallel>], iteration_bounds = array<i64: 1>, scalar_prefetch = 0 : i64, scratch_operands = 0 : i64, tpu.core_type = #tpu.core_type<tc>, window_params = [{transform_indices = @transform_0, window_bounds = array<i64: 16, 32>}, {pipeline_mode = #tpu.pipeline_mode<synchronous>, transform_indices = @transform_1, window_bounds = array<i64: 1, 32>}, {pipeline_mode = #tpu.pipeline_mode<synchronous>, transform_indices = @transform_2, window_bounds = array<i64: 1, 32>}, {pipeline_mode = #tpu.pipeline_mode<synchronous>, transform_indices = @transform_3, window_bounds = array<i64: 32, 64>}, {pipeline_mode = #tpu.pipeline_mode<synchronous>, transform_indices = @transform_4, window_bounds = array<i64: 1, 64>}, {pipeline_mode = #tpu.pipeline_mode<synchronous>, transform_indices = @transform_5, window_bounds = array<i64: 64, 32>}, {pipeline_mode = #tpu.pipeline_mode<synchronous>, transform_indices = @transform_6, window_bounds = array<i64: 1, 32>}, {transform_indices = @transform_7, window_bounds = array<i64: 16, 32>}]} {
    %c0 = arith.constant 0 : index
    %c0_0 = arith.constant 0 : index
    %0 = vector.load %arg1[%c0, %c0_0] : memref<16x32xf32, #tpu.memory_space<vmem>>, vector<16x32xf32>
    %c0_1 = arith.constant 0 : index
    %c0_2 = arith.constant 0 : index
    %1 = vector.load %arg2[%c0_1, %c0_2] : memref<1x32xf32, #tpu.memory_space<vmem>>, vector<1x32xf32>
    %c0_3 = arith.constant 0 : index
    %c0_4 = arith.constant 0 : index
    %2 = vector.load %arg3[%c0_3, %c0_4] : memref<1x32xf32, #tpu.memory_space<vmem>>, vector<1x32xf32>
    %cst = arith.constant dense<0.000000e+00> : vector<16xf32>
    %3 = vector.multi_reduction <add>, %0, %cst [1] : vector<16x32xf32> to vector<16xf32>
    %4 = vector.shape_cast %3 : vector<16xf32> to vector<16x1xf32>
    %cst_5 = arith.constant 3.200000e+01 : f32
    %5 = vector.broadcast %cst_5 : f32 to vector<16x1xf32>
    %6 = arith.divf %4, %5 : vector<16x1xf32>
    %7 = vector.broadcast %6 : vector<16x1xf32> to vector<16x32xf32>
    %8 = arith.subf %0, %7 : vector<16x32xf32>
    %9 = arith.mulf %8, %8 : vector<16x32xf32>
    %cst_6 = arith.constant dense<0.000000e+00> : vector<16xf32>
    %10 = vector.multi_reduction <add>, %9, %cst_6 [1] : vector<16x32xf32> to vector<16xf32>
    %11 = vector.shape_cast %10 : vector<16xf32> to vector<16x1xf32>
    %cst_7 = arith.constant 3.100000e+01 : f32
    %12 = vector.broadcast %cst_7 : f32 to vector<16x1xf32>
    %13 = arith.divf %11, %12 : vector<16x1xf32>
    %14 = math.sqrt %13 : vector<16x1xf32>
    %cst_8 = arith.constant 9.99999997E-7 : f32
    %15 = vector.broadcast %cst_8 : f32 to vector<16x1xf32>
    %16 = arith.addf %14, %15 : vector<16x1xf32>
    %17 = tpu.reciprocal %16 : vector<16x1xf32> -> vector<16x1xf32>
    %18 = vector.broadcast %1 : vector<1x32xf32> to vector<16x32xf32>
    %19 = arith.mulf %18, %8 : vector<16x32xf32>
    %20 = vector.broadcast %17 : vector<16x1xf32> to vector<16x32xf32>
    %21 = arith.mulf %19, %20 : vector<16x32xf32>
    %22 = vector.broadcast %2 : vector<1x32xf32> to vector<16x32xf32>
    %23 = arith.addf %21, %22 : vector<16x32xf32>
    %24 = arith.truncf %23 : vector<16x32xf32> to vector<16x32xbf16>
    %c0_9 = arith.constant 0 : index
    %c0_10 = arith.constant 0 : index
    %25 = vector.load %arg4[%c0_9, %c0_10] : memref<32x64xbf16, #tpu.memory_space<vmem>>, vector<32x64xbf16>
    %cst_11 = arith.constant dense<0.000000e+00> : vector<16x64xf32>
    %26 = tpu.matmul %24, %25, %cst_11 {dimension_numbers = #tpu.dot_dimension_numbers<[1], [0], [0], [1], [0, 0, 1, 1], [], []>} : vector<16x32xbf16>, vector<32x64xbf16>, vector<16x64xf32> -> vector<16x64xf32>
    %c0_12 = arith.constant 0 : index
    %c0_13 = arith.constant 0 : index
    %27 = vector.load %arg5[%c0_12, %c0_13] : memref<1x64xf32, #tpu.memory_space<vmem>>, vector<1x64xf32>
    %28 = vector.broadcast %27 : vector<1x64xf32> to vector<16x64xf32>
    %29 = arith.addf %26, %28 : vector<16x64xf32>
    %cst_14 = arith.constant 0.000000e+00 : f32
    %30 = vector.broadcast %cst_14 : f32 to vector<16x64xf32>
    %31 = arith.maximumf %29, %30 : vector<16x64xf32>
    %32 = arith.truncf %31 : vector<16x64xf32> to vector<16x64xbf16>
    %c0_15 = arith.constant 0 : index
    %c0_16 = arith.constant 0 : index
    %33 = vector.load %arg6[%c0_15, %c0_16] : memref<64x32xbf16, #tpu.memory_space<vmem>>, vector<64x32xbf16>
    %cst_17 = arith.constant dense<0.000000e+00> : vector<16x32xf32>
    %34 = tpu.matmul %32, %33, %cst_17 {dimension_numbers = #tpu.dot_dimension_numbers<[1], [0], [0], [1], [0, 0, 1, 1], [], []>} : vector<16x64xbf16>, vector<64x32xbf16>, vector<16x32xf32> -> vector<16x32xf32>
    %c0_18 = arith.constant 0 : index
    %c0_19 = arith.constant 0 : index
    %35 = vector.load %arg7[%c0_18, %c0_19] : memref<1x32xf32, #tpu.memory_space<vmem>>, vector<1x32xf32>
    %36 = vector.broadcast %35 : vector<1x32xf32> to vector<16x32xf32>
    %37 = arith.addf %34, %36 : vector<16x32xf32>
    %38 = arith.addf %0, %37 : vector<16x32xf32>
    %c0_20 = arith.constant 0 : index
    %c0_21 = arith.constant 0 : index
    %39 = vector.load %arg8[%c0_20, %c0_21] : memref<16x32xf32, #tpu.memory_space<vmem>>, vector<16x32xf32>
    tpu.vector_store %arg8[%c0_20, %c0_21], %38 {strides = array<i32>} : memref<16x32xf32, #tpu.memory_space<vmem>>, vector<16x32xf32>,
    return
  }
  func.func @transform_0(%arg0: i32) -> (i32, i32) {
    %c0_i32 = arith.constant 0 : i32
    %c0_i32_0 = arith.constant 0 : i32
    return %arg0, %c0_i32 : i32, i32
  }
  func.func @transform_1(%arg0: i32) -> (i32, i32) {
    %c0_i32 = arith.constant 0 : i32
    %c0_i32_0 = arith.constant 0 : i32
    %c0_i32_1 = arith.constant 0 : i32
    return %c0_i32, %c0_i32_0 : i32, i32
  }
  func.func @transform_2(%arg0: i32) -> (i32, i32) {
    %c0_i32 = arith.constant 0 : i32
    %c0_i32_0 = arith.constant 0 : i32
    %c0_i32_1 = arith.constant 0 : i32
    return %c0_i32, %c0_i32_0 : i32, i32
  }
  func.func @transform_3(%arg0: i32) -> (i32, i32) {
    %c0_i32 = arith.constant 0 : i32
    %c0_i32_0 = arith.constant 0 : i32
    %c0_i32_1 = arith.constant 0 : i32
    return %c0_i32, %c0_i32_0 : i32, i32
  }
  func.func @transform_4(%arg0: i32) -> (i32, i32) {
    %c0_i32 = arith.constant 0 : i32
    %c0_i32_0 = arith.constant 0 : i32
    %c0_i32_1 = arith.constant 0 : i32
    return %c0_i32, %c0_i32_0 : i32, i32
  }
  func.func @transform_5(%arg0: i32) -> (i32, i32) {
    %c0_i32 = arith.constant 0 : i32
    %c0_i32_0 = arith.constant 0 : i32
    %c0_i32_1 = arith.constant 0 : i32
    return %c0_i32, %c0_i32_0 : i32, i32
  }
  func.func @transform_6(%arg0: i32) -> (i32, i32) {
    %c0_i32 = arith.constant 0 : i32
    %c0_i32_0 = arith.constant 0 : i32
    %c0_i32_1 = arith.constant 0 : i32
    return %c0_i32, %c0_i32_0 : i32, i32
  }
  func.func @transform_7(%arg0: i32) -> (i32, i32) {
    %c0_i32 = arith.constant 0 : i32
    %c0_i32_0 = arith.constant 0 : i32
    return %arg0, %c0_i32 : i32, i32
  }
}

module attributes {stable_mosaic.version = 11 : i64} {
  func.func @_mha_kernel(%arg0: i32, %arg1: i32, %arg2: memref<1x8x32xf32, #tpu.memory_space<vmem>>, %arg3: memref<1x32xf32, #tpu.memory_space<vmem>>, %arg4: memref<1x32xf32, #tpu.memory_space<vmem>>, %arg5: memref<32x32xbf16, #tpu.memory_space<vmem>>, %arg6: memref<1x32xf32, #tpu.memory_space<vmem>>, %arg7: memref<32x64xbf16, #tpu.memory_space<vmem>>, %arg8: memref<1x64xf32, #tpu.memory_space<vmem>>, %arg9: memref<32x32xbf16, #tpu.memory_space<vmem>>, %arg10: memref<1x32xf32, #tpu.memory_space<vmem>>, %arg11: memref<1x1x8xf32, #tpu.memory_space<vmem>>, %arg12: memref<1x8x32xf32, #tpu.memory_space<vmem>>) attributes {dimension_semantics = [#tpu.dimension_semantics<parallel>, #tpu.dimension_semantics<arbitrary>], iteration_bounds = array<i64: 2, 1>, scalar_prefetch = 0 : i64, scratch_operands = 0 : i64, tpu.core_type = #tpu.core_type<tc>, window_params = [{transform_indices = @transform_0, window_bounds = array<i64: 1, 8, 32>}, {pipeline_mode = #tpu.pipeline_mode<synchronous>, transform_indices = @transform_1, window_bounds = array<i64: 1, 32>}, {pipeline_mode = #tpu.pipeline_mode<synchronous>, transform_indices = @transform_2, window_bounds = array<i64: 1, 32>}, {pipeline_mode = #tpu.pipeline_mode<synchronous>, transform_indices = @transform_3, window_bounds = array<i64: 32, 32>}, {pipeline_mode = #tpu.pipeline_mode<synchronous>, transform_indices = @transform_4, window_bounds = array<i64: 1, 32>}, {pipeline_mode = #tpu.pipeline_mode<synchronous>, transform_indices = @transform_5, window_bounds = array<i64: 32, 64>}, {pipeline_mode = #tpu.pipeline_mode<synchronous>, transform_indices = @transform_6, window_bounds = array<i64: 1, 64>}, {pipeline_mode = #tpu.pipeline_mode<synchronous>, transform_indices = @transform_7, window_bounds = array<i64: 32, 32>}, {pipeline_mode = #tpu.pipeline_mode<synchronous>, transform_indices = @transform_8, window_bounds = array<i64: 1, 32>}, {transform_indices = @transform_9, window_bounds = array<i64: 1, 1, 8>}, {transform_indices = @transform_10, window_bounds = array<i64: 1, 8, 32>}]} {
    %c0 = arith.constant 0 : index
    %c0_0 = arith.constant 0 : index
    %c0_1 = arith.constant 0 : index
    %0 = vector.load %arg2[%c0, %c0_0, %c0_1] : memref<1x8x32xf32, #tpu.memory_space<vmem>>, vector<1x8x32xf32>
    %1 = vector.shape_cast %0 : vector<1x8x32xf32> to vector<8x32xf32>
    %c0_2 = arith.constant 0 : index
    %c0_3 = arith.constant 0 : index
    %2 = vector.load %arg3[%c0_2, %c0_3] : memref<1x32xf32, #tpu.memory_space<vmem>>, vector<1x32xf32>
    %c0_4 = arith.constant 0 : index
    %c0_5 = arith.constant 0 : index
    %3 = vector.load %arg4[%c0_4, %c0_5] : memref<1x32xf32, #tpu.memory_space<vmem>>, vector<1x32xf32>
    %cst = arith.constant dense<0.000000e+00> : vector<8xf32>
    %4 = vector.multi_reduction <add>, %1, %cst [1] : vector<8x32xf32> to vector<8xf32>
    %5 = vector.shape_cast %4 : vector<8xf32> to vector<8x1xf32>
    %cst_6 = arith.constant 3.200000e+01 : f32
    %6 = vector.broadcast %cst_6 : f32 to vector<8x1xf32>
    %7 = arith.divf %5, %6 : vector<8x1xf32>
    %8 = vector.broadcast %7 : vector<8x1xf32> to vector<8x32xf32>
    %9 = arith.subf %1, %8 : vector<8x32xf32>
    %10 = arith.mulf %9, %9 : vector<8x32xf32>
    %cst_7 = arith.constant dense<0.000000e+00> : vector<8xf32>
    %11 = vector.multi_reduction <add>, %10, %cst_7 [1] : vector<8x32xf32> to vector<8xf32>
    %12 = vector.shape_cast %11 : vector<8xf32> to vector<8x1xf32>
    %cst_8 = arith.constant 3.100000e+01 : f32
    %13 = vector.broadcast %cst_8 : f32 to vector<8x1xf32>
    %14 = arith.divf %12, %13 : vector<8x1xf32>
    %15 = math.sqrt %14 : vector<8x1xf32>
    %cst_9 = arith.constant 9.99999997E-7 : f32
    %16 = vector.broadcast %cst_9 : f32 to vector<8x1xf32>
    %17 = arith.addf %15, %16 : vector<8x1xf32>
    %18 = tpu.reciprocal %17 : vector<8x1xf32> -> vector<8x1xf32>
    %19 = vector.broadcast %2 : vector<1x32xf32> to vector<8x32xf32>
    %20 = arith.mulf %19, %9 : vector<8x32xf32>
    %21 = vector.broadcast %18 : vector<8x1xf32> to vector<8x32xf32>
    %22 = arith.mulf %20, %21 : vector<8x32xf32>
    %23 = vector.broadcast %3 : vector<1x32xf32> to vector<8x32xf32>
    %24 = arith.addf %22, %23 : vector<8x32xf32>
    %25 = arith.truncf %24 : vector<8x32xf32> to vector<8x32xbf16>
    %c0_10 = arith.constant 0 : index
    %c0_11 = arith.constant 0 : index
    %26 = vector.load %arg5[%c0_10, %c0_11] : memref<32x32xbf16, #tpu.memory_space<vmem>>, vector<32x32xbf16>
    %cst_12 = arith.constant dense<0.000000e+00> : vector<8x32xf32>
    %27 = tpu.matmul %25, %26, %cst_12 {dimension_numbers = #tpu.dot_dimension_numbers<[1], [0], [0], [1], [0, 0, 1, 1], [], []>} : vector<8x32xbf16>, vector<32x32xbf16>, vector<8x32xf32> -> vector<8x32xf32>
    %c0_13 = arith.constant 0 : index
    %c0_14 = arith.constant 0 : index
    %28 = vector.load %arg6[%c0_13, %c0_14] : memref<1x32xf32, #tpu.memory_space<vmem>>, vector<1x32xf32>
    %29 = vector.broadcast %28 : vector<1x32xf32> to vector<8x32xf32>
    %30 = arith.addf %27, %29 : vector<8x32xf32>
    %c0_15 = arith.constant 0 : index
    %c0_16 = arith.constant 0 : index
    %31 = vector.load %arg7[%c0_15, %c0_16] : memref<32x64xbf16, #tpu.memory_space<vmem>>, vector<32x64xbf16>
    %cst_17 = arith.constant dense<0.000000e+00> : vector<8x64xf32>
    %32 = tpu.matmul %25, %31, %cst_17 {dimension_numbers = #tpu.dot_dimension_numbers<[1], [0], [0], [1], [0, 0, 1, 1], [], []>} : vector<8x32xbf16>, vector<32x64xbf16>, vector<8x64xf32> -> vector<8x64xf32>
    %c0_18 = arith.constant 0 : index
    %c0_19 = arith.constant 0 : index
    %33 = vector.load %arg8[%c0_18, %c0_19] : memref<1x64xf32, #tpu.memory_space<vmem>>, vector<1x64xf32>
    %34 = vector.broadcast %33 : vector<1x64xf32> to vector<8x64xf32>
    %35 = arith.addf %32, %34 : vector<8x64xf32>
    %36 = vector.extract_strided_slice %35 {offsets = [0, 0], sizes = [8, 32], strides = [1, 1]} : vector<8x64xf32> to vector<8x32xf32>
    %37 = vector.extract_strided_slice %35 {offsets = [0, 32], sizes = [8, 32], strides = [1, 1]} : vector<8x64xf32> to vector<8x32xf32>
    %c0_20 = arith.constant 0 : index
    %c0_21 = arith.constant 0 : index
    %c0_22 = arith.constant 0 : index
    %38 = vector.load %arg11[%c0_20, %c0_21, %c0_22] : memref<1x1x8xf32, #tpu.memory_space<vmem>>, vector<1x1x8xf32>
    %39 = vector.shape_cast %38 : vector<1x1x8xf32> to vector<1x8xf32>
    %c0_23 = arith.constant 0 : index
    %c0_24 = arith.constant 0 : index
    %40 = vector.load %arg9[%c0_23, %c0_24] : memref<32x32xbf16, #tpu.memory_space<vmem>>, vector<32x32xbf16>
    %cst_25 = arith.constant 0.000000e+00 : f32
    %41 = vector.broadcast %cst_25 : f32 to vector<8x32xf32>
    %42 = vector.extract_strided_slice %30 {offsets = [0, 0], sizes = [8, 8], strides = [1, 1]} : vector<8x32xf32> to vector<8x8xf32>
    %43 = vector.extract_strided_slice %36 {offsets = [0, 0], sizes = [8, 8], strides = [1, 1]} : vector<8x32xf32> to vector<8x8xf32>
    %cst_26 = arith.constant dense<0.000000e+00> : vector<8x8xf32>
    %44 = tpu.matmul %42, %43, %cst_26 {dimension_numbers = #tpu.dot_dimension_numbers<[1], [1], [0], [0], [0, 0, 1, 0], [], []>} : vector<8x8xf32>, vector<8x8xf32>, vector<8x8xf32> -> vector<8x8xf32>
    %45 = vector.broadcast %39 : vector<1x8xf32> to vector<8x8xf32>
    %46 = arith.addf %44, %45 : vector<8x8xf32>
    %cst_27 = arith.constant dense<0xFF800000> : vector<8xf32>
    %47 = vector.multi_reduction <maximumf>, %46, %cst_27 [1] : vector<8x8xf32> to vector<8xf32>
    %48 = vector.shape_cast %47 : vector<8xf32> to vector<8x1xf32>
    %49 = vector.broadcast %48 : vector<8x1xf32> to vector<8x8xf32>
    %50 = arith.subf %46, %49 : vector<8x8xf32>
    %51 = math.exp %50 : vector<8x8xf32>
    %cst_28 = arith.constant dense<0.000000e+00> : vector<8xf32>
    %52 = vector.multi_reduction <add>, %51, %cst_28 [1] : vector<8x8xf32> to vector<8xf32>
    %53 = vector.shape_cast %52 : vector<8xf32> to vector<8x1xf32>
    %54 = tpu.reciprocal %53 {approx = true} : vector<8x1xf32> -> vector<8x1xf32>
    %55 = vector.broadcast %54 : vector<8x1xf32> to vector<8x8xf32>
    %56 = arith.mulf %51, %55 : vector<8x8xf32>
    %57 = arith.truncf %56 : vector<8x8xf32> to vector<8x8xbf16>
    %58 = vector.extract_strided_slice %37 {offsets = [0, 0], sizes = [8, 8], strides = [1, 1]} : vector<8x32xf32> to vector<8x8xf32>
    %59 = arith.truncf %58 : vector<8x8xf32> to vector<8x8xbf16>
    %cst_29 = arith.constant dense<0.000000e+00> : vector<8x8xf32>
    %60 = tpu.matmul %57, %59, %cst_29 {dimension_numbers = #tpu.dot_dimension_numbers<[1], [0], [0], [1], [0, 0, 1, 1], [], []>} : vector<8x8xbf16>, vector<8x8xbf16>, vector<8x8xf32> -> vector<8x8xf32>
    %61 = arith.truncf %60 : vector<8x8xf32> to vector<8x8xbf16>
    %62 = vector.extract_strided_slice %40 {offsets = [0, 0], sizes = [8, 32], strides = [1, 1]} : vector<32x32xbf16> to vector<8x32xbf16>
    %cst_30 = arith.constant dense<0.000000e+00> : vector<8x32xf32>
    %63 = tpu.matmul %61, %62, %cst_30 {dimension_numbers = #tpu.dot_dimension_numbers<[1], [0], [0], [1], [0, 0, 1, 1], [], []>} : vector<8x8xbf16>, vector<8x32xbf16>, vector<8x32xf32> -> vector<8x32xf32>
    %64 = arith.addf %41, %63 : vector<8x32xf32>
    %65 = vector.extract_strided_slice %30 {offsets = [0, 8], sizes = [8, 8], strides = [1, 1]} : vector<8x32xf32> to vector<8x8xf32>
    %66 = vector.extract_strided_slice %36 {offsets = [0, 8], sizes = [8, 8], strides = [1, 1]} : vector<8x32xf32> to vector<8x8xf32>
    %cst_31 = arith.constant dense<0.000000e+00> : vector<8x8xf32>
    %67 = tpu.matmul %65, %66, %cst_31 {dimension_numbers = #tpu.dot_dimension_numbers<[1], [1], [0], [0], [0, 0, 1, 0], [], []>} : vector<8x8xf32>, vector<8x8xf32>, vector<8x8xf32> -> vector<8x8xf32>
    %68 = vector.broadcast %39 : vector<1x8xf32> to vector<8x8xf32>
    %69 = arith.addf %67, %68 : vector<8x8xf32>
    %cst_32 = arith.constant dense<0xFF800000> : vector<8xf32>
    %70 = vector.multi_reduction <maximumf>, %69, %cst_32 [1] : vector<8x8xf32> to vector<8xf32>
    %71 = vector.shape_cast %70 : vector<8xf32> to vector<8x1xf32>
    %72 = vector.broadcast %71 : vector<8x1xf32> to vector<8x8xf32>
    %73 = arith.subf %69, %72 : vector<8x8xf32>
    %74 = math.exp %73 : vector<8x8xf32>
    %cst_33 = arith.constant dense<0.000000e+00> : vector<8xf32>
    %75 = vector.multi_reduction <add>, %74, %cst_33 [1] : vector<8x8xf32> to vector<8xf32>
    %76 = vector.shape_cast %75 : vector<8xf32> to vector<8x1xf32>
    %77 = tpu.reciprocal %76 {approx = true} : vector<8x1xf32> -> vector<8x1xf32>
    %78 = vector.broadcast %77 : vector<8x1xf32> to vector<8x8xf32>
    %79 = arith.mulf %74, %78 : vector<8x8xf32>
    %80 = arith.truncf %79 : vector<8x8xf32> to vector<8x8xbf16>
    %81 = vector.extract_strided_slice %37 {offsets = [0, 8], sizes = [8, 8], strides = [1, 1]} : vector<8x32xf32> to vector<8x8xf32>
    %82 = arith.truncf %81 : vector<8x8xf32> to vector<8x8xbf16>
    %cst_34 = arith.constant dense<0.000000e+00> : vector<8x8xf32>
    %83 = tpu.matmul %80, %82, %cst_34 {dimension_numbers = #tpu.dot_dimension_numbers<[1], [0], [0], [1], [0, 0, 1, 1], [], []>} : vector<8x8xbf16>, vector<8x8xbf16>, vector<8x8xf32> -> vector<8x8xf32>
    %84 = arith.truncf %83 : vector<8x8xf32> to vector<8x8xbf16>
    %85 = vector.extract_strided_slice %40 {offsets = [8, 0], sizes = [8, 32], strides = [1, 1]} : vector<32x32xbf16> to vector<8x32xbf16>
    %cst_35 = arith.constant dense<0.000000e+00> : vector<8x32xf32>
    %86 = tpu.matmul %84, %85, %cst_35 {dimension_numbers = #tpu.dot_dimension_numbers<[1], [0], [0], [1], [0, 0, 1, 1], [], []>} : vector<8x8xbf16>, vector<8x32xbf16>, vector<8x32xf32> -> vector<8x32xf32>
    %87 = arith.addf %64, %86 : vector<8x32xf32>
    %88 = vector.extract_strided_slice %30 {offsets = [0, 16], sizes = [8, 8], strides = [1, 1]} : vector<8x32xf32> to vector<8x8xf32>
    %89 = vector.extract_strided_slice %36 {offsets = [0, 16], sizes = [8, 8], strides = [1, 1]} : vector<8x32xf32> to vector<8x8xf32>
    %cst_36 = arith.constant dense<0.000000e+00> : vector<8x8xf32>
    %90 = tpu.matmul %88, %89, %cst_36 {dimension_numbers = #tpu.dot_dimension_numbers<[1], [1], [0], [0], [0, 0, 1, 0], [], []>} : vector<8x8xf32>, vector<8x8xf32>, vector<8x8xf32> -> vector<8x8xf32>
    %91 = vector.broadcast %39 : vector<1x8xf32> to vector<8x8xf32>
    %92 = arith.addf %90, %91 : vector<8x8xf32>
    %cst_37 = arith.constant dense<0xFF800000> : vector<8xf32>
    %93 = vector.multi_reduction <maximumf>, %92, %cst_37 [1] : vector<8x8xf32> to vector<8xf32>
    %94 = vector.shape_cast %93 : vector<8xf32> to vector<8x1xf32>
    %95 = vector.broadcast %94 : vector<8x1xf32> to vector<8x8xf32>
    %96 = arith.subf %92, %95 : vector<8x8xf32>
    %97 = math.exp %96 : vector<8x8xf32>
    %cst_38 = arith.constant dense<0.000000e+00> : vector<8xf32>
    %98 = vector.multi_reduction <add>, %97, %cst_38 [1] : vector<8x8xf32> to vector<8xf32>
    %99 = vector.shape_cast %98 : vector<8xf32> to vector<8x1xf32>
    %100 = tpu.reciprocal %99 {approx = true} : vector<8x1xf32> -> vector<8x1xf32>
    %101 = vector.broadcast %100 : vector<8x1xf32> to vector<8x8xf32>
    %102 = arith.mulf %97, %101 : vector<8x8xf32>
    %103 = arith.truncf %102 : vector<8x8xf32> to vector<8x8xbf16>
    %104 = vector.extract_strided_slice %37 {offsets = [0, 16], sizes = [8, 8], strides = [1, 1]} : vector<8x32xf32> to vector<8x8xf32>
    %105 = arith.truncf %104 : vector<8x8xf32> to vector<8x8xbf16>
    %cst_39 = arith.constant dense<0.000000e+00> : vector<8x8xf32>
    %106 = tpu.matmul %103, %105, %cst_39 {dimension_numbers = #tpu.dot_dimension_numbers<[1], [0], [0], [1], [0, 0, 1, 1], [], []>} : vector<8x8xbf16>, vector<8x8xbf16>, vector<8x8xf32> -> vector<8x8xf32>
    %107 = arith.truncf %106 : vector<8x8xf32> to vector<8x8xbf16>
    %108 = vector.extract_strided_slice %40 {offsets = [16, 0], sizes = [8, 32], strides = [1, 1]} : vector<32x32xbf16> to vector<8x32xbf16>
    %cst_40 = arith.constant dense<0.000000e+00> : vector<8x32xf32>
    %109 = tpu.matmul %107, %108, %cst_40 {dimension_numbers = #tpu.dot_dimension_numbers<[1], [0], [0], [1], [0, 0, 1, 1], [], []>} : vector<8x8xbf16>, vector<8x32xbf16>, vector<8x32xf32> -> vector<8x32xf32>
    %110 = arith.addf %87, %109 : vector<8x32xf32>
    %111 = vector.extract_strided_slice %30 {offsets = [0, 24], sizes = [8, 8], strides = [1, 1]} : vector<8x32xf32> to vector<8x8xf32>
    %112 = vector.extract_strided_slice %36 {offsets = [0, 24], sizes = [8, 8], strides = [1, 1]} : vector<8x32xf32> to vector<8x8xf32>
    %cst_41 = arith.constant dense<0.000000e+00> : vector<8x8xf32>
    %113 = tpu.matmul %111, %112, %cst_41 {dimension_numbers = #tpu.dot_dimension_numbers<[1], [1], [0], [0], [0, 0, 1, 0], [], []>} : vector<8x8xf32>, vector<8x8xf32>, vector<8x8xf32> -> vector<8x8xf32>
    %114 = vector.broadcast %39 : vector<1x8xf32> to vector<8x8xf32>
    %115 = arith.addf %113, %114 : vector<8x8xf32>
    %cst_42 = arith.constant dense<0xFF800000> : vector<8xf32>
    %116 = vector.multi_reduction <maximumf>, %115, %cst_42 [1] : vector<8x8xf32> to vector<8xf32>
    %117 = vector.shape_cast %116 : vector<8xf32> to vector<8x1xf32>
    %118 = vector.broadcast %117 : vector<8x1xf32> to vector<8x8xf32>
    %119 = arith.subf %115, %118 : vector<8x8xf32>
    %120 = math.exp %119 : vector<8x8xf32>
    %cst_43 = arith.constant dense<0.000000e+00> : vector<8xf32>
    %121 = vector.multi_reduction <add>, %120, %cst_43 [1] : vector<8x8xf32> to vector<8xf32>
    %122 = vector.shape_cast %121 : vector<8xf32> to vector<8x1xf32>
    %123 = tpu.reciprocal %122 {approx = true} : vector<8x1xf32> -> vector<8x1xf32>
    %124 = vector.broadcast %123 : vector<8x1xf32> to vector<8x8xf32>
    %125 = arith.mulf %120, %124 : vector<8x8xf32>
    %126 = arith.truncf %125 : vector<8x8xf32> to vector<8x8xbf16>
    %127 = vector.extract_strided_slice %37 {offsets = [0, 24], sizes = [8, 8], strides = [1, 1]} : vector<8x32xf32> to vector<8x8xf32>
    %128 = arith.truncf %127 : vector<8x8xf32> to vector<8x8xbf16>
    %cst_44 = arith.constant dense<0.000000e+00> : vector<8x8xf32>
    %129 = tpu.matmul %126, %128, %cst_44 {dimension_numbers = #tpu.dot_dimension_numbers<[1], [0], [0], [1], [0, 0, 1, 1], [], []>} : vector<8x8xbf16>, vector<8x8xbf16>, vector<8x8xf32> -> vector<8x8xf32>
    %130 = arith.truncf %129 : vector<8x8xf32> to vector<8x8xbf16>
    %131 = vector.extract_strided_slice %40 {offsets = [24, 0], sizes = [8, 32], strides = [1, 1]} : vector<32x32xbf16> to vector<8x32xbf16>
    %cst_45 = arith.constant dense<0.000000e+00> : vector<8x32xf32>
    %132 = tpu.matmul %130, %131, %cst_45 {dimension_numbers = #tpu.dot_dimension_numbers<[1], [0], [0], [1], [0, 0, 1, 1], [], []>} : vector<8x8xbf16>, vector<8x32xbf16>, vector<8x32xf32> -> vector<8x32xf32>
    %133 = arith.addf %110, %132 : vector<8x32xf32>
    %134 = arith.addf %1, %133 : vector<8x32xf32>
    %c0_46 = arith.constant 0 : index
    %c0_47 = arith.constant 0 : index
    %135 = vector.load %arg10[%c0_46, %c0_47] : memref<1x32xf32, #tpu.memory_space<vmem>>, vector<1x32xf32>
    %136 = vector.broadcast %135 : vector<1x32xf32> to vector<8x32xf32>
    %137 = arith.addf %134, %136 : vector<8x32xf32>
    %c0_48 = arith.constant 0 : index
    %c0_49 = arith.constant 0 : index
    %c0_50 = arith.constant 0 : index
    %138 = vector.load %arg12[%c0_48, %c0_49, %c0_50] : memref<1x8x32xf32, #tpu.memory_space<vmem>>, vector<1x8x32xf32>
    %139 = vector.shape_cast %138 : vector<1x8x32xf32> to vector<8x32xf32>
    %140 = vector.shape_cast %137 : vector<8x32xf32> to vector<1x8x32xf32>
    tpu.vector_store %arg12[%c0_48, %c0_49, %c0_50], %140 {strides = array<i32>} : memref<1x8x32xf32, #tpu.memory_space<vmem>>, vector<1x8x32xf32>,
    return
  }
  func.func @transform_0(%arg0: i32, %arg1: i32) -> (i32, i32, i32) {
    %c0_i32 = arith.constant 0 : i32
    %c0_i32_0 = arith.constant 0 : i32
    return %arg0, %arg1, %c0_i32 : i32, i32, i32
  }
  func.func @transform_1(%arg0: i32, %arg1: i32) -> (i32, i32) {
    %c0_i32 = arith.constant 0 : i32
    %c0_i32_0 = arith.constant 0 : i32
    %c0_i32_1 = arith.constant 0 : i32
    return %c0_i32, %c0_i32_0 : i32, i32
  }
  func.func @transform_2(%arg0: i32, %arg1: i32) -> (i32, i32) {
    %c0_i32 = arith.constant 0 : i32
    %c0_i32_0 = arith.constant 0 : i32
    %c0_i32_1 = arith.constant 0 : i32
    return %c0_i32, %c0_i32_0 : i32, i32
  }
  func.func @transform_3(%arg0: i32, %arg1: i32) -> (i32, i32) {
    %c0_i32 = arith.constant 0 : i32
    %c0_i32_0 = arith.constant 0 : i32
    %c0_i32_1 = arith.constant 0 : i32
    return %c0_i32, %c0_i32_0 : i32, i32
  }
  func.func @transform_4(%arg0: i32, %arg1: i32) -> (i32, i32) {
    %c0_i32 = arith.constant 0 : i32
    %c0_i32_0 = arith.constant 0 : i32
    %c0_i32_1 = arith.constant 0 : i32
    return %c0_i32, %c0_i32_0 : i32, i32
  }
  func.func @transform_5(%arg0: i32, %arg1: i32) -> (i32, i32) {
    %c0_i32 = arith.constant 0 : i32
    %c0_i32_0 = arith.constant 0 : i32
    %c0_i32_1 = arith.constant 0 : i32
    return %c0_i32, %c0_i32_0 : i32, i32
  }
  func.func @transform_6(%arg0: i32, %arg1: i32) -> (i32, i32) {
    %c0_i32 = arith.constant 0 : i32
    %c0_i32_0 = arith.constant 0 : i32
    %c0_i32_1 = arith.constant 0 : i32
    return %c0_i32, %c0_i32_0 : i32, i32
  }
  func.func @transform_7(%arg0: i32, %arg1: i32) -> (i32, i32) {
    %c0_i32 = arith.constant 0 : i32
    %c0_i32_0 = arith.constant 0 : i32
    %c0_i32_1 = arith.constant 0 : i32
    return %c0_i32, %c0_i32_0 : i32, i32
  }
  func.func @transform_8(%arg0: i32, %arg1: i32) -> (i32, i32) {
    %c0_i32 = arith.constant 0 : i32
    %c0_i32_0 = arith.constant 0 : i32
    %c0_i32_1 = arith.constant 0 : i32
    return %c0_i32, %c0_i32_0 : i32, i32
  }
  func.func @transform_9(%arg0: i32, %arg1: i32) -> (i32, i32, i32) {
    %c0_i32 = arith.constant 0 : i32
    %c0_i32_0 = arith.constant 0 : i32
    %c0_i32_1 = arith.constant 0 : i32
    return %arg0, %c0_i32, %c0_i32_0 : i32, i32, i32
  }
  func.func @transform_10(%arg0: i32, %arg1: i32) -> (i32, i32, i32) {
    %c0_i32 = arith.constant 0 : i32
    %c0_i32_0 = arith.constant 0 : i32
    return %arg0, %arg1, %c0_i32 : i32, i32, i32
  }
}

module attributes {stable_mosaic.version = 11 : i64} {
  func.func @_mha_kernel(%arg0: i32, %arg1: i32, %arg2: memref<1x8x32xf32, #tpu.memory_space<vmem>>, %arg3: memref<1x32xf32, #tpu.memory_space<vmem>>, %arg4: memref<1x32xf32, #tpu.memory_space<vmem>>, %arg5: memref<32x32xbf16, #tpu.memory_space<vmem>>, %arg6: memref<1x32xf32, #tpu.memory_space<vmem>>, %arg7: memref<32x64xbf16, #tpu.memory_space<vmem>>, %arg8: memref<1x64xf32, #tpu.memory_space<vmem>>, %arg9: memref<32x32xbf16, #tpu.memory_space<vmem>>, %arg10: memref<1x32xf32, #tpu.memory_space<vmem>>, %arg11: memref<1x8x8xf32, #tpu.memory_space<vmem>>, %arg12: memref<1x8x32xf32, #tpu.memory_space<vmem>>) attributes {dimension_semantics = [#tpu.dimension_semantics<parallel>, #tpu.dimension_semantics<arbitrary>], iteration_bounds = array<i64: 2, 1>, scalar_prefetch = 0 : i64, scratch_operands = 0 : i64, tpu.core_type = #tpu.core_type<tc>, window_params = [{transform_indices = @transform_0, window_bounds = array<i64: 1, 8, 32>}, {pipeline_mode = #tpu.pipeline_mode<synchronous>, transform_indices = @transform_1, window_bounds = array<i64: 1, 32>}, {pipeline_mode = #tpu.pipeline_mode<synchronous>, transform_indices = @transform_2, window_bounds = array<i64: 1, 32>}, {pipeline_mode = #tpu.pipeline_mode<synchronous>, transform_indices = @transform_3, window_bounds = array<i64: 32, 32>}, {pipeline_mode = #tpu.pipeline_mode<synchronous>, transform_indices = @transform_4, window_bounds = array<i64: 1, 32>}, {pipeline_mode = #tpu.pipeline_mode<synchronous>, transform_indices = @transform_5, window_bounds = array<i64: 32, 64>}, {pipeline_mode = #tpu.pipeline_mode<synchronous>, transform_indices = @transform_6, window_bounds = array<i64: 1, 64>}, {pipeline_mode = #tpu.pipeline_mode<synchronous>, transform_indices = @transform_7, window_bounds = array<i64: 32, 32>}, {pipeline_mode = #tpu.pipeline_mode<synchronous>, transform_indices = @transform_8, window_bounds = array<i64: 1, 32>}, {transform_indices = @transform_9, window_bounds = array<i64: 1, 8, 8>}, {transform_indices = @transform_10, window_bounds = array<i64: 1, 8, 32>}]} {
    %c0 = arith.constant 0 : index
    %c0_0 = arith.constant 0 : index
    %c0_1 = arith.constant 0 : index
    %0 = vector.load %arg2[%c0, %c0_0, %c0_1] : memref<1x8x32xf32, #tpu.memory_space<vmem>>, vector<1x8x32xf32>
    %1 = vector.shape_cast %0 : vector<1x8x32xf32> to vector<8x32xf32>
    %c0_2 = arith.constant 0 : index
    %c0_3 = arith.constant 0 : index
    %2 = vector.load %arg3[%c0_2, %c0_3] : memref<1x32xf32, #tpu.memory_space<vmem>>, vector<1x32xf32>
    %c0_4 = arith.constant 0 : index
    %c0_5 = arith.constant 0 : index
    %3 = vector.load %arg4[%c0_4, %c0_5] : memref<1x32xf32, #tpu.memory_space<vmem>>, vector<1x32xf32>
    %cst = arith.constant dense<0.000000e+00> : vector<8xf32>
    %4 = vector.multi_reduction <add>, %1, %cst [1] : vector<8x32xf32> to vector<8xf32>
    %5 = vector.shape_cast %4 : vector<8xf32> to vector<8x1xf32>
    %cst_6 = arith.constant 3.200000e+01 : f32
    %6 = vector.broadcast %cst_6 : f32 to vector<8x1xf32>
    %7 = arith.divf %5, %6 : vector<8x1xf32>
    %8 = vector.broadcast %7 : vector<8x1xf32> to vector<8x32xf32>
    %9 = arith.subf %1, %8 : vector<8x32xf32>
    %10 = arith.mulf %9, %9 : vector<8x32xf32>
    %cst_7 = arith.constant dense<0.000000e+00> : vector<8xf32>
    %11 = vector.multi_reduction <add>, %10, %cst_7 [1] : vector<8x32xf32> to vector<8xf32>
    %12 = vector.shape_cast %11 : vector<8xf32> to vector<8x1xf32>
    %cst_8 = arith.constant 3.100000e+01 : f32
    %13 = vector.broadcast %cst_8 : f32 to vector<8x1xf32>
    %14 = arith.divf %12, %13 : vector<8x1xf32>
    %15 = math.sqrt %14 : vector<8x1xf32>
    %cst_9 = arith.constant 9.99999997E-7 : f32
    %16 = vector.broadcast %cst_9 : f32 to vector<8x1xf32>
    %17 = arith.addf %15, %16 : vector<8x1xf32>
    %18 = tpu.reciprocal %17 : vector<8x1xf32> -> vector<8x1xf32>
    %19 = vector.broadcast %2 : vector<1x32xf32> to vector<8x32xf32>
    %20 = arith.mulf %19, %9 : vector<8x32xf32>
    %21 = vector.broadcast %18 : vector<8x1xf32> to vector<8x32xf32>
    %22 = arith.mulf %20, %21 : vector<8x32xf32>
    %23 = vector.broadcast %3 : vector<1x32xf32> to vector<8x32xf32>
    %24 = arith.addf %22, %23 : vector<8x32xf32>
    %25 = arith.truncf %24 : vector<8x32xf32> to vector<8x32xbf16>
    %c0_10 = arith.constant 0 : index
    %c0_11 = arith.constant 0 : index
    %26 = vector.load %arg5[%c0_10, %c0_11] : memref<32x32xbf16, #tpu.memory_space<vmem>>, vector<32x32xbf16>
    %cst_12 = arith.constant dense<0.000000e+00> : vector<8x32xf32>
    %27 = tpu.matmul %25, %26, %cst_12 {dimension_numbers = #tpu.dot_dimension_numbers<[1], [0], [0], [1], [0, 0, 1, 1], [], []>} : vector<8x32xbf16>, vector<32x32xbf16>, vector<8x32xf32> -> vector<8x32xf32>
    %c0_13 = arith.constant 0 : index
    %c0_14 = arith.constant 0 : index
    %28 = vector.load %arg6[%c0_13, %c0_14] : memref<1x32xf32, #tpu.memory_space<vmem>>, vector<1x32xf32>
    %29 = vector.broadcast %28 : vector<1x32xf32> to vector<8x32xf32>
    %30 = arith.addf %27, %29 : vector<8x32xf32>
    %c0_15 = arith.constant 0 : index
    %c0_16 = arith.constant 0 : index
    %31 = vector.load %arg7[%c0_15, %c0_16] : memref<32x64xbf16, #tpu.memory_space<vmem>>, vector<32x64xbf16>
    %cst_17 = arith.constant dense<0.000000e+00> : vector<8x64xf32>
    %32 = tpu.matmul %25, %31, %cst_17 {dimension_numbers = #tpu.dot_dimension_numbers<[1], [0], [0], [1], [0, 0, 1, 1], [], []>} : vector<8x32xbf16>, vector<32x64xbf16>, vector<8x64xf32> -> vector<8x64xf32>
    %c0_18 = arith.constant 0 : index
    %c0_19 = arith.constant 0 : index
    %33 = vector.load %arg8[%c0_18, %c0_19] : memref<1x64xf32, #tpu.memory_space<vmem>>, vector<1x64xf32>
    %34 = vector.broadcast %33 : vector<1x64xf32> to vector<8x64xf32>
    %35 = arith.addf %32, %34 : vector<8x64xf32>
    %36 = vector.extract_strided_slice %35 {offsets = [0, 0], sizes = [8, 32], strides = [1, 1]} : vector<8x64xf32> to vector<8x32xf32>
    %37 = vector.extract_strided_slice %35 {offsets = [0, 32], sizes = [8, 32], strides = [1, 1]} : vector<8x64xf32> to vector<8x32xf32>
    %c0_20 = arith.constant 0 : index
    %c0_21 = arith.constant 0 : index
    %c0_22 = arith.constant 0 : index
    %38 = vector.load %arg11[%c0_20, %c0_21, %c0_22] : memref<1x8x8xf32, #tpu.memory_space<vmem>>, vector<1x8x8xf32>
    %39 = vector.shape_cast %38 : vector<1x8x8xf32> to vector<8x8xf32>
    %c0_23 = arith.constant 0 : index
    %c0_24 = arith.constant 0 : index
    %40 = vector.load %arg9[%c0_23, %c0_24] : memref<32x32xbf16, #tpu.memory_space<vmem>>, vector<32x32xbf16>
    %cst_25 = arith.constant 0.000000e+00 : f32
    %41 = vector.broadcast %cst_25 : f32 to vector<8x32xf32>
    %42 = vector.extract_strided_slice %30 {offsets = [0, 0], sizes = [8, 8], strides = [1, 1]} : vector<8x32xf32> to vector<8x8xf32>
    %43 = vector.extract_strided_slice %36 {offsets = [0, 0], sizes = [8, 8], strides = [1, 1]} : vector<8x32xf32> to vector<8x8xf32>
    %cst_26 = arith.constant dense<0.000000e+00> : vector<8x8xf32>
    %44 = tpu.matmul %42, %43, %cst_26 {dimension_numbers = #tpu.dot_dimension_numbers<[1], [1], [0], [0], [0, 0, 1, 0], [], []>} : vector<8x8xf32>, vector<8x8xf32>, vector<8x8xf32> -> vector<8x8xf32>
    %45 = arith.addf %44, %39 : vector<8x8xf32>
    %cst_27 = arith.constant dense<0xFF800000> : vector<8xf32>
    %46 = vector.multi_reduction <maximumf>, %45, %cst_27 [1] : vector<8x8xf32> to vector<8xf32>
    %47 = vector.shape_cast %46 : vector<8xf32> to vector<8x1xf32>
    %48 = vector.broadcast %47 : vector<8x1xf32> to vector<8x8xf32>
    %49 = arith.subf %45, %48 : vector<8x8xf32>
    %50 = math.exp %49 : vector<8x8xf32>
    %cst_28 = arith.constant dense<0.000000e+00> : vector<8xf32>
    %51 = vector.multi_reduction <add>, %50, %cst_28 [1] : vector<8x8xf32> to vector<8xf32>
    %52 = vector.shape_cast %51 : vector<8xf32> to vector<8x1xf32>
    %53 = tpu.reciprocal %52 {approx = true} : vector<8x1xf32> -> vector<8x1xf32>
    %54 = vector.broadcast %53 : vector<8x1xf32> to vector<8x8xf32>
    %55 = arith.mulf %50, %54 : vector<8x8xf32>
    %56 = arith.truncf %55 : vector<8x8xf32> to vector<8x8xbf16>
    %57 = vector.extract_strided_slice %37 {offsets = [0, 0], sizes = [8, 8], strides = [1, 1]} : vector<8x32xf32> to vector<8x8xf32>
    %58 = arith.truncf %57 : vector<8x8xf32> to vector<8x8xbf16>
    %cst_29 = arith.constant dense<0.000000e+00> : vector<8x8xf32>
    %59 = tpu.matmul %56, %58, %cst_29 {dimension_numbers = #tpu.dot_dimension_numbers<[1], [0], [0], [1], [0, 0, 1, 1], [], []>} : vector<8x8xbf16>, vector<8x8xbf16>, vector<8x8xf32> -> vector<8x8xf32>
    %60 = arith.truncf %59 : vector<8x8xf32> to vector<8x8xbf16>
    %61 = vector.extract_strided_slice %40 {offsets = [0, 0], sizes = [8, 32], strides = [1, 1]} : vector<32x32xbf16> to vector<8x32xbf16>
    %cst_30 = arith.constant dense<0.000000e+00> : vector<8x32xf32>
    %62 = tpu.matmul %60, %61, %cst_30 {dimension_numbers = #tpu.dot_dimension_numbers<[1], [0], [0], [1], [0, 0, 1, 1], [], []>} : vector<8x8xbf16>, vector<8x32xbf16>, vector<8x32xf32> -> vector<8x32xf32>
    %63 = arith.addf %41, %62 : vector<8x32xf32>
    %64 = vector.extract_strided_slice %30 {offsets = [0, 8], sizes = [8, 8], strides = [1, 1]} : vector<8x32xf32> to vector<8x8xf32>
    %65 = vector.extract_strided_slice %36 {offsets = [0, 8], sizes = [8, 8], strides = [1, 1]} : vector<8x32xf32> to vector<8x8xf32>
    %cst_31 = arith.constant dense<0.000000e+00> : vector<8x8xf32>
    %66 = tpu.matmul %64, %65, %cst_31 {dimension_numbers = #tpu.dot_dimension_numbers<[1], [1], [0], [0], [0, 0, 1, 0], [], []>} : vector<8x8xf32>, vector<8x8xf32>, vector<8x8xf32> -> vector<8x8xf32>
    %67 = arith.addf %66, %39 : vector<8x8xf32>
    %cst_32 = arith.constant dense<0xFF800000> : vector<8xf32>
    %68 = vector.multi_reduction <maximumf>, %67, %cst_32 [1] : vector<8x8xf32> to vector<8xf32>
    %69 = vector.shape_cast %68 : vector<8xf32> to vector<8x1xf32>
    %70 = vector.broadcast %69 : vector<8x1xf32> to vector<8x8xf32>
    %71 = arith.subf %67, %70 : vector<8x8xf32>
    %72 = math.exp %71 : vector<8x8xf32>
    %cst_33 = arith.constant dense<0.000000e+00> : vector<8xf32>
    %73 = vector.multi_reduction <add>, %72, %cst_33 [1] : vector<8x8xf32> to vector<8xf32>
    %74 = vector.shape_cast %73 : vector<8xf32> to vector<8x1xf32>
    %75 = tpu.reciprocal %74 {approx = true} : vector<8x1xf32> -> vector<8x1xf32>
    %76 = vector.broadcast %75 : vector<8x1xf32> to vector<8x8xf32>
    %77 = arith.mulf %72, %76 : vector<8x8xf32>
    %78 = arith.truncf %77 : vector<8x8xf32> to vector<8x8xbf16>
    %79 = vector.extract_strided_slice %37 {offsets = [0, 8], sizes = [8, 8], strides = [1, 1]} : vector<8x32xf32> to vector<8x8xf32>
    %80 = arith.truncf %79 : vector<8x8xf32> to vector<8x8xbf16>
    %cst_34 = arith.constant dense<0.000000e+00> : vector<8x8xf32>
    %81 = tpu.matmul %78, %80, %cst_34 {dimension_numbers = #tpu.dot_dimension_numbers<[1], [0], [0], [1], [0, 0, 1, 1], [], []>} : vector<8x8xbf16>, vector<8x8xbf16>, vector<8x8xf32> -> vector<8x8xf32>
    %82 = arith.truncf %81 : vector<8x8xf32> to vector<8x8xbf16>
    %83 = vector.extract_strided_slice %40 {offsets = [8, 0], sizes = [8, 32], strides = [1, 1]} : vector<32x32xbf16> to vector<8x32xbf16>
    %cst_35 = arith.constant dense<0.000000e+00> : vector<8x32xf32>
    %84 = tpu.matmul %82, %83, %cst_35 {dimension_numbers = #tpu.dot_dimension_numbers<[1], [0], [0], [1], [0, 0, 1, 1], [], []>} : vector<8x8xbf16>, vector<8x32xbf16>, vector<8x32xf32> -> vector<8x32xf32>
    %85 = arith.addf %63, %84 : vector<8x32xf32>
    %86 = vector.extract_strided_slice %30 {offsets = [0, 16], sizes = [8, 8], strides = [1, 1]} : vector<8x32xf32> to vector<8x8xf32>
    %87 = vector.extract_strided_slice %36 {offsets = [0, 16], sizes = [8, 8], strides = [1, 1]} : vector<8x32xf32> to vector<8x8xf32>
    %cst_36 = arith.constant dense<0.000000e+00> : vector<8x8xf32>
    %88 = tpu.matmul %86, %87, %cst_36 {dimension_numbers = #tpu.dot_dimension_numbers<[1], [1], [0], [0], [0, 0, 1, 0], [], []>} : vector<8x8xf32>, vector<8x8xf32>, vector<8x8xf32> -> vector<8x8xf32>
    %89 = arith.addf %88, %39 : vector<8x8xf32>
    %cst_37 = arith.constant dense<0xFF800000> : vector<8xf32>
    %90 = vector.multi_reduction <maximumf>, %89, %cst_37 [1] : vector<8x8xf32> to vector<8xf32>
    %91 = vector.shape_cast %90 : vector<8xf32> to vector<8x1xf32>
    %92 = vector.broadcast %91 : vector<8x1xf32> to vector<8x8xf32>
    %93 = arith.subf %89, %92 : vector<8x8xf32>
    %94 = math.exp %93 : vector<8x8xf32>
    %cst_38 = arith.constant dense<0.000000e+00> : vector<8xf32>
    %95 = vector.multi_reduction <add>, %94, %cst_38 [1] : vector<8x8xf32> to vector<8xf32>
    %96 = vector.shape_cast %95 : vector<8xf32> to vector<8x1xf32>
    %97 = tpu.reciprocal %96 {approx = true} : vector<8x1xf32> -> vector<8x1xf32>
    %98 = vector.broadcast %97 : vector<8x1xf32> to vector<8x8xf32>
    %99 = arith.mulf %94, %98 : vector<8x8xf32>
    %100 = arith.truncf %99 : vector<8x8xf32> to vector<8x8xbf16>
    %101 = vector.extract_strided_slice %37 {offsets = [0, 16], sizes = [8, 8], strides = [1, 1]} : vector<8x32xf32> to vector<8x8xf32>
    %102 = arith.truncf %101 : vector<8x8xf32> to vector<8x8xbf16>
    %cst_39 = arith.constant dense<0.000000e+00> : vector<8x8xf32>
    %103 = tpu.matmul %100, %102, %cst_39 {dimension_numbers = #tpu.dot_dimension_numbers<[1], [0], [0], [1], [0, 0, 1, 1], [], []>} : vector<8x8xbf16>, vector<8x8xbf16>, vector<8x8xf32> -> vector<8x8xf32>
    %104 = arith.truncf %103 : vector<8x8xf32> to vector<8x8xbf16>
    %105 = vector.extract_strided_slice %40 {offsets = [16, 0], sizes = [8, 32], strides = [1, 1]} : vector<32x32xbf16> to vector<8x32xbf16>
    %cst_40 = arith.constant dense<0.000000e+00> : vector<8x32xf32>
    %106 = tpu.matmul %104, %105, %cst_40 {dimension_numbers = #tpu.dot_dimension_numbers<[1], [0], [0], [1], [0, 0, 1, 1], [], []>} : vector<8x8xbf16>, vector<8x32xbf16>, vector<8x32xf32> -> vector<8x32xf32>
    %107 = arith.addf %85, %106 : vector<8x32xf32>
    %108 = vector.extract_strided_slice %30 {offsets = [0, 24], sizes = [8, 8], strides = [1, 1]} : vector<8x32xf32> to vector<8x8xf32>
    %109 = vector.extract_strided_slice %36 {offsets = [0, 24], sizes = [8, 8], strides = [1, 1]} : vector<8x32xf32> to vector<8x8xf32>
    %cst_41 = arith.constant dense<0.000000e+00> : vector<8x8xf32>
    %110 = tpu.matmul %108, %109, %cst_41 {dimension_numbers = #tpu.dot_dimension_numbers<[1], [1], [0], [0], [0, 0, 1, 0], [], []>} : vector<8x8xf32>, vector<8x8xf32>, vector<8x8xf32> -> vector<8x8xf32>
    %111 = arith.addf %110, %39 : vector<8x8xf32>
    %cst_42 = arith.constant dense<0xFF800000> : vector<8xf32>
    %112 = vector.multi_reduction <maximumf>, %111, %cst_42 [1] : vector<8x8xf32> to vector<8xf32>
    %113 = vector.shape_cast %112 : vector<8xf32> to vector<8x1xf32>
    %114 = vector.broadcast %113 : vector<8x1xf32> to vector<8x8xf32>
    %115 = arith.subf %111, %114 : vector<8x8xf32>
    %116 = math.exp %115 : vector<8x8xf32>
    %cst_43 = arith.constant dense<0.000000e+00> : vector<8xf32>
    %117 = vector.multi_reduction <add>, %116, %cst_43 [1] : vector<8x8xf32> to vector<8xf32>
    %118 = vector.shape_cast %117 : vector<8xf32> to vector<8x1xf32>
    %119 = tpu.reciprocal %118 {approx = true} : vector<8x1xf32> -> vector<8x1xf32>
    %120 = vector.broadcast %119 : vector<8x1xf32> to vector<8x8xf32>
    %121 = arith.mulf %116, %120 : vector<8x8xf32>
    %122 = arith.truncf %121 : vector<8x8xf32> to vector<8x8xbf16>
    %123 = vector.extract_strided_slice %37 {offsets = [0, 24], sizes = [8, 8], strides = [1, 1]} : vector<8x32xf32> to vector<8x8xf32>
    %124 = arith.truncf %123 : vector<8x8xf32> to vector<8x8xbf16>
    %cst_44 = arith.constant dense<0.000000e+00> : vector<8x8xf32>
    %125 = tpu.matmul %122, %124, %cst_44 {dimension_numbers = #tpu.dot_dimension_numbers<[1], [0], [0], [1], [0, 0, 1, 1], [], []>} : vector<8x8xbf16>, vector<8x8xbf16>, vector<8x8xf32> -> vector<8x8xf32>
    %126 = arith.truncf %125 : vector<8x8xf32> to vector<8x8xbf16>
    %127 = vector.extract_strided_slice %40 {offsets = [24, 0], sizes = [8, 32], strides = [1, 1]} : vector<32x32xbf16> to vector<8x32xbf16>
    %cst_45 = arith.constant dense<0.000000e+00> : vector<8x32xf32>
    %128 = tpu.matmul %126, %127, %cst_45 {dimension_numbers = #tpu.dot_dimension_numbers<[1], [0], [0], [1], [0, 0, 1, 1], [], []>} : vector<8x8xbf16>, vector<8x32xbf16>, vector<8x32xf32> -> vector<8x32xf32>
    %129 = arith.addf %107, %128 : vector<8x32xf32>
    %130 = arith.addf %1, %129 : vector<8x32xf32>
    %c0_46 = arith.constant 0 : index
    %c0_47 = arith.constant 0 : index
    %131 = vector.load %arg10[%c0_46, %c0_47] : memref<1x32xf32, #tpu.memory_space<vmem>>, vector<1x32xf32>
    %132 = vector.broadcast %131 : vector<1x32xf32> to vector<8x32xf32>
    %133 = arith.addf %130, %132 : vector<8x32xf32>
    %c0_48 = arith.constant 0 : index
    %c0_49 = arith.constant 0 : index
    %c0_50 = arith.constant 0 : index
    %134 = vector.load %arg12[%c0_48, %c0_49, %c0_50] : memref<1x8x32xf32, #tpu.memory_space<vmem>>, vector<1x8x32xf32>
    %135 = vector.shape_cast %134 : vector<1x8x32xf32> to vector<8x32xf32>
    %136 = vector.shape_cast %133 : vector<8x32xf32> to vector<1x8x32xf32>
    tpu.vector_store %arg12[%c0_48, %c0_49, %c0_50], %136 {strides = array<i32>} : memref<1x8x32xf32, #tpu.memory_space<vmem>>, vector<1x8x32xf32>,
    return
  }
  func.func @transform_0(%arg0: i32, %arg1: i32) -> (i32, i32, i32) {
    %c0_i32 = arith.constant 0 : i32
    %c0_i32_0 = arith.constant 0 : i32
    return %arg0, %arg1, %c0_i32 : i32, i32, i32
  }
  func.func @transform_1(%arg0: i32, %arg1: i32) -> (i32, i32) {
    %c0_i32 = arith.constant 0 : i32
    %c0_i32_0 = arith.constant 0 : i32
    %c0_i32_1 = arith.constant 0 : i32
    return %c0_i32, %c0_i32_0 : i32, i32
  }
  func.func @transform_2(%arg0: i32, %arg1: i32) -> (i32, i32) {
    %c0_i32 = arith.constant 0 : i32
    %c0_i32_0 = arith.constant 0 : i32
    %c0_i32_1 = arith.constant 0 : i32
    return %c0_i32, %c0_i32_0 : i32, i32
  }
  func.func @transform_3(%arg0: i32, %arg1: i32) -> (i32, i32) {
    %c0_i32 = arith.constant 0 : i32
    %c0_i32_0 = arith.constant 0 : i32
    %c0_i32_1 = arith.constant 0 : i32
    return %c0_i32, %c0_i32_0 : i32, i32
  }
  func.func @transform_4(%arg0: i32, %arg1: i32) -> (i32, i32) {
    %c0_i32 = arith.constant 0 : i32
    %c0_i32_0 = arith.constant 0 : i32
    %c0_i32_1 = arith.constant 0 : i32
    return %c0_i32, %c0_i32_0 : i32, i32
  }
  func.func @transform_5(%arg0: i32, %arg1: i32) -> (i32, i32) {
    %c0_i32 = arith.constant 0 : i32
    %c0_i32_0 = arith.constant 0 : i32
    %c0_i32_1 = arith.constant 0 : i32
    return %c0_i32, %c0_i32_0 : i32, i32
  }
  func.func @transform_6(%arg0: i32, %arg1: i32) -> (i32, i32) {
    %c0_i32 = arith.constant 0 : i32
    %c0_i32_0 = arith.constant 0 : i32
    %c0_i32_1 = arith.constant 0 : i32
    return %c0_i32, %c0_i32_0 : i32, i32
  }
  func.func @transform_7(%arg0: i32, %arg1: i32) -> (i32, i32) {
    %c0_i32 = arith.constant 0 : i32
    %c0_i32_0 = arith.constant 0 : i32
    %c0_i32_1 = arith.constant 0 : i32
    return %c0_i32, %c0_i32_0 : i32, i32
  }
  func.func @transform_8(%arg0: i32, %arg1: i32) -> (i32, i32) {
    %c0_i32 = arith.constant 0 : i32
    %c0_i32_0 = arith.constant 0 : i32
    %c0_i32_1 = arith.constant 0 : i32
    return %c0_i32, %c0_i32_0 : i32, i32
  }
  func.func @transform_9(%arg0: i32, %arg1: i32) -> (i32, i32, i32) {
    %c0_i32 = arith.constant 0 : i32
    %c0_i32_0 = arith.constant 0 : i32
    return %arg0, %arg1, %c0_i32 : i32, i32, i32
  }
  func.func @transform_10(%arg0: i32, %arg1: i32) -> (i32, i32, i32) {
    %c0_i32 = arith.constant 0 : i32
    %c0_i32_0 = arith.constant 0 : i32
    return %arg0, %arg1, %c0_i32 : i32, i32, i32
  }
}

module attributes {stable_mosaic.version = 11 : i64} {
  func.func @_mha_kernel(%arg0: i32, %arg1: i32, %arg2: memref<1x8x32xf32, #tpu.memory_space<vmem>>, %arg3: memref<1x8x32xf32, #tpu.memory_space<vmem>>, %arg4: memref<1x32xf32, #tpu.memory_space<vmem>>, %arg5: memref<1x32xf32, #tpu.memory_space<vmem>>, %arg6: memref<32x32xbf16, #tpu.memory_space<vmem>>, %arg7: memref<1x32xf32, #tpu.memory_space<vmem>>, %arg8: memref<32x64xbf16, #tpu.memory_space<vmem>>, %arg9: memref<1x64xf32, #tpu.memory_space<vmem>>, %arg10: memref<32x32xbf16, #tpu.memory_space<vmem>>, %arg11: memref<1x32xf32, #tpu.memory_space<vmem>>, %arg12: memref<1x1x8xf32, #tpu.memory_space<vmem>>, %arg13: memref<1x8x32xf32, #tpu.memory_space<vmem>>) attributes {dimension_semantics = [#tpu.dimension_semantics<parallel>, #tpu.dimension_semantics<arbitrary>], iteration_bounds = array<i64: 2, 1>, scalar_prefetch = 0 : i64, scratch_operands = 0 : i64, tpu.core_type = #tpu.core_type<tc>, window_params = [{transform_indices = @transform_0, window_bounds = array<i64: 1, 8, 32>}, {transform_indices = @transform_1, window_bounds = array<i64: 1, 8, 32>}, {pipeline_mode = #tpu.pipeline_mode<synchronous>, transform_indices = @transform_2, window_bounds = array<i64: 1, 32>}, {pipeline_mode = #tpu.pipeline_mode<synchronous>, transform_indices = @transform_3, window_bounds = array<i64: 1, 32>}, {pipeline_mode = #tpu.pipeline_mode<synchronous>, transform_indices = @transform_4, window_bounds = array<i64: 32, 32>}, {pipeline_mode = #tpu.pipeline_mode<synchronous>, transform_indices = @transform_5, window_bounds = array<i64: 1, 32>}, {pipeline_mode = #tpu.pipeline_mode<synchronous>, transform_indices = @transform_6, window_bounds = array<i64: 32, 64>}, {pipeline_mode = #tpu.pipeline_mode<synchronous>, transform_indices = @transform_7, window_bounds = array<i64: 1, 64>}, {pipeline_mode = #tpu.pipeline_mode<synchronous>, transform_indices = @transform_8, window_bounds = array<i64: 32, 32>}, {pipeline_mode = #tpu.pipeline_mode<synchronous>, transform_indices = @transform_9, window_bounds = array<i64: 1, 32>}, {transform_indices = @transform_10, window_bounds = array<i64: 1, 1, 8>}, {transform_indices = @transform_11, window_bounds = array<i64: 1, 8, 32>}]} {
    %c0 = arith.constant 0 : index
    %c0_0 = arith.constant 0 : index
    %c0_1 = arith.constant 0 : index
    %0 = vector.load %arg2[%c0, %c0_0, %c0_1] : memref<1x8x32xf32, #tpu.memory_space<vmem>>, vector<1x8x32xf32>
    %1 = vector.shape_cast %0 : vector<1x8x32xf32> to vector<8x32xf32>
    %c0_2 = arith.constant 0 : index
    %c0_3 = arith.constant 0 : index
    %2 = vector.load %arg4[%c0_2, %c0_3] : memref<1x32xf32, #tpu.memory_space<vmem>>, vector<1x32xf32>
    %c0_4 = arith.constant 0 : index
    %c0_5 = arith.constant 0 : index
    %3 = vector.load %arg5[%c0_4, %c0_5] : memref<1x32xf32, #tpu.memory_space<vmem>>, vector<1x32xf32>
    %cst = arith.constant dense<0.000000e+00> : vector<8xf32>
    %4 = vector.multi_reduction <add>, %1, %cst [1] : vector<8x32xf32> to vector<8xf32>
    %5 = vector.shape_cast %4 : vector<8xf32> to vector<8x1xf32>
    %cst_6 = arith.constant 3.200000e+01 : f32
    %6 = vector.broadcast %cst_6 : f32 to vector<8x1xf32>
    %7 = arith.divf %5, %6 : vector<8x1xf32>
    %8 = vector.broadcast %7 : vector<8x1xf32> to vector<8x32xf32>
    %9 = arith.subf %1, %8 : vector<8x32xf32>
    %10 = arith.mulf %9, %9 : vector<8x32xf32>
    %cst_7 = arith.constant dense<0.000000e+00> : vector<8xf32>
    %11 = vector.multi_reduction <add>, %10, %cst_7 [1] : vector<8x32xf32> to vector<8xf32>
    %12 = vector.shape_cast %11 : vector<8xf32> to vector<8x1xf32>
    %cst_8 = arith.constant 3.100000e+01 : f32
    %13 = vector.broadcast %cst_8 : f32 to vector<8x1xf32>
    %14 = arith.divf %12, %13 : vector<8x1xf32>
    %15 = math.sqrt %14 : vector<8x1xf32>
    %cst_9 = arith.constant 9.99999997E-7 : f32
    %16 = vector.broadcast %cst_9 : f32 to vector<8x1xf32>
    %17 = arith.addf %15, %16 : vector<8x1xf32>
    %18 = tpu.reciprocal %17 : vector<8x1xf32> -> vector<8x1xf32>
    %19 = vector.broadcast %2 : vector<1x32xf32> to vector<8x32xf32>
    %20 = arith.mulf %19, %9 : vector<8x32xf32>
    %21 = vector.broadcast %18 : vector<8x1xf32> to vector<8x32xf32>
    %22 = arith.mulf %20, %21 : vector<8x32xf32>
    %23 = vector.broadcast %3 : vector<1x32xf32> to vector<8x32xf32>
    %24 = arith.addf %22, %23 : vector<8x32xf32>
    %25 = arith.truncf %24 : vector<8x32xf32> to vector<8x32xbf16>
    %c0_10 = arith.constant 0 : index
    %c0_11 = arith.constant 0 : index
    %c0_12 = arith.constant 0 : index
    %26 = vector.load %arg3[%c0_10, %c0_11, %c0_12] : memref<1x8x32xf32, #tpu.memory_space<vmem>>, vector<1x8x32xf32>
    %27 = vector.shape_cast %26 : vector<1x8x32xf32> to vector<8x32xf32>
    %28 = arith.truncf %27 : vector<8x32xf32> to vector<8x32xbf16>
    %c0_13 = arith.constant 0 : index
    %c0_14 = arith.constant 0 : index
    %29 = vector.load %arg6[%c0_13, %c0_14] : memref<32x32xbf16, #tpu.memory_space<vmem>>, vector<32x32xbf16>
    %cst_15 = arith.constant dense<0.000000e+00> : vector<8x32xf32>
    %30 = tpu.matmul %25, %29, %cst_15 {dimension_numbers = #tpu.dot_dimension_numbers<[1], [0], [0], [1], [0, 0, 1, 1], [], []>} : vector<8x32xbf16>, vector<32x32xbf16>, vector<8x32xf32> -> vector<8x32xf32>
    %c0_16 = arith.constant 0 : index
    %c0_17 = arith.constant 0 : index
    %31 = vector.load %arg7[%c0_16, %c0_17] : memref<1x32xf32, #tpu.memory_space<vmem>>, vector<1x32xf32>
    %32 = vector.broadcast %31 : vector<1x32xf32> to vector<8x32xf32>
    %33 = arith.addf %30, %32 : vector<8x32xf32>
    %c0_18 = arith.constant 0 : index
    %c0_19 = arith.constant 0 : index
    %34 = vector.load %arg8[%c0_18, %c0_19] : memref<32x64xbf16, #tpu.memory_space<vmem>>, vector<32x64xbf16>
    %cst_20 = arith.constant dense<0.000000e+00> : vector<8x64xf32>
    %35 = tpu.matmul %28, %34, %cst_20 {dimension_numbers = #tpu.dot_dimension_numbers<[1], [0], [0], [1], [0, 0, 1, 1], [], []>} : vector<8x32xbf16>, vector<32x64xbf16>, vector<8x64xf32> -> vector<8x64xf32>
    %c0_21 = arith.constant 0 : index
    %c0_22 = arith.constant 0 : index
    %36 = vector.load %arg9[%c0_21, %c0_22] : memref<1x64xf32, #tpu.memory_space<vmem>>, vector<1x64xf32>
    %37 = vector.broadcast %36 : vector<1x64xf32> to vector<8x64xf32>
    %38 = arith.addf %35, %37 : vector<8x64xf32>
    %39 = vector.extract_strided_slice %38 {offsets = [0, 0], sizes = [8, 32], strides = [1, 1]} : vector<8x64xf32> to vector<8x32xf32>
    %40 = vector.extract_strided_slice %38 {offsets = [0, 32], sizes = [8, 32], strides = [1, 1]} : vector<8x64xf32> to vector<8x32xf32>
    %c0_23 = arith.constant 0 : index
    %c0_24 = arith.constant 0 : index
    %c0_25 = arith.constant 0 : index
    %41 = vector.load %arg12[%c0_23, %c0_24, %c0_25] : memref<1x1x8xf32, #tpu.memory_space<vmem>>, vector<1x1x8xf32>
    %42 = vector.shape_cast %41 : vector<1x1x8xf32> to vector<1x8xf32>
    %c0_26 = arith.constant 0 : index
    %c0_27 = arith.constant 0 : index
    %43 = vector.load %arg10[%c0_26, %c0_27] : memref<32x32xbf16, #tpu.memory_space<vmem>>, vector<32x32xbf16>
    %cst_28 = arith.constant 0.000000e+00 : f32
    %44 = vector.broadcast %cst_28 : f32 to vector<8x32xf32>
    %45 = vector.extract_strided_slice %33 {offsets = [0, 0], sizes = [8, 8], strides = [1, 1]} : vector<8x32xf32> to vector<8x8xf32>
    %46 = vector.extract_strided_slice %39 {offsets = [0, 0], sizes = [8, 8], strides = [1, 1]} : vector<8x32xf32> to vector<8x8xf32>
    %cst_29 = arith.constant dense<0.000000e+00> : vector<8x8xf32>
    %47 = tpu.matmul %45, %46, %cst_29 {dimension_numbers = #tpu.dot_dimension_numbers<[1], [1], [0], [0], [0, 0, 1, 0], [], []>} : vector<8x8xf32>, vector<8x8xf32>, vector<8x8xf32> -> vector<8x8xf32>
    %48 = vector.broadcast %42 : vector<1x8xf32> to vector<8x8xf32>
    %49 = arith.addf %47, %48 : vector<8x8xf32>
    %cst_30 = arith.constant dense<0xFF800000> : vector<8xf32>
    %50 = vector.multi_reduction <maximumf>, %49, %cst_30 [1] : vector<8x8xf32> to vector<8xf32>
    %51 = vector.shape_cast %50 : vector<8xf32> to vector<8x1xf32>
    %52 = vector.broadcast %51 : vector<8x1xf32> to vector<8x8xf32>
    %53 = arith.subf %49, %52 : vector<8x8xf32>
    %54 = math.exp %53 : vector<8x8xf32>
    %cst_31 = arith.constant dense<0.000000e+00> : vector<8xf32>
    %55 = vector.multi_reduction <add>, %54, %cst_31 [1] : vector<8x8xf32> to vector<8xf32>
    %56 = vector.shape_cast %55 : vector<8xf32> to vector<8x1xf32>
    %57 = tpu.reciprocal %56 {approx = true} : vector<8x1xf32> -> vector<8x1xf32>
    %58 = vector.broadcast %57 : vector<8x1xf32> to vector<8x8xf32>
    %59 = arith.mulf %54, %58 : vector<8x8xf32>
    %60 = arith.truncf %59 : vector<8x8xf32> to vector<8x8xbf16>
    %61 = vector.extract_strided_slice %40 {offsets = [0, 0], sizes = [8, 8], strides = [1, 1]} : vector<8x32xf32> to vector<8x8xf32>
    %62 = arith.truncf %61 : vector<8x8xf32> to vector<8x8xbf16>
    %cst_32 = arith.constant dense<0.000000e+00> : vector<8x8xf32>
    %63 = tpu.matmul %60, %62, %cst_32 {dimension_numbers = #tpu.dot_dimension_numbers<[1], [0], [0], [1], [0, 0, 1, 1], [], []>} : vector<8x8xbf16>, vector<8x8xbf16>, vector<8x8xf32> -> vector<8x8xf32>
    %64 = arith.truncf %63 : vector<8x8xf32> to vector<8x8xbf16>
    %65 = vector.extract_strided_slice %43 {offsets = [0, 0], sizes = [8, 32], strides = [1, 1]} : vector<32x32xbf16> to vector<8x32xbf16>
    %cst_33 = arith.constant dense<0.000000e+00> : vector<8x32xf32>
    %66 = tpu.matmul %64, %65, %cst_33 {dimension_numbers = #tpu.dot_dimension_numbers<[1], [0], [0], [1], [0, 0, 1, 1], [], []>} : vector<8x8xbf16>, vector<8x32xbf16>, vector<8x32xf32> -> vector<8x32xf32>
    %67 = arith.addf %44, %66 : vector<8x32xf32>
    %68 = vector.extract_strided_slice %33 {offsets = [0, 8], sizes = [8, 8], strides = [1, 1]} : vector<8x32xf32> to vector<8x8xf32>
    %69 = vector.extract_strided_slice %39 {offsets = [0, 8], sizes = [8, 8], strides = [1, 1]} : vector<8x32xf32> to vector<8x8xf32>
    %cst_34 = arith.constant dense<0.000000e+00> : vector<8x8xf32>
    %70 = tpu.matmul %68, %69, %cst_34 {dimension_numbers = #tpu.dot_dimension_numbers<[1], [1], [0], [0], [0, 0, 1, 0], [], []>} : vector<8x8xf32>, vector<8x8xf32>, vector<8x8xf32> -> vector<8x8xf32>
    %71 = vector.broadcast %42 : vector<1x8xf32> to vector<8x8xf32>
    %72 = arith.addf %70, %71 : vector<8x8xf32>
    %cst_35 = arith.constant dense<0xFF800000> : vector<8xf32>
    %73 = vector.multi_reduction <maximumf>, %72, %cst_35 [1] : vector<8x8xf32> to vector<8xf32>
    %74 = vector.shape_cast %73 : vector<8xf32> to vector<8x1xf32>
    %75 = vector.broadcast %74 : vector<8x1xf32> to vector<8x8xf32>
    %76 = arith.subf %72, %75 : vector<8x8xf32>
    %77 = math.exp %76 : vector<8x8xf32>
    %cst_36 = arith.constant dense<0.000000e+00> : vector<8xf32>
    %78 = vector.multi_reduction <add>, %77, %cst_36 [1] : vector<8x8xf32> to vector<8xf32>
    %79 = vector.shape_cast %78 : vector<8xf32> to vector<8x1xf32>
    %80 = tpu.reciprocal %79 {approx = true} : vector<8x1xf32> -> vector<8x1xf32>
    %81 = vector.broadcast %80 : vector<8x1xf32> to vector<8x8xf32>
    %82 = arith.mulf %77, %81 : vector<8x8xf32>
    %83 = arith.truncf %82 : vector<8x8xf32> to vector<8x8xbf16>
    %84 = vector.extract_strided_slice %40 {offsets = [0, 8], sizes = [8, 8], strides = [1, 1]} : vector<8x32xf32> to vector<8x8xf32>
    %85 = arith.truncf %84 : vector<8x8xf32> to vector<8x8xbf16>
    %cst_37 = arith.constant dense<0.000000e+00> : vector<8x8xf32>
    %86 = tpu.matmul %83, %85, %cst_37 {dimension_numbers = #tpu.dot_dimension_numbers<[1], [0], [0], [1], [0, 0, 1, 1], [], []>} : vector<8x8xbf16>, vector<8x8xbf16>, vector<8x8xf32> -> vector<8x8xf32>
    %87 = arith.truncf %86 : vector<8x8xf32> to vector<8x8xbf16>
    %88 = vector.extract_strided_slice %43 {offsets = [8, 0], sizes = [8, 32], strides = [1, 1]} : vector<32x32xbf16> to vector<8x32xbf16>
    %cst_38 = arith.constant dense<0.000000e+00> : vector<8x32xf32>
    %89 = tpu.matmul %87, %88, %cst_38 {dimension_numbers = #tpu.dot_dimension_numbers<[1], [0], [0], [1], [0, 0, 1, 1], [], []>} : vector<8x8xbf16>, vector<8x32xbf16>, vector<8x32xf32> -> vector<8x32xf32>
    %90 = arith.addf %67, %89 : vector<8x32xf32>
    %91 = vector.extract_strided_slice %33 {offsets = [0, 16], sizes = [8, 8], strides = [1, 1]} : vector<8x32xf32> to vector<8x8xf32>
    %92 = vector.extract_strided_slice %39 {offsets = [0, 16], sizes = [8, 8], strides = [1, 1]} : vector<8x32xf32> to vector<8x8xf32>
    %cst_39 = arith.constant dense<0.000000e+00> : vector<8x8xf32>
    %93 = tpu.matmul %91, %92, %cst_39 {dimension_numbers = #tpu.dot_dimension_numbers<[1], [1], [0], [0], [0, 0, 1, 0], [], []>} : vector<8x8xf32>, vector<8x8xf32>, vector<8x8xf32> -> vector<8x8xf32>
    %94 = vector.broadcast %42 : vector<1x8xf32> to vector<8x8xf32>
    %95 = arith.addf %93, %94 : vector<8x8xf32>
    %cst_40 = arith.constant dense<0xFF800000> : vector<8xf32>
    %96 = vector.multi_reduction <maximumf>, %95, %cst_40 [1] : vector<8x8xf32> to vector<8xf32>
    %97 = vector.shape_cast %96 : vector<8xf32> to vector<8x1xf32>
    %98 = vector.broadcast %97 : vector<8x1xf32> to vector<8x8xf32>
    %99 = arith.subf %95, %98 : vector<8x8xf32>
    %100 = math.exp %99 : vector<8x8xf32>
    %cst_41 = arith.constant dense<0.000000e+00> : vector<8xf32>
    %101 = vector.multi_reduction <add>, %100, %cst_41 [1] : vector<8x8xf32> to vector<8xf32>
    %102 = vector.shape_cast %101 : vector<8xf32> to vector<8x1xf32>
    %103 = tpu.reciprocal %102 {approx = true} : vector<8x1xf32> -> vector<8x1xf32>
    %104 = vector.broadcast %103 : vector<8x1xf32> to vector<8x8xf32>
    %105 = arith.mulf %100, %104 : vector<8x8xf32>
    %106 = arith.truncf %105 : vector<8x8xf32> to vector<8x8xbf16>
    %107 = vector.extract_strided_slice %40 {offsets = [0, 16], sizes = [8, 8], strides = [1, 1]} : vector<8x32xf32> to vector<8x8xf32>
    %108 = arith.truncf %107 : vector<8x8xf32> to vector<8x8xbf16>
    %cst_42 = arith.constant dense<0.000000e+00> : vector<8x8xf32>
    %109 = tpu.matmul %106, %108, %cst_42 {dimension_numbers = #tpu.dot_dimension_numbers<[1], [0], [0], [1], [0, 0, 1, 1], [], []>} : vector<8x8xbf16>, vector<8x8xbf16>, vector<8x8xf32> -> vector<8x8xf32>
    %110 = arith.truncf %109 : vector<8x8xf32> to vector<8x8xbf16>
    %111 = vector.extract_strided_slice %43 {offsets = [16, 0], sizes = [8, 32], strides = [1, 1]} : vector<32x32xbf16> to vector<8x32xbf16>
    %cst_43 = arith.constant dense<0.000000e+00> : vector<8x32xf32>
    %112 = tpu.matmul %110, %111, %cst_43 {dimension_numbers = #tpu.dot_dimension_numbers<[1], [0], [0], [1], [0, 0, 1, 1], [], []>} : vector<8x8xbf16>, vector<8x32xbf16>, vector<8x32xf32> -> vector<8x32xf32>
    %113 = arith.addf %90, %112 : vector<8x32xf32>
    %114 = vector.extract_strided_slice %33 {offsets = [0, 24], sizes = [8, 8], strides = [1, 1]} : vector<8x32xf32> to vector<8x8xf32>
    %115 = vector.extract_strided_slice %39 {offsets = [0, 24], sizes = [8, 8], strides = [1, 1]} : vector<8x32xf32> to vector<8x8xf32>
    %cst_44 = arith.constant dense<0.000000e+00> : vector<8x8xf32>
    %116 = tpu.matmul %114, %115, %cst_44 {dimension_numbers = #tpu.dot_dimension_numbers<[1], [1], [0], [0], [0, 0, 1, 0], [], []>} : vector<8x8xf32>, vector<8x8xf32>, vector<8x8xf32> -> vector<8x8xf32>
    %117 = vector.broadcast %42 : vector<1x8xf32> to vector<8x8xf32>
    %118 = arith.addf %116, %117 : vector<8x8xf32>
    %cst_45 = arith.constant dense<0xFF800000> : vector<8xf32>
    %119 = vector.multi_reduction <maximumf>, %118, %cst_45 [1] : vector<8x8xf32> to vector<8xf32>
    %120 = vector.shape_cast %119 : vector<8xf32> to vector<8x1xf32>
    %121 = vector.broadcast %120 : vector<8x1xf32> to vector<8x8xf32>
    %122 = arith.subf %118, %121 : vector<8x8xf32>
    %123 = math.exp %122 : vector<8x8xf32>
    %cst_46 = arith.constant dense<0.000000e+00> : vector<8xf32>
    %124 = vector.multi_reduction <add>, %123, %cst_46 [1] : vector<8x8xf32> to vector<8xf32>
    %125 = vector.shape_cast %124 : vector<8xf32> to vector<8x1xf32>
    %126 = tpu.reciprocal %125 {approx = true} : vector<8x1xf32> -> vector<8x1xf32>
    %127 = vector.broadcast %126 : vector<8x1xf32> to vector<8x8xf32>
    %128 = arith.mulf %123, %127 : vector<8x8xf32>
    %129 = arith.truncf %128 : vector<8x8xf32> to vector<8x8xbf16>
    %130 = vector.extract_strided_slice %40 {offsets = [0, 24], sizes = [8, 8], strides = [1, 1]} : vector<8x32xf32> to vector<8x8xf32>
    %131 = arith.truncf %130 : vector<8x8xf32> to vector<8x8xbf16>
    %cst_47 = arith.constant dense<0.000000e+00> : vector<8x8xf32>
    %132 = tpu.matmul %129, %131, %cst_47 {dimension_numbers = #tpu.dot_dimension_numbers<[1], [0], [0], [1], [0, 0, 1, 1], [], []>} : vector<8x8xbf16>, vector<8x8xbf16>, vector<8x8xf32> -> vector<8x8xf32>
    %133 = arith.truncf %132 : vector<8x8xf32> to vector<8x8xbf16>
    %134 = vector.extract_strided_slice %43 {offsets = [24, 0], sizes = [8, 32], strides = [1, 1]} : vector<32x32xbf16> to vector<8x32xbf16>
    %cst_48 = arith.constant dense<0.000000e+00> : vector<8x32xf32>
    %135 = tpu.matmul %133, %134, %cst_48 {dimension_numbers = #tpu.dot_dimension_numbers<[1], [0], [0], [1], [0, 0, 1, 1], [], []>} : vector<8x8xbf16>, vector<8x32xbf16>, vector<8x32xf32> -> vector<8x32xf32>
    %136 = arith.addf %113, %135 : vector<8x32xf32>
    %137 = arith.addf %1, %136 : vector<8x32xf32>
    %c0_49 = arith.constant 0 : index
    %c0_50 = arith.constant 0 : index
    %138 = vector.load %arg11[%c0_49, %c0_50] : memref<1x32xf32, #tpu.memory_space<vmem>>, vector<1x32xf32>
    %139 = vector.broadcast %138 : vector<1x32xf32> to vector<8x32xf32>
    %140 = arith.addf %137, %139 : vector<8x32xf32>
    %c0_51 = arith.constant 0 : index
    %c0_52 = arith.constant 0 : index
    %c0_53 = arith.constant 0 : index
    %141 = vector.load %arg13[%c0_51, %c0_52, %c0_53] : memref<1x8x32xf32, #tpu.memory_space<vmem>>, vector<1x8x32xf32>
    %142 = vector.shape_cast %141 : vector<1x8x32xf32> to vector<8x32xf32>
    %143 = vector.shape_cast %140 : vector<8x32xf32> to vector<1x8x32xf32>
    tpu.vector_store %arg13[%c0_51, %c0_52, %c0_53], %143 {strides = array<i32>} : memref<1x8x32xf32, #tpu.memory_space<vmem>>, vector<1x8x32xf32>,
    return
  }
  func.func @transform_0(%arg0: i32, %arg1: i32) -> (i32, i32, i32) {
    %c0_i32 = arith.constant 0 : i32
    %c0_i32_0 = arith.constant 0 : i32
    return %arg0, %arg1, %c0_i32 : i32, i32, i32
  }
  func.func @transform_1(%arg0: i32, %arg1: i32) -> (i32, i32, i32) {
    %c0_i32 = arith.constant 0 : i32
    %c0_i32_0 = arith.constant 0 : i32
    %c0_i32_1 = arith.constant 0 : i32
    return %arg0, %c0_i32, %c0_i32_0 : i32, i32, i32
  }
  func.func @transform_2(%arg0: i32, %arg1: i32) -> (i32, i32) {
    %c0_i32 = arith.constant 0 : i32
    %c0_i32_0 = arith.constant 0 : i32
    %c0_i32_1 = arith.constant 0 : i32
    return %c0_i32, %c0_i32_0 : i32, i32
  }
  func.func @transform_3(%arg0: i32, %arg1: i32) -> (i32, i32) {
    %c0_i32 = arith.constant 0 : i32
    %c0_i32_0 = arith.constant 0 : i32
    %c0_i32_1 = arith.constant 0 : i32
    return %c0_i32, %c0_i32_0 : i32, i32
  }
  func.func @transform_4(%arg0: i32, %arg1: i32) -> (i32, i32) {
    %c0_i32 = arith.constant 0 : i32
    %c0_i32_0 = arith.constant 0 : i32
    %c0_i32_1 = arith.constant 0 : i32
    return %c0_i32, %c0_i32_0 : i32, i32
  }
  func.func @transform_5(%arg0: i32, %arg1: i32) -> (i32, i32) {
    %c0_i32 = arith.constant 0 : i32
    %c0_i32_0 = arith.constant 0 : i32
    %c0_i32_1 = arith.constant 0 : i32
    return %c0_i32, %c0_i32_0 : i32, i32
  }
  func.func @transform_6(%arg0: i32, %arg1: i32) -> (i32, i32) {
    %c0_i32 = arith.constant 0 : i32
    %c0_i32_0 = arith.constant 0 : i32
    %c0_i32_1 = arith.constant 0 : i32
    return %c0_i32, %c0_i32_0 : i32, i32
  }
  func.func @transform_7(%arg0: i32, %arg1: i32) -> (i32, i32) {
    %c0_i32 = arith.constant 0 : i32
    %c0_i32_0 = arith.constant 0 : i32
    %c0_i32_1 = arith.constant 0 : i32
    return %c0_i32, %c0_i32_0 : i32, i32
  }
  func.func @transform_8(%arg0: i32, %arg1: i32) -> (i32, i32) {
    %c0_i32 = arith.constant 0 : i32
    %c0_i32_0 = arith.constant 0 : i32
    %c0_i32_1 = arith.constant 0 : i32
    return %c0_i32, %c0_i32_0 : i32, i32
  }
  func.func @transform_9(%arg0: i32, %arg1: i32) -> (i32, i32) {
    %c0_i32 = arith.constant 0 : i32
    %c0_i32_0 = arith.constant 0 : i32
    %c0_i32_1 = arith.constant 0 : i32
    return %c0_i32, %c0_i32_0 : i32, i32
  }
  func.func @transform_10(%arg0: i32, %arg1: i32) -> (i32, i32, i32) {
    %c0_i32 = arith.constant 0 : i32
    %c0_i32_0 = arith.constant 0 : i32
    %c0_i32_1 = arith.constant 0 : i32
    return %arg0, %c0_i32, %c0_i32_0 : i32, i32, i32
  }
  func.func @transform_11(%arg0: i32, %arg1: i32) -> (i32, i32, i32) {
    %c0_i32 = arith.constant 0 : i32
    %c0_i32_0 = arith.constant 0 : i32
    return %arg0, %arg1, %c0_i32 : i32, i32, i32
  }
}

</mosaic_0001>

<bundles_post_ra>
// kernel: encoder_decoder_forward.16
= control target key start
LH: loop header
LB: loop body
LE: loop exit
PB: predicated region body
PF: predicated region fallthrough
CT: control target
= control target key end

     0   :  { %vm18_vm0 = vcmask 261120   ;;  %s137_s0 = inlined_call_operand.vmem [shape: f32[16,32], index: 0, kind: input, shape index: {}, may-alias: {0,3}]   ;;  %s138_s1 = inlined_call_operand.vmem [shape: f32[1,32], index: 1, kind: input, shape index: {}]   ;;  %s139_s2 = inlined_call_operand.vmem [shape: f32[1,32], index: 2, kind: input, shape index: {}]   ;;  %s140_s3 = inlined_call_operand.vmem [shape: f32[16,32], index: 3, kind: output, shape index: {}, may-alias: {0,3}]  }
   0x1   :  { %v14_v0 = vld [vmem:[%s137_s0] sm:$0xff]  ;;  %v15_v1 = vld [vmem:[%s137_s0 + $0x8] sm:$0xff] }
   0x2   :  { %v19_v2 = vsel %vm18_vm0, %v14_v0, 0.0  ;;  %v22_v3 = vsel %vm18_vm0, %v15_v1, 0.0  ;;  %v83_v30 = vld [vmem:[%s138_s1] ss:$0 sm:$0xff] }
   0x3   :  { %20 = vadd.xlane.f32.xlu0 %v19_v2  ;;  %v84_v33 = vld [vmem:[%s139_s2] ss:$0 sm:$0xff] }
   0x7   :  { %23 = vadd.xlane.f32.xlu0 %v22_v3 }
  0x8c   :  { %v21_v4 = vpop.xlane.xlu0 %20 }
  0x8d   :  { %v26_v5 = vmul.f32 0.03125, %v21_v4 }
  0x8f   :  { %v28_v6 = vsub.f32 %v14_v0, %v26_v5 }
  0x90   :  { %v24_v7 = vpop.xlane.xlu0 %23 }
  0x91   :  { %v27_v8 = vmul.f32 0.03125, %v24_v7  ;;  %v30_v9 = vmul.f32 %v28_v6, %v28_v6  ;;  %v65_v31 = vmul.f32 %v83_v30, %v28_v6 }
  0x93   :  { %v29_v10 = vsub.f32 %v15_v1, %v27_v8  ;;  %v32_v11 = vsel %vm18_vm0, %v30_v9, 0.0 }
  0x94   :  { %33 = vadd.xlane.f32.xlu1 %v32_v11 }
  0x95   :  { %v31_v12 = vmul.f32 %v29_v10, %v29_v10  ;;  %v66_v35 = vmul.f32 %v83_v30, %v29_v10 }
  0x97   :  { %v35_v13 = vsel %vm18_vm0, %v31_v12, 0.0 }
  0x98   :  { %36 = vadd.xlane.f32.xlu1 %v35_v13 }
 0x11d   :  { %v34_v14 = vpop.xlane.xlu1 %33 }
 0x11e   :  { %v39_v15 = vmul.f32 0.032258064, %v34_v14 }
 0x120   :  { %85 = vrsqrt.f32 %v39_v15  ;;  %vm43_vm1 = vcmp.eq.f32.partialorder %v39_v15, inf  ;;  %v46_v20 = vand.u32 2147483648, %v39_v15  ;;  %vm45_vm2 = vcmp.eq.f32.partialorder %v39_v15, 0.0 }
 0x121   :  { %v37_v16 = vpop.xlane.xlu1 %36 }
 0x122   :  { %v40_v17 = vmul.f32 0.032258064, %v37_v16 }
 0x124   :  { %87 = vrsqrt.f32 %v40_v17  ;;  %vm50_vm3 = vcmp.eq.f32.partialorder %v40_v17, inf  ;;  %v53_v26 = vand.u32 2147483648, %v40_v17  ;;  %vm52_vm4 = vcmp.eq.f32.partialorder %v40_v17, 0.0 }
 0x12d   :  { %v86_v18 = vpop.eup %85 }
 0x12e   :  { %v42_v19 = vmul.f32 %v86_v18, %v39_v15 }
 0x130   :  { %v44_v21 = vsel %vm43_vm1, %v39_v15, %v42_v19 }
 0x131   :  { %v88_v22 = vpop.eup %87  ;;  %v47_v23 = vsel %vm45_vm2, %v46_v20, %v44_v21 }
 0x132   :  { %v55_v24 = vadd.f32 1e-06, %v47_v23  ;;  %v49_v25 = vmul.f32 %v88_v22, %v40_v17 }
 0x134   :  { %89 = vrcp.f32 %v55_v24  ;;  %v51_v27 = vsel %vm50_vm3, %v40_v17, %v49_v25 }
 0x135   :  { %v54_v28 = vsel %vm52_vm4, %v53_v26, %v51_v27 }
 0x136   :  { %v56_v29 = vadd.f32 1e-06, %v54_v28 }
 0x138   :  { %91 = vrcp.f32 %v56_v29 }
 0x141   :  { %v90_v32 = vpop.eup %89 }
 0x142   :  { %v67_v34 = vmul.f32 %v90_v32, %v65_v31 }
 0x144   :  { %v75_v36 = vadd.f32 %v84_v33, %v67_v34 }
 0x145   :  { %v92_v37 = vpop.eup %91 }
 0x146   :  { %77 = vst.msk [vmem:[%s140_s3] sm:$0xff] %vm18_vm0, %v75_v36  ;;  %v68_v38 = vmul.f32 %v92_v37, %v66_v35 }
 0x148   :  { %v76_v39 = vadd.f32 %v84_v33, %v68_v38 }
 0x14a   :  { %78 = vst.msk [vmem:[%s140_s3 + $0x8] sm:$0xff] %vm18_vm0, %v76_v39 }

// kernel: encoder_decoder_forward.13
= control target key start
LH: loop header
LB: loop body
LE: loop exit
PB: predicated region body
PF: predicated region fallthrough
CT: control target
= control target key end

     0   :  { %vm31_vm0 = vcmask 261120   ;;  %v309_v14 = vmov 0.0   ;;  %vm310_vm1 = vmmov 0   ;;  %vm200_vm6 = vcmask 523264   ;;  %s410_s0 = inlined_call_operand.vmem [shape: f32[16,32], index: 0, kind: input, shape index: {}, may-alias: {0,7}]   ;;  %s411_s3 = inlined_call_operand.vmem [shape: bf16[32,64], index: 3, kind: input, shape index: {}]   ;;  %s412_s5 = inlined_call_operand.vmem [shape: bf16[64,32], index: 5, kind: input, shape index: {}]   ;;  %s413_s1 = inlined_call_operand.vmem [shape: f32[1,32], index: 1, kind: input, shape index: {}]   ;;  %s414_s2 = inlined_call_operand.vmem [shape: f32[1,32], index: 2, kind: input, shape index: {}]   ;;  %s415_s4 = inlined_call_operand.vmem [shape: f32[1,64], index: 4, kind: input, shape index: {}]   ;;  %s416_s6 = inlined_call_operand.vmem [shape: f32[1,32], index: 6, kind: input, shape index: {}]   ;;  %s417_s7 = inlined_call_operand.vmem [shape: f32[16,32], index: 7, kind: output, shape index: {}, may-alias: {0,7}]  }
   0x1   :  { %v354_v0 = vld [vmem:[%s410_s0] sm:$0xff]  ;;  %v359_v1 = vld [vmem:[%s410_s0 + $0x8] sm:$0xff]  ;;  %273 = vmatprep.subr.bf16.mxu0 %v309_v14  ;;  %277 = vmatprep.mubr.msk.bf16.mxu0 %vm310_vm1, %v309_v14  ;;  %v297_v17 = vld [vmem:[%s412_s5 + $0x18] sm:$0xff]  }
   0x2   :  { %v32_v2 = vsel %vm31_vm0, %v354_v0, 0.0  ;;  %v35_v3 = vsel %vm31_vm0, %v359_v1, 0.0  ;;  %v295_v15 = vld [vmem:[%s411_s3 + $0x8] sm:$0xff]   ;;  %281 = vmatprep.subr.bf16.mxu1 %v309_v14  ;;  %289 = vmatprep.mubr.msk.bf16.mxu1 %vm310_vm1, %v309_v14  ;;  %v296_v16 = vld [vmem:[%s411_s3] sm:$0xff]   ;;  %v298_v45 = vld [vmem:[%s412_s5 + $0x10] sm:$0xff]  }
   0x3   :  { %33 = vadd.xlane.f32.xlu0 %v32_v2  ;;  %274 = vmatpush3.bf16.msra.mxu0 %v295_v15  ;;  %v253_v34 = vld [vmem:[%s413_s1] ss:$0 sm:$0xff]  ;;  %v299_v46 = vld [vmem:[%s412_s5 + $0x8] sm:$0xff]  }
   0x4   :  { %275 = vmatprep.subr.bf16.mxu0 %v309_v14  ;;  %282 = vmatpush3.bf16.msra.mxu1 %v297_v17  ;;  %v254_v40 = vld [vmem:[%s414_s2] ss:$0 sm:$0xff] }
   0x5   :  { %283 = vmatprep.subr.bf16.mxu1 %v309_v14  ;;  %v300_v47 = vld [vmem:[%s412_s5] sm:$0xff]  }
   0x6   :  { %v255_v48 = vld [vmem:[%s415_s4] ss:$0 sm:$0xff] }
   0x7   :  { %36 = vadd.xlane.f32.xlu0 %v35_v3  ;;  %276 = vmatpush3.bf16.msra.mxu0 %v296_v16  ;;  %v259_v58 = vld [vmem:[%s416_s6] ss:$0 sm:$0xff] }
   0x8   :  { %284 = vmatpush3.bf16.msra.mxu1 %v298_v45 }
   0x9   :  { %285 = vmatprep.subr.bf16.mxu1 %v309_v14 }
   0xc   :  { %286 = vmatpush3.bf16.msra.mxu1 %v299_v46 }
   0xd   :  { %287 = vmatprep.subr.bf16.mxu1 %v309_v14 }
  0x10   :  { %288 = vmatpush3.bf16.msra.mxu1 %v300_v47 }
  0x8c   :  { %v34_v4 = vpop.xlane.xlu0 %33 }
  0x8d   :  { %v39_v5 = vmul.f32 0.03125, %v34_v4 }
  0x8f   :  { %v41_v6 = vsub.f32 %v354_v0, %v39_v5 }
  0x90   :  { %v37_v7 = vpop.xlane.xlu0 %36 }
  0x91   :  { %v40_v8 = vmul.f32 0.03125, %v37_v7  ;;  %v43_v9 = vmul.f32 %v41_v6, %v41_v6  ;;  %v78_v36 = vmul.f32 %v253_v34, %v41_v6 }
  0x93   :  { %v42_v10 = vsub.f32 %v359_v1, %v40_v8  ;;  %v45_v11 = vsel %vm31_vm0, %v43_v9, 0.0 }
  0x94   :  { %46 = vadd.xlane.f32.xlu1 %v45_v11 }
  0x95   :  { %v44_v12 = vmul.f32 %v42_v10, %v42_v10  ;;  %v79_v37 = vmul.f32 %v253_v34, %v42_v10 }
  0x97   :  { %v48_v13 = vsel %vm31_vm0, %v44_v12, 0.0 }
  0x98   :  { %49 = vadd.xlane.f32.xlu1 %v48_v13 }
 0x11d   :  { %v47_v18 = vpop.xlane.xlu1 %46 }
 0x11e   :  { %v52_v19 = vmul.f32 0.032258064, %v47_v18 }
 0x120   :  { %301 = vrsqrt.f32 %v52_v19  ;;  %vm56_vm2 = vcmp.eq.f32.partialorder %v52_v19, inf  ;;  %v59_v24 = vand.u32 2147483648, %v52_v19  ;;  %vm58_vm3 = vcmp.eq.f32.partialorder %v52_v19, 0.0 }
 0x121   :  { %v50_v20 = vpop.xlane.xlu1 %49 }
 0x122   :  { %v53_v21 = vmul.f32 0.032258064, %v50_v20 }
 0x124   :  { %303 = vrsqrt.f32 %v53_v21  ;;  %vm63_vm4 = vcmp.eq.f32.partialorder %v53_v21, inf  ;;  %v66_v30 = vand.u32 2147483648, %v53_v21  ;;  %vm65_vm5 = vcmp.eq.f32.partialorder %v53_v21, 0.0 }
 0x12d   :  { %v302_v22 = vpop.eup %301 }
 0x12e   :  { %v55_v23 = vmul.f32 %v302_v22, %v52_v19 }
 0x130   :  { %v57_v25 = vsel %vm56_vm2, %v52_v19, %v55_v23 }
 0x131   :  { %v304_v26 = vpop.eup %303  ;;  %v60_v27 = vsel %vm58_vm3, %v59_v24, %v57_v25 }
 0x132   :  { %v68_v28 = vadd.f32 1e-06, %v60_v27  ;;  %v62_v29 = vmul.f32 %v304_v26, %v53_v21 }
 0x134   :  { %305 = vrcp.f32 %v68_v28  ;;  %v64_v31 = vsel %vm63_vm4, %v53_v21, %v62_v29 }
 0x135   :  { %v67_v32 = vsel %vm65_vm5, %v66_v30, %v64_v31 }
 0x136   :  { %v69_v33 = vadd.f32 1e-06, %v67_v32 }
 0x138   :  { %307 = vrcp.f32 %v69_v33 }
 0x141   :  { %v306_v35 = vpop.eup %305 }
 0x142   :  { %v80_v38 = vmul.f32 %v306_v35, %v78_v36 }
 0x144   :  { %v88_v42 = vadd.f32 %v254_v40, %v80_v38 }
 0x145   :  { %v308_v39 = vpop.eup %307 }
 0x146   :  { %v81_v41 = vmul.f32 %v308_v39, %v79_v37 }
 0x148   :  { %v89_v43 = vadd.f32 %v254_v40, %v81_v41 }
 0x14a   :  { %v90_v44 = vpack.c.bf16 %v89_v43, %v88_v42 }
 0x14c   :  { %278 = vmatmul.mubr.msk.bf16.vlgmr.msra.gmra.mxu0 %vm31_vm0, %v90_v44 }
 0x20c   :  { %v151_v49 = vpop.f32.mrf.mxu0 }
 0x20d   :  { %v152_v51 = vadd.f32 %v255_v48, %v151_v49 }
 0x20e   :  { %v279_v50 = vpop.f32.mrf.mxu0 }
 0x20f   :  { %v158_v55 = vmax.f32 %v152_v51, 0.0 }
 0x210   :  { %v154_v52 = vpop.f32.mrf.mxu0 }
 0x211   :  { %v155_v53 = vadd.f32 %v255_v48, %v154_v52 }
 0x212   :  { %v280_v54 = vpop.f32.mrf.mxu0 }
 0x213   :  { %v159_v56 = vmax.f32 %v155_v53, 0.0 }
 0x215   :  { %v160_v57 = vpack.c.bf16 %v159_v56, %v158_v55 }
 0x217   :  { %290 = vmatmul.mubr.msk.bf16.vlgmr.msra.gmra.mxu1 %vm200_vm6, %v160_v57 }
 0x2d7   :  { %v238_v59 = vpop.f32.mrf.mxu1 }
 0x2d8   :  { %v239_v60 = vadd.f32 %v259_v58, %v238_v59 }
 0x2d9   :  { %v291_v61 = vpop.f32.mrf.mxu1 }
 0x2da   :  { %v245_v62 = vadd.f32 %v239_v60, %v354_v0 }
 0x2db   :  { %v241_v63 = vpop.f32.mrf.mxu1 }
 0x2dc   :  { %247 = vst.msk [vmem:[%s417_s7] sm:$0xff] %vm31_vm0, %v245_v62  ;;  %v242_v2 = vadd.f32 %v259_v58, %v241_v63 }
 0x2dd   :  { %v292_v3 = vpop.f32.mrf.mxu1 }
 0x2de   :  { %v246_v4 = vadd.f32 %v242_v2, %v359_v1 }
 0x2e0   :  { %248 = vst.msk [vmem:[%s417_s7 + $0x8] sm:$0xff] %vm31_vm0, %v246_v4 }

// kernel: encoder_decoder_forward.12
= control target key start
LH: loop header
LB: loop body
LE: loop exit
PB: predicated region body
PF: predicated region fallthrough
CT: control target
= control target key end

     0   :  { %s1715_s13 = smov 0   ;;  %s1717_s14 = smov 0   ;;  %s1910_s0 = inlined_call_operand.vmem [shape: f32[2,8,32], index: 0, kind: input, shape index: {}, may-alias: {0,10}]   ;;  %s1911_s1 = inlined_call_operand.vmem [shape: f32[1,32], index: 1, kind: input, shape index: {}]   ;;  %s1912_s2 = inlined_call_operand.vmem [shape: f32[1,32], index: 2, kind: input, shape index: {}]   ;;  %s1913_s3 = inlined_call_operand.vmem [shape: bf16[32,32], index: 3, kind: input, shape index: {}]   ;;  %s1914_s4 = inlined_call_operand.vmem [shape: f32[1,32], index: 4, kind: input, shape index: {}]   ;;  %s1915_s5 = inlined_call_operand.vmem [shape: bf16[32,64], index: 5, kind: input, shape index: {}]   ;;  %s1916_s6 = inlined_call_operand.vmem [shape: f32[1,64], index: 6, kind: input, shape index: {}]   ;;  %s1917_s7 = inlined_call_operand.vmem [shape: bf16[32,32], index: 7, kind: input, shape index: {}]   ;;  %s1918_s8 = inlined_call_operand.vmem [shape: f32[1,32], index: 8, kind: input, shape index: {}]   ;;  %s1919_s9 = inlined_call_operand.vmem [shape: f32[2,1,8], index: 9, kind: input, shape index: {}]   ;;  %s1920_s10 = inlined_call_operand.vmem [shape: f32[2,8,32], index: 10, kind: output, shape index: {}, may-alias: {0,10}]  }
   0x1   :  { %s1719_s15 = smov 0  }
   0x2 LB: > { %s32_s16 = sadd.s32 1, %s1645_s14  ;;  %p1423_p0 = scmp.ge.s32.totalorder %s1649_s15, 1  ;;  %s1649_s15 = sphi %s1719_s15, %s20_s15   ;;  %s1645_s14 = sphi %s1717_s14, %s1922_s14   ;;  %s1641_s13 = sphi %s1715_s13, %s1921_s13  }
   0x3   : > { %p34_p1 = scmp.ge.s32.totalorder %s32_s16, 2  ;;  %p338_p2 = scmp.lt.s32.totalorder %s1649_s15, 3 }
   0x5   : > { %s1924_s16 = smov (%p34_p1, %s32_s16), 0  ;;  %p339_p3 = pnand %p1423_p0, %p338_p2 }
   0x6   : > { %p383_p4 = scmp.lt.s32.totalorder (!%p339_p3), %s1641_s13, 1  ;;  %s1653_s22 = smov (!%p339_p3), 120  }
   0x7   : > { %342 = sbr.rel (%p339_p3) target bundleno = 2789 (0xae5), region = 60  ;;  %s1654_s26 = smov (!%p339_p3), 88  }
   0x8   : > { %s1655_s27 = smov (!%p339_p3), 112   ;;  %s1656_s28 = smov (!%p339_p3), 96  }
   0x9   : > { %s1657_s18 = smov (!%p339_p3), 80   ;;  %s1658_s19 = smov (!%p339_p3), 104  }
   0xc   : > { %s1926_s13 = smov (!%p383_p4, %s1641_s13), 1  ;;  %vm404_vm0 = vcmask 261120   ;;  %v1603_v7 = vld [vmem:[%s1913_s3 + $0x8] sm:$0xff]   ;;  %v1651_v9 = vmov 0.0   ;;  %v1605_v10 = vld [vmem:[%s1913_s3] sm:$0xff]   ;;  %vm1652_vm1 = vmmov 0  }
   0xd   : > { %s1424_s17 = sshll.u32 %s1926_s13, 3  ;;  %v1604_v8 = vld [vmem:[%s1915_s5 + $0x8] sm:$0xff]   ;;  %1486 = vmatprep.subr.bf16.mxu0 %v1651_v9  ;;  %1494 = vmatprep.subr.bf16.mxu1 %v1651_v9  ;;  %v1606_v11 = vld [vmem:[%s1915_s5] sm:$0xff]   ;;  %vm582_vm4 = vcmask 64512   ;;  %s392_s25 = scalar_lea.vmem %s1919_s9, %s1926_s13  ;;  %vm678_vm5 = vcmask 1043456  }
   0xe   : > { %s389_s20 = scalar_lea.vmem %s1910_s0, %s1424_s17  ;;  %1487 = vmatpush3.bf16.msra.mxu0 %v1603_v7  ;;  %1495 = vmatpush3.bf16.msra.mxu1 %v1604_v8  ;;  %v1426_v20 = vld [vmem:[%s1911_s1] ss:$0 sm:$0xff]  ;;  %v573_v8 = vld [vmem:[%s1917_s7 + $0x4] sm:$0xf]  ;;  %s399_s29 = scalar_lea.vmem %s1920_s10, %s1424_s17 }
   0xf   : > { %v1741_v0 = vld [vmem:[%s389_s20] sm:$0xff]  ;;  %1488 = vmatprep.subr.bf16.mxu0 %v1651_v9  ;;  %1496 = vmatprep.subr.bf16.mxu1 %v1651_v9 }
  0x10   : > { %v405_v1 = vsel %vm404_vm0, %v1741_v0, 0.0  ;;  %1490 = vmatprep.mubr.msk.bf16.mxu0 %vm1652_vm1, %v1651_v9  ;;  %1498 = vmatprep.mubr.msk.bf16.mxu1 %vm1652_vm1, %v1651_v9  ;;  %v1427_v23 = vld [vmem:[%s1912_s2] ss:$0 sm:$0xff] }
  0x11   : > { %406 = vadd.xlane.f32.xlu0 %v405_v1  ;;  %v1432_v27 = vld [vmem:[%s1916_s6] ss:$0 sm:$0xff] }
  0x12   : > { %1489 = vmatpush3.bf16.msra.mxu0 %v1605_v10  ;;  %1497 = vmatpush3.bf16.msra.mxu1 %v1606_v11  ;;  %v1428_v30 = vld [vmem:[%s1914_s4] ss:$0 sm:$0xff] }
  0x13   : > { %1502 = vmatprep.subr.mxu0 %v1651_v9  ;;  %1507 = vmatprep.subr.bf16.mxu1 %v1651_v9  ;;  %v1809_v43 = vld [vmem:[%s392_s25] ss:$0 sm:$0xff] }
  0x9a   : > { %v407_v2 = vpop.xlane.xlu0 %406 }
  0x9b   : > { %v409_v3 = vmul.f32 0.03125, %v407_v2 }
  0x9d   : > { %v410_v4 = vsub.f32 %v1741_v0, %v409_v3 }
  0x9f   : > { %v411_v5 = vmul.f32 %v410_v4, %v410_v4  ;;  %v432_v21 = vmul.f32 %v1426_v20, %v410_v4 }
  0xa1   : > { %v412_v6 = vsel %vm404_vm0, %v411_v5, 0.0 }
  0xa2   : > { %413 = vadd.xlane.f32.xlu0 %v412_v6 }
 0x12b   : > { %v414_v12 = vpop.xlane.xlu0 %413 }
 0x12c   : > { %v416_v13 = vmul.f32 0.032258064, %v414_v12  ;;  %v866_v12 = vsel %vm678_vm5, %v573_v8, 0 }
 0x12e   : > { %1607 = vrsqrt.f32 %v416_v13  ;;  %vm419_vm2 = vcmp.eq.f32.partialorder %v416_v13, inf  ;;  %v422_v16 = vand.u32 2147483648, %v416_v13  ;;  %vm421_vm3 = vcmp.eq.f32.partialorder %v416_v13, 0.0 }
 0x13b   : > { %v1608_v14 = vpop.eup %1607 }
 0x13c   : > { %v418_v15 = vmul.f32 %v1608_v14, %v416_v13 }
 0x13e   : > { %v420_v17 = vsel %vm419_vm2, %v416_v13, %v418_v15  ;;  %v572_v13 = vld [vmem:[%s1917_s7] sm:$0xf] }
 0x13f   : > { %v423_v18 = vsel %vm421_vm3, %v422_v16, %v420_v17  ;;  %v912_v14 = vsel %vm678_vm5, %v572_v13, 0 }
 0x140   : > { %v424_v19 = vadd.f32 1e-06, %v423_v18 }
 0x142   : > { %1609 = vrcp.f32 %v424_v19 }
 0x14f   : > { %v1610_v22 = vpop.eup %1609 }
 0x150   : > { %v433_v24 = vmul.f32 %v1610_v22, %v432_v21 }
 0x152   : > { %v440_v25 = vadd.f32 %v1427_v23, %v433_v24 }
 0x154   : > { %v441_v26 = vpack.c.bf16 %v440_v25, %v440_v25 }
 0x156   : > { %1491 = vmatmul.mubr.msk.bf16.vlgmr.msra.gmra.mxu0 %vm404_vm0, %v441_v26  ;;  %1499 = vmatmul.mubr.msk.bf16.vlgmr.msra.gmra.mxu1 %vm404_vm0, %v441_v26 }
 0x157   : > { %1504 = vmatprep.mubr.msk.f32.mxu0 %vm1652_vm1, %v1651_v9  ;;  %1509 = vmatprep.mubr.msk.bf16.mxu1 %vm1652_vm1, %v1651_v9 }
 0x216   : > { %v502_v28 = vpop.f32.mrf.mxu0  ;;  %v565_v29 = vpop.f32.mrf.mxu1 }
 0x217   : > { %v1787_v31 = vadd.f32 %v1432_v27, %v565_v29  ;;  %v1792_v34 = vadd.f32 %v1428_v30, %v502_v28 }
 0x218   : > { %v1492_v32 = vpop.f32.mrf.mxu0  ;;  %v1500_v33 = vpop.f32.mrf.mxu1 }
 0x219   : > { %725 = vrot.lane.b32.xlu1 %v1787_v31, %s1653_s22  ;;  %1503 = vmatpush3.xpose.msk.msra.mxu0 %vm582_vm4, %v1787_v31  ;;  %v1815_v48 = vpack.c.bf16 %v1787_v31, %v1787_v31 }
 0x21a   : > { %v505_v35 = vpop.f32.mrf.mxu0  ;;  %v568_v36 = vpop.f32.mrf.mxu1  ;;  %1513 = vmatprep.subr.mxu0 %v1651_v9 }
 0x21c   : > { %v1493_v37 = vpop.f32.mrf.mxu0  ;;  %v1501_v38 = vpop.f32.mrf.mxu1  ;;  %1505 = vmatmul.mubr.msk.f32.vlgmr.msra.gmra.mxu0 %vm582_vm4, %v1792_v34 }
 0x21d   : > { %723 = vrot.lane.b32.xlu1 %v1792_v34, %s1653_s22  ;;  %1515 = vmatprep.mubr.msk.f32.mxu0 %vm1652_vm1, %v1651_v9  ;;  %s1659_s22 = smov 72  }
 0x28b   : > { %v726_v39 = vpop.permute.xlu1 %725 }
 0x28c   : > { %1514 = vmatpush3.xpose.msk.msra.mxu0 %vm582_vm4, %v726_v39 }
 0x28d   : > { %1518 = vmatprep.subr.bf16.mxu0 %v1651_v9 }
 0x28f   : > { %v724_v40 = vpop.permute.xlu1 %723 }
 0x290   : > { %1516 = vmatmul.mubr.msk.f32.vlgmr.msra.gmra.mxu0 %vm582_vm4, %v724_v40 }
 0x291   : > { %1520 = vmatprep.mubr.msk.bf16.mxu0 %vm1652_vm1, %v1651_v9 }
 0x2dc   : > { %v655_v41 = vpop.f32.mrf.mxu0 }
 0x2dd   : > { %v656_v49 = vadd.f32 %v1809_v43, %v655_v41 }
 0x2de   : > { %v1506_v42 = vpop.f32.mrf.mxu0 }
 0x2df   : > { %v659_v50 = vsel %vm582_vm4, %v656_v49, -inf }
 0x350   : > { %v797_v44 = vpop.f32.mrf.mxu0 }
 0x351   : > { %v798_v45 = vadd.f32 %v1809_v43, %v797_v44 }
 0x352   : > { %v1517_v46 = vpop.f32.mrf.mxu0 }
 0x353   : > { %v801_v47 = vsel %vm582_vm4, %v798_v45, -inf }
 0x354   : > { %802 = vmax.xlane.f32.xlu0 %v801_v47 }
 0x36a   : > { %813 = vrot.lane.b32.xlu0 %v1815_v48, %s1654_s26 }
 0x389   : > { %660 = vmax.xlane.f32.xlu0 %v659_v50 }
 0x39f   : > { %956 = vrot.lane.b32.xlu0 %v1787_v31, %s1655_s27 }
 0x3dd   : > { %v803_v51 = vpop.xlane.xlu0 %802 }
 0x3de   : > { %v804_v52 = vsub.f32 %v798_v45, %v803_v51 }
 0x3e0   : > { %v805_v53 = vmul.f32 1.442695, %v804_v52 }
 0x3e1   : > { %v814_v54 = vpop.permute.xlu0 %813 }
 0x3e2   : > { %1611 = vpow2.f32 %v805_v53  ;;  %v819_v55 = vsel %vm678_vm5, %v814_v54, 0 }
 0x3e3   : > { %1519 = vmatpush3.bf16.msra.mxu0 %v819_v55 }
 0x3e4   : > { %1530 = vmatprep.subr.bf16.mxu0 %v1651_v9 }
 0x3ef   : > { %v1612_v56 = vpop.eup %1611 }
 0x3f0   : > { %v807_v57 = vsel %vm582_vm4, %v1612_v56, 0.0 }
 0x3f1   : > { %808 = vadd.xlane.f32.xlu1 %v807_v57 }
 0x412   : > { %v661_v58 = vpop.xlane.xlu0 %660 }
 0x413   : > { %v662_v59 = vsub.f32 %v656_v49, %v661_v58 }
 0x415   : > { %v663_v60 = vmul.f32 1.442695, %v662_v59 }
 0x416   : > { %v957_v18 = vpop.permute.xlu0 %956 }
 0x417   : > { %1613 = vpow2.f32 %v663_v60 }
 0x424   : > { %v1614_v61 = vpop.eup %1613 }
 0x425   : > { %v665_v62 = vsel %vm582_vm4, %v1614_v61, 0.0 }
 0x426   : > { %666 = vadd.xlane.f32.xlu1 %v665_v62 }
 0x437   : > { %673 = vrot.lane.b32.xlu1 %v1815_v48, %s1656_s28 }
 0x43b   : > { %954 = vrot.lane.b32.xlu1 %v1792_v34, %s1655_s27 }
 0x47a   : > { %v809_v63 = vpop.xlane.xlu1 %808 }
 0x47b   : > { %1615 = vrcp.f32 %v809_v63 }
 0x488   : > { %v1616_v1 = vpop.eup %1615 }
 0x489   : > { %v811_v2 = vmul.f32 %v1616_v1, %v1612_v56 }
 0x48b   : > { %v812_v3 = vpack.c.bf16 %v811_v2, %v811_v2 }
 0x48d   : > { %1521 = vmatmul.mubr.msk.bf16.vlgmr.msra.gmra.mxu0 %vm582_vm4, %v812_v3 }
 0x48e   : > { %1532 = vmatprep.mubr.msk.bf16.mxu0 %vm1652_vm1, %v1651_v9  ;;  %1531 = vmatpush3.bf16.msra.mxu0 %v912_v14 }
 0x48f   : > { %1547 = vmatprep.subr.bf16.mxu0 %v1651_v9 }
 0x4af   : > { %v667_v4 = vpop.xlane.xlu1 %666 }
 0x4b0   : > { %1617 = vrcp.f32 %v667_v4 }
 0x4b3   : > { %v674_v5 = vpop.permute.xlu1 %673 }
 0x4b4   : > { %v680_v6 = vsel %vm678_vm5, %v674_v5, 0 }
 0x4b5   : > { %1508 = vmatpush3.bf16.msra.mxu1 %v680_v6 }
 0x4b6   : > { %1524 = vmatprep.subr.bf16.mxu1 %v1651_v9 }
 0x4b7   : > { %v955_v21 = vpop.permute.xlu1 %954 }
 0x4bd   : > { %v1618_v7 = vpop.eup %1617 }
 0x4be   : > { %v669_v10 = vmul.f32 %v1618_v7, %v1614_v61 }
 0x4c0   : > { %v670_v11 = vpack.c.bf16 %v669_v10, %v669_v10 }
 0x4c2   : > { %1510 = vmatmul.mubr.msk.bf16.vlgmr.msra.gmra.mxu1 %vm582_vm4, %v670_v11 }
 0x4c3   : > { %1525 = vmatpush3.bf16.msra.mxu1 %v866_v12  ;;  %1526 = vmatprep.mubr.msk.bf16.mxu1 %vm1652_vm1, %v1651_v9  ;;  %v575_v12 = vld [vmem:[%s1917_s7 + $0xc] sm:$0xf] }
 0x4c4   : > { %1536 = vmatprep.subr.mxu1 %v1651_v9 }
 0x54d   : > { %v855_v15 = vpop.f32.mrf.mxu0 }
 0x54e   : > { %v861_v16 = vpack.c.bf16 %v855_v15, %v855_v15 }
 0x54f   : > { %v1522_v17 = vpop.f32.mrf.mxu0 }
 0x550   : > { %1527 = vmatmul.mubr.msk.bf16.vlgmr.msra.gmra.mxu1 %vm582_vm4, %v861_v16 }
 0x551   : > { %1537 = vmatpush3.xpose.msk.msra.mxu1 %vm582_vm4, %v957_v18  ;;  %v858_v19 = vpop.f32.mrf.mxu0  ;;  %1538 = vmatprep.mubr.msk.f32.mxu1 %vm1652_vm1, %v1651_v9 }
 0x552   : > { %1541 = vmatprep.subr.bf16.mxu1 %v1651_v9 }
 0x553   : > { %v1523_v20 = vpop.f32.mrf.mxu0 }
 0x558   : > { %1539 = vmatmul.mubr.msk.f32.vlgmr.msra.gmra.mxu1 %vm582_vm4, %v955_v21 }
 0x559   : > { %1543 = vmatprep.mubr.msk.bf16.mxu1 %vm1652_vm1, %v1651_v9 }
 0x582   : > { %v716_v22 = vpop.f32.mrf.mxu1 }
 0x583   : > { %v722_v23 = vpack.c.bf16 %v716_v22, %v716_v22 }
 0x584   : > { %v1511_v24 = vpop.f32.mrf.mxu1 }
 0x585   : > { %1533 = vmatmul.mubr.msk.bf16.vlgmr.msra.gmra.mxu0 %vm582_vm4, %v722_v23 }
 0x586   : > { %v719_v25 = vpop.f32.mrf.mxu1  ;;  %1549 = vmatprep.mubr.msk.bf16.mxu0 %vm1652_vm1, %v1651_v9 }
 0x588   : > { %v1512_v26 = vpop.f32.mrf.mxu1 }
 0x589   : > { %v1453_v26 = vld [vmem:[%s1918_s8] ss:$0 sm:$0xff] }
 0x610   : > { %v902_v27 = vpop.f32.mrf.mxu1 }
 0x612   : > { %v1528_v28 = vpop.f32.mrf.mxu1 }
 0x614   : > { %v905_v29 = vpop.f32.mrf.mxu1 }
 0x616   : > { %v1529_v30 = vpop.f32.mrf.mxu1 }
 0x618   : > { %v1028_v32 = vpop.f32.mrf.mxu1 }
 0x619   : > { %v1029_v33 = vadd.f32 %v1809_v43, %v1028_v32 }
 0x61a   : > { %v1540_v35 = vpop.f32.mrf.mxu1 }
 0x61b   : > { %v1032_v36 = vsel %vm582_vm4, %v1029_v33, -inf }
 0x61c   : > { %1033 = vmax.xlane.f32.xlu1 %v1032_v36 }
 0x62d   : > { %1044 = vrot.lane.b32.xlu1 %v1815_v48, %s1657_s18 }
 0x631   : > { %1140 = vrot.lane.b32.xlu1 %v1792_v34, %s1658_s19 }
 0x645   : > { %v948_v37 = vpop.f32.mrf.mxu0 }
 0x646   : > { %v949_v38 = vadd.f32 %v948_v37, %v902_v27 }
 0x647   : > { %v1534_v39 = vpop.f32.mrf.mxu0 }
 0x649   : > { %v951_v40 = vpop.f32.mrf.mxu0 }
 0x64b   : > { %v1535_v41 = vpop.f32.mrf.mxu0 }
 0x6a5   : > { %v1034_v42 = vpop.xlane.xlu1 %1033 }
 0x6a6   : > { %v1035_v44 = vsub.f32 %v1029_v33, %v1034_v42 }
 0x6a8   : > { %v1036_v45 = vmul.f32 1.442695, %v1035_v44 }
 0x6a9   : > { %v1045_v46 = vpop.permute.xlu1 %1044 }
 0x6aa   : > { %1619 = vpow2.f32 %v1036_v45  ;;  %v1050_v47 = vsel %vm678_vm5, %v1045_v46, 0 }
 0x6ab   : > { %1542 = vmatpush3.bf16.msra.mxu1 %v1050_v47 }
 0x6ac   : > { %1553 = vmatprep.subr.mxu1 %v1651_v9 }
 0x6ad   : > { %v1141_v55 = vpop.permute.xlu1 %1140 }
 0x6b7   : > { %v1620_v49 = vpop.eup %1619 }
 0x6b8   : > { %v1038_v50 = vsel %vm582_vm4, %v1620_v49, 0.0 }
 0x6b9   : > { %1039 = vadd.xlane.f32.xlu0 %v1038_v50 }
 0x6cf   : > { %1142 = vrot.lane.b32.xlu0 %v1787_v31, %s1658_s19  ;;  %v574_v31 = vld [vmem:[%s1917_s7 + $0x8] sm:$0xf] }
 0x6d0   : > { %v1097_v56 = vsel %vm678_vm5, %v574_v31, 0 }
 0x6d1   : > { %1548 = vmatpush3.bf16.msra.mxu0 %v1097_v56 }
 0x6d2   : > { %1558 = vmatprep.subr.bf16.mxu0 %v1651_v9 }
 0x742   : > { %v1040_v34 = vpop.xlane.xlu0 %1039 }
 0x743   : > { %1621 = vrcp.f32 %v1040_v34 }
 0x746   : > { %v1143_v54 = vpop.permute.xlu0 %1142 }
 0x750   : > { %v1622_v51 = vpop.eup %1621 }
 0x751   : > { %v1042_v52 = vmul.f32 %v1622_v51, %v1620_v49 }
 0x753   : > { %v1043_v53 = vpack.c.bf16 %v1042_v52, %v1042_v52 }
 0x755   : > { %1544 = vmatmul.mubr.msk.bf16.vlgmr.msra.gmra.mxu1 %vm582_vm4, %v1043_v53 }
 0x756   : > { %1554 = vmatpush3.xpose.msk.msra.mxu1 %vm582_vm4, %v1143_v54  ;;  %1555 = vmatprep.mubr.msk.f32.mxu1 %vm1652_vm1, %v1651_v9 }
 0x757   : > { %1564 = vmatprep.subr.bf16.mxu1 %v1651_v9 }
 0x75d   : > { %1556 = vmatmul.mubr.msk.f32.vlgmr.msra.gmra.mxu1 %vm582_vm4, %v1141_v55 }
 0x75e   : > { %1566 = vmatprep.mubr.msk.bf16.mxu1 %vm1652_vm1, %v1651_v9 }
 0x815   : > { %v1086_v57 = vpop.f32.mrf.mxu1 }
 0x816   : > { %v1092_v58 = vpack.c.bf16 %v1086_v57, %v1086_v57 }
 0x817   : > { %v1545_v59 = vpop.f32.mrf.mxu1 }
 0x818   : > { %1550 = vmatmul.mubr.msk.bf16.vlgmr.msra.gmra.mxu0 %vm582_vm4, %v1092_v58 }
 0x819   : > { %v1089_v60 = vpop.f32.mrf.mxu1  ;;  %1560 = vmatprep.mubr.msk.bf16.mxu0 %vm1652_vm1, %v1651_v9 }
 0x81b   : > { %v1546_v61 = vpop.f32.mrf.mxu1 }
 0x81d   : > { %v1214_v62 = vpop.f32.mrf.mxu1 }
 0x81e   : > { %v1215_v63 = vadd.f32 %v1809_v43, %v1214_v62 }
 0x81f   : > { %v1557_v1 = vpop.f32.mrf.mxu1 }
 0x820   : > { %v1218_v2 = vsel %vm582_vm4, %v1215_v63, -inf }
 0x821   : > { %1219 = vmax.xlane.f32.xlu1 %v1218_v2 }
 0x832   : > { %1230 = vrot.lane.b32.xlu1 %v1815_v48, %s1659_s22  ;;  %v1283_v48 = vsel %vm678_vm5, %v575_v12, 0 }
 0x833   : > { %1565 = vmatpush3.bf16.msra.mxu1 %v1283_v48 }
 0x8aa   : > { %v1220_v3 = vpop.xlane.xlu1 %1219 }
 0x8ab   : > { %v1221_v4 = vsub.f32 %v1215_v63, %v1220_v3 }
 0x8ad   : > { %v1222_v5 = vmul.f32 1.442695, %v1221_v4 }
 0x8ae   : > { %v1231_v6 = vpop.permute.xlu1 %1230 }
 0x8af   : > { %1623 = vpow2.f32 %v1222_v5  ;;  %v1236_v7 = vsel %vm678_vm5, %v1231_v6, 0 }
 0x8b0   : > { %1559 = vmatpush3.bf16.msra.mxu0 %v1236_v7 }
 0x8bc   : > { %v1624_v9 = vpop.eup %1623 }
 0x8bd   : > { %v1224_v8 = vsel %vm582_vm4, %v1624_v9, 0.0 }
 0x8be   : > { %1225 = vadd.xlane.f32.xlu0 %v1224_v8 }
 0x8d8   : > { %v1133_v43 = vpop.f32.mrf.mxu0 }
 0x8d9   : > { %v1139_v10 = vadd.f32 %v1133_v43, %v949_v38 }
 0x8da   : > { %v1551_v11 = vpop.f32.mrf.mxu0 }
 0x8dc   : > { %v1136_v13 = vpop.f32.mrf.mxu0 }
 0x8de   : > { %v1552_v14 = vpop.f32.mrf.mxu0 }
 0x947   : > { %v1226_v15 = vpop.xlane.xlu0 %1225 }
 0x948   : > { %1625 = vrcp.f32 %v1226_v15 }
 0x955   : > { %v1626_v16 = vpop.eup %1625 }
 0x956   : > { %v1228_v17 = vmul.f32 %v1626_v16, %v1624_v9 }
 0x958   : > { %v1229_v18 = vpack.c.bf16 %v1228_v17, %v1228_v17 }
 0x95a   : > { %1561 = vmatmul.mubr.msk.bf16.vlgmr.msra.gmra.mxu0 %vm582_vm4, %v1229_v18 }
 0xa1a   : > { %v1272_v19 = vpop.f32.mrf.mxu0 }
 0xa1b   : > { %v1278_v20 = vpack.c.bf16 %v1272_v19, %v1272_v19 }
 0xa1c   : > { %v1562_v21 = vpop.f32.mrf.mxu0 }
 0xa1d   : > { %1567 = vmatmul.mubr.msk.bf16.vlgmr.msra.gmra.mxu1 %vm582_vm4, %v1278_v20 }
 0xa1e   : > { %v1275_v22 = vpop.f32.mrf.mxu0 }
 0xa20   : > { %v1563_v23 = vpop.f32.mrf.mxu0 }
 0xadd   : > { %v1319_v24 = vpop.f32.mrf.mxu1 }
 0xade   : > { %v1325_v25 = vadd.f32 %v1319_v24, %v1139_v10 }
 0xadf   : > { %v1568_v27 = vpop.f32.mrf.mxu1 }
 0xae0   : > { %v1326_v28 = vadd.f32 %v1325_v25, %v1741_v0 }
 0xae1   : > { %v1322_v29 = vpop.f32.mrf.mxu1 }
 0xae2   : > { %v1334_v30 = vadd.f32 %v1453_v26, %v1326_v28 }
 0xae3   : > { %v1569_v32 = vpop.f32.mrf.mxu1 }
 0xae4   : > { %1335 = vst.msk [vmem:[%s399_s29] sm:$0xff] %vm404_vm0, %v1334_v30 }
 0xae5 PF: > { %s20_s15 = sadd.s32 1, %s1649_s15   ;;  %s1921_s13 = smov %s1645_s14 }
 0xae6   : > { %p17_p5 = scmp.ge.s32.totalorder %s20_s15, 4   ;;  %s1922_s14 = smov %s1924_s16 }
 0xae8   :  { %19 = sbr.rel (!%p17_p5) target bundleno = 2 (0x2), region = 93 }

// kernel: encoder_decoder_forward.17
= control target key start
LH: loop header
LB: loop body
LE: loop exit
PB: predicated region body
PF: predicated region fallthrough
CT: control target
= control target key end

     0   :  { %s1729_s13 = smov 0   ;;  %s1731_s14 = smov 0   ;;  %s1921_s0 = inlined_call_operand.vmem [shape: f32[2,8,32], index: 0, kind: input, shape index: {}, may-alias: {0,10}]   ;;  %s1922_s1 = inlined_call_operand.vmem [shape: f32[1,32], index: 1, kind: input, shape index: {}]   ;;  %s1923_s2 = inlined_call_operand.vmem [shape: f32[1,32], index: 2, kind: input, shape index: {}]   ;;  %s1924_s3 = inlined_call_operand.vmem [shape: bf16[32,32], index: 3, kind: input, shape index: {}]   ;;  %s1925_s4 = inlined_call_operand.vmem [shape: f32[1,32], index: 4, kind: input, shape index: {}]   ;;  %s1926_s5 = inlined_call_operand.vmem [shape: bf16[32,64], index: 5, kind: input, shape index: {}]   ;;  %s1927_s6 = inlined_call_operand.vmem [shape: f32[1,64], index: 6, kind: input, shape index: {}]   ;;  %s1928_s7 = inlined_call_operand.vmem [shape: bf16[32,32], index: 7, kind: input, shape index: {}]   ;;  %s1929_s8 = inlined_call_operand.vmem [shape: f32[1,32], index: 8, kind: input, shape index: {}]   ;;  %s1930_s9 = inlined_call_operand.vmem [shape: f32[2,8,8], index: 9, kind: input, shape index: {}]   ;;  %s1931_s10 = inlined_call_operand.vmem [shape: f32[2,8,32], index: 10, kind: output, shape index: {}, may-alias: {0,10}]  }
   0x1   :  { %s1733_s15 = smov 0  }
   0x2 LB: > { %s32_s16 = sadd.s32 1, %s1659_s14  ;;  %p1437_p0 = scmp.ge.s32.totalorder %s1663_s15, 1  ;;  %s1663_s15 = sphi %s1733_s15, %s20_s15   ;;  %s1659_s14 = sphi %s1731_s14, %s1933_s14   ;;  %s1655_s13 = sphi %s1729_s13, %s1932_s13  }
   0x3   : > { %p34_p1 = scmp.ge.s32.totalorder %s32_s16, 2  ;;  %p344_p2 = scmp.lt.s32.totalorder %s1663_s15, 3 }
   0x5   : > { %s1935_s16 = smov (%p34_p1, %s32_s16), 0  ;;  %p345_p3 = pnand %p1437_p0, %p344_p2 }
   0x6   : > { %p393_p4 = scmp.lt.s32.totalorder (!%p345_p3), %s1655_s13, 1  ;;  %s1667_s21 = smov (!%p345_p3), 120  }
   0x7   : > { %348 = sbr.rel (%p345_p3) target bundleno = 2789 (0xae5), region = 60  ;;  %s1668_s25 = smov (!%p345_p3), 88  }
   0x8   : > { %s1669_s26 = smov (!%p345_p3), 112   ;;  %s1670_s27 = smov (!%p345_p3), 96  }
   0x9   : > { %s1671_s12 = smov (!%p345_p3), 80  }
   0xc   : > { %s1937_s13 = smov (!%p393_p4, %s1655_s13), 1  ;;  %vm418_vm0 = vcmask 261120   ;;  %v1617_v7 = vld [vmem:[%s1924_s3 + $0x8] sm:$0xff]   ;;  %v1665_v9 = vmov 0.0   ;;  %v1619_v10 = vld [vmem:[%s1924_s3] sm:$0xff]   ;;  %vm1666_vm1 = vmmov 0  }
   0xd   : > { %s1747_s17 = sshll.u32 %s1937_s13, 3  ;;  %v1618_v8 = vld [vmem:[%s1926_s5 + $0x8] sm:$0xff]   ;;  %1500 = vmatprep.subr.bf16.mxu0 %v1665_v9  ;;  %1508 = vmatprep.subr.bf16.mxu1 %v1665_v9  ;;  %v1620_v11 = vld [vmem:[%s1926_s5] sm:$0xff]   ;;  %vm590_vm4 = vcmask 64512   ;;  %vm686_vm5 = vcmask 1043456   ;;  %s1672_s13 = smov 104  }
   0xe   : > { %s399_s20 = scalar_lea.vmem %s1921_s0, %s1747_s17  ;;  %1501 = vmatpush3.bf16.msra.mxu0 %v1617_v7  ;;  %1509 = vmatpush3.bf16.msra.mxu1 %v1618_v8  ;;  %v1441_v20 = vld [vmem:[%s1922_s1] ss:$0 sm:$0xff]  ;;  %s406_s24 = scalar_lea.vmem %s1930_s9, %s1747_s17  ;;  %v587_v8 = vld [vmem:[%s1928_s7 + $0x4] sm:$0xf] }
   0xf   : > { %v1753_v0 = vld [vmem:[%s399_s20] sm:$0xff]  ;;  %1502 = vmatprep.subr.bf16.mxu0 %v1665_v9  ;;  %1510 = vmatprep.subr.bf16.mxu1 %v1665_v9  ;;  %s1673_s20 = smov 72  }
  0x10   : > { %v419_v1 = vsel %vm418_vm0, %v1753_v0, 0.0  ;;  %1504 = vmatprep.mubr.msk.bf16.mxu0 %vm1666_vm1, %v1665_v9  ;;  %1512 = vmatprep.mubr.msk.bf16.mxu1 %vm1666_vm1, %v1665_v9  ;;  %v1442_v23 = vld [vmem:[%s1923_s2] ss:$0 sm:$0xff] }
  0x11   : > { %420 = vadd.xlane.f32.xlu0 %v419_v1  ;;  %v1447_v27 = vld [vmem:[%s1927_s6] ss:$0 sm:$0xff] }
  0x12   : > { %1503 = vmatpush3.bf16.msra.mxu0 %v1619_v10  ;;  %1511 = vmatpush3.bf16.msra.mxu1 %v1620_v11  ;;  %v1443_v30 = vld [vmem:[%s1925_s4] ss:$0 sm:$0xff] }
  0x13   : > { %1516 = vmatprep.subr.mxu0 %v1665_v9  ;;  %1521 = vmatprep.subr.bf16.mxu1 %v1665_v9  ;;  %v1821_v43 = vld [vmem:[%s406_s24] sm:$0xff] }
  0x9a   : > { %v421_v2 = vpop.xlane.xlu0 %420 }
  0x9b   : > { %v423_v3 = vmul.f32 0.03125, %v421_v2 }
  0x9d   : > { %v424_v4 = vsub.f32 %v1753_v0, %v423_v3 }
  0x9f   : > { %v425_v5 = vmul.f32 %v424_v4, %v424_v4  ;;  %v446_v21 = vmul.f32 %v1441_v20, %v424_v4 }
  0xa1   : > { %v426_v6 = vsel %vm418_vm0, %v425_v5, 0.0 }
  0xa2   : > { %427 = vadd.xlane.f32.xlu0 %v426_v6 }
 0x12b   : > { %v428_v12 = vpop.xlane.xlu0 %427 }
 0x12c   : > { %v430_v13 = vmul.f32 0.032258064, %v428_v12  ;;  %v874_v12 = vsel %vm686_vm5, %v587_v8, 0 }
 0x12e   : > { %1621 = vrsqrt.f32 %v430_v13  ;;  %vm433_vm2 = vcmp.eq.f32.partialorder %v430_v13, inf  ;;  %v436_v16 = vand.u32 2147483648, %v430_v13  ;;  %vm435_vm3 = vcmp.eq.f32.partialorder %v430_v13, 0.0 }
 0x13b   : > { %v1622_v14 = vpop.eup %1621 }
 0x13c   : > { %v432_v15 = vmul.f32 %v1622_v14, %v430_v13 }
 0x13e   : > { %v434_v17 = vsel %vm433_vm2, %v430_v13, %v432_v15  ;;  %v586_v13 = vld [vmem:[%s1928_s7] sm:$0xf] }
 0x13f   : > { %v437_v18 = vsel %vm435_vm3, %v436_v16, %v434_v17  ;;  %v920_v14 = vsel %vm686_vm5, %v586_v13, 0 }
 0x140   : > { %v438_v19 = vadd.f32 1e-06, %v437_v18 }
 0x142   : > { %1623 = vrcp.f32 %v438_v19 }
 0x14f   : > { %v1624_v22 = vpop.eup %1623 }
 0x150   : > { %v447_v24 = vmul.f32 %v1624_v22, %v446_v21 }
 0x152   : > { %v454_v25 = vadd.f32 %v1442_v23, %v447_v24 }
 0x154   : > { %v455_v26 = vpack.c.bf16 %v454_v25, %v454_v25 }
 0x156   : > { %1505 = vmatmul.mubr.msk.bf16.vlgmr.msra.gmra.mxu0 %vm418_vm0, %v455_v26  ;;  %1513 = vmatmul.mubr.msk.bf16.vlgmr.msra.gmra.mxu1 %vm418_vm0, %v455_v26 }
 0x157   : > { %1518 = vmatprep.mubr.msk.f32.mxu0 %vm1666_vm1, %v1665_v9  ;;  %1523 = vmatprep.mubr.msk.bf16.mxu1 %vm1666_vm1, %v1665_v9 }
 0x216   : > { %v516_v28 = vpop.f32.mrf.mxu0  ;;  %v579_v29 = vpop.f32.mrf.mxu1 }
 0x217   : > { %v1799_v31 = vadd.f32 %v1447_v27, %v579_v29  ;;  %v1804_v34 = vadd.f32 %v1443_v30, %v516_v28 }
 0x218   : > { %v1506_v32 = vpop.f32.mrf.mxu0  ;;  %v1514_v33 = vpop.f32.mrf.mxu1 }
 0x219   : > { %733 = vrot.lane.b32.xlu1 %v1799_v31, %s1667_s21  ;;  %1517 = vmatpush3.xpose.msk.msra.mxu0 %vm590_vm4, %v1799_v31  ;;  %v1827_v48 = vpack.c.bf16 %v1799_v31, %v1799_v31 }
 0x21a   : > { %v519_v35 = vpop.f32.mrf.mxu0  ;;  %v582_v36 = vpop.f32.mrf.mxu1  ;;  %1527 = vmatprep.subr.mxu0 %v1665_v9 }
 0x21c   : > { %v1507_v37 = vpop.f32.mrf.mxu0  ;;  %v1515_v38 = vpop.f32.mrf.mxu1  ;;  %1519 = vmatmul.mubr.msk.f32.vlgmr.msra.gmra.mxu0 %vm590_vm4, %v1804_v34 }
 0x21d   : > { %731 = vrot.lane.b32.xlu1 %v1804_v34, %s1667_s21  ;;  %1529 = vmatprep.mubr.msk.f32.mxu0 %vm1666_vm1, %v1665_v9 }
 0x28b   : > { %v734_v39 = vpop.permute.xlu1 %733 }
 0x28c   : > { %1528 = vmatpush3.xpose.msk.msra.mxu0 %vm590_vm4, %v734_v39 }
 0x28d   : > { %1532 = vmatprep.subr.bf16.mxu0 %v1665_v9 }
 0x28f   : > { %v732_v40 = vpop.permute.xlu1 %731 }
 0x290   : > { %1530 = vmatmul.mubr.msk.f32.vlgmr.msra.gmra.mxu0 %vm590_vm4, %v732_v40 }
 0x291   : > { %1534 = vmatprep.mubr.msk.bf16.mxu0 %vm1666_vm1, %v1665_v9 }
 0x2dc   : > { %v663_v41 = vpop.f32.mrf.mxu0 }
 0x2dd   : > { %v664_v49 = vadd.f32 %v663_v41, %v1821_v43 }
 0x2de   : > { %v1520_v42 = vpop.f32.mrf.mxu0 }
 0x2df   : > { %v667_v50 = vsel %vm590_vm4, %v664_v49, -inf }
 0x350   : > { %v805_v44 = vpop.f32.mrf.mxu0 }
 0x351   : > { %v806_v45 = vadd.f32 %v805_v44, %v1821_v43 }
 0x352   : > { %v1531_v46 = vpop.f32.mrf.mxu0 }
 0x353   : > { %v809_v47 = vsel %vm590_vm4, %v806_v45, -inf }
 0x354   : > { %810 = vmax.xlane.f32.xlu0 %v809_v47 }
 0x36a   : > { %821 = vrot.lane.b32.xlu0 %v1827_v48, %s1668_s25 }
 0x389   : > { %668 = vmax.xlane.f32.xlu0 %v667_v50 }
 0x39f   : > { %964 = vrot.lane.b32.xlu0 %v1799_v31, %s1669_s26 }
 0x3dd   : > { %v811_v51 = vpop.xlane.xlu0 %810 }
 0x3de   : > { %v812_v52 = vsub.f32 %v806_v45, %v811_v51 }
 0x3e0   : > { %v813_v53 = vmul.f32 1.442695, %v812_v52 }
 0x3e1   : > { %v822_v54 = vpop.permute.xlu0 %821 }
 0x3e2   : > { %1625 = vpow2.f32 %v813_v53  ;;  %v827_v55 = vsel %vm686_vm5, %v822_v54, 0 }
 0x3e3   : > { %1533 = vmatpush3.bf16.msra.mxu0 %v827_v55 }
 0x3e4   : > { %1544 = vmatprep.subr.bf16.mxu0 %v1665_v9 }
 0x3ef   : > { %v1626_v56 = vpop.eup %1625 }
 0x3f0   : > { %v815_v57 = vsel %vm590_vm4, %v1626_v56, 0.0 }
 0x3f1   : > { %816 = vadd.xlane.f32.xlu1 %v815_v57 }
 0x412   : > { %v669_v58 = vpop.xlane.xlu0 %668 }
 0x413   : > { %v670_v59 = vsub.f32 %v664_v49, %v669_v58 }
 0x415   : > { %v671_v60 = vmul.f32 1.442695, %v670_v59 }
 0x416   : > { %v965_v18 = vpop.permute.xlu0 %964 }
 0x417   : > { %1627 = vpow2.f32 %v671_v60 }
 0x424   : > { %v1628_v61 = vpop.eup %1627 }
 0x425   : > { %v673_v62 = vsel %vm590_vm4, %v1628_v61, 0.0 }
 0x426   : > { %674 = vadd.xlane.f32.xlu1 %v673_v62 }
 0x437   : > { %681 = vrot.lane.b32.xlu1 %v1827_v48, %s1670_s27  ;;  %s413_s27 = scalar_lea.vmem %s1931_s10, %s1747_s17 }
 0x43b   : > { %962 = vrot.lane.b32.xlu1 %v1804_v34, %s1669_s26 }
 0x47a   : > { %v817_v63 = vpop.xlane.xlu1 %816 }
 0x47b   : > { %1629 = vrcp.f32 %v817_v63 }
 0x488   : > { %v1630_v1 = vpop.eup %1629 }
 0x489   : > { %v819_v2 = vmul.f32 %v1630_v1, %v1626_v56 }
 0x48b   : > { %v820_v3 = vpack.c.bf16 %v819_v2, %v819_v2 }
 0x48d   : > { %1535 = vmatmul.mubr.msk.bf16.vlgmr.msra.gmra.mxu0 %vm590_vm4, %v820_v3 }
 0x48e   : > { %1546 = vmatprep.mubr.msk.bf16.mxu0 %vm1666_vm1, %v1665_v9  ;;  %1545 = vmatpush3.bf16.msra.mxu0 %v920_v14 }
 0x48f   : > { %1561 = vmatprep.subr.bf16.mxu0 %v1665_v9 }
 0x4af   : > { %v675_v4 = vpop.xlane.xlu1 %674 }
 0x4b0   : > { %1631 = vrcp.f32 %v675_v4 }
 0x4b3   : > { %v682_v5 = vpop.permute.xlu1 %681 }
 0x4b4   : > { %v688_v6 = vsel %vm686_vm5, %v682_v5, 0 }
 0x4b5   : > { %1522 = vmatpush3.bf16.msra.mxu1 %v688_v6 }
 0x4b6   : > { %1538 = vmatprep.subr.bf16.mxu1 %v1665_v9 }
 0x4b7   : > { %v963_v21 = vpop.permute.xlu1 %962 }
 0x4bd   : > { %v1632_v7 = vpop.eup %1631 }
 0x4be   : > { %v677_v10 = vmul.f32 %v1632_v7, %v1628_v61 }
 0x4c0   : > { %v678_v11 = vpack.c.bf16 %v677_v10, %v677_v10 }
 0x4c2   : > { %1524 = vmatmul.mubr.msk.bf16.vlgmr.msra.gmra.mxu1 %vm590_vm4, %v678_v11 }
 0x4c3   : > { %1539 = vmatpush3.bf16.msra.mxu1 %v874_v12  ;;  %1540 = vmatprep.mubr.msk.bf16.mxu1 %vm1666_vm1, %v1665_v9  ;;  %v589_v12 = vld [vmem:[%s1928_s7 + $0xc] sm:$0xf] }
 0x4c4   : > { %1550 = vmatprep.subr.mxu1 %v1665_v9 }
 0x54d   : > { %v863_v15 = vpop.f32.mrf.mxu0 }
 0x54e   : > { %v869_v16 = vpack.c.bf16 %v863_v15, %v863_v15 }
 0x54f   : > { %v1536_v17 = vpop.f32.mrf.mxu0 }
 0x550   : > { %1541 = vmatmul.mubr.msk.bf16.vlgmr.msra.gmra.mxu1 %vm590_vm4, %v869_v16 }
 0x551   : > { %1551 = vmatpush3.xpose.msk.msra.mxu1 %vm590_vm4, %v965_v18  ;;  %v866_v19 = vpop.f32.mrf.mxu0  ;;  %1552 = vmatprep.mubr.msk.f32.mxu1 %vm1666_vm1, %v1665_v9 }
 0x552   : > { %1555 = vmatprep.subr.bf16.mxu1 %v1665_v9 }
 0x553   : > { %v1537_v20 = vpop.f32.mrf.mxu0 }
 0x558   : > { %1553 = vmatmul.mubr.msk.f32.vlgmr.msra.gmra.mxu1 %vm590_vm4, %v963_v21 }
 0x559   : > { %1557 = vmatprep.mubr.msk.bf16.mxu1 %vm1666_vm1, %v1665_v9 }
 0x582   : > { %v724_v22 = vpop.f32.mrf.mxu1 }
 0x583   : > { %v730_v23 = vpack.c.bf16 %v724_v22, %v724_v22 }
 0x584   : > { %v1525_v24 = vpop.f32.mrf.mxu1 }
 0x585   : > { %1547 = vmatmul.mubr.msk.bf16.vlgmr.msra.gmra.mxu0 %vm590_vm4, %v730_v23 }
 0x586   : > { %v727_v25 = vpop.f32.mrf.mxu1  ;;  %1563 = vmatprep.mubr.msk.bf16.mxu0 %vm1666_vm1, %v1665_v9 }
 0x588   : > { %v1526_v26 = vpop.f32.mrf.mxu1 }
 0x589   : > { %v1467_v26 = vld [vmem:[%s1929_s8] ss:$0 sm:$0xff] }
 0x610   : > { %v910_v27 = vpop.f32.mrf.mxu1 }
 0x612   : > { %v1542_v28 = vpop.f32.mrf.mxu1 }
 0x614   : > { %v913_v29 = vpop.f32.mrf.mxu1 }
 0x616   : > { %v1543_v30 = vpop.f32.mrf.mxu1 }
 0x618   : > { %v1036_v32 = vpop.f32.mrf.mxu1 }
 0x619   : > { %v1037_v33 = vadd.f32 %v1036_v32, %v1821_v43 }
 0x61a   : > { %v1554_v35 = vpop.f32.mrf.mxu1 }
 0x61b   : > { %v1040_v36 = vsel %vm590_vm4, %v1037_v33, -inf }
 0x61c   : > { %1041 = vmax.xlane.f32.xlu1 %v1040_v36 }
 0x62d   : > { %1052 = vrot.lane.b32.xlu1 %v1827_v48, %s1671_s12 }
 0x631   : > { %1148 = vrot.lane.b32.xlu1 %v1804_v34, %s1672_s13 }
 0x645   : > { %v956_v37 = vpop.f32.mrf.mxu0 }
 0x646   : > { %v957_v38 = vadd.f32 %v956_v37, %v910_v27 }
 0x647   : > { %v1548_v39 = vpop.f32.mrf.mxu0 }
 0x649   : > { %v959_v40 = vpop.f32.mrf.mxu0 }
 0x64b   : > { %v1549_v41 = vpop.f32.mrf.mxu0 }
 0x6a5   : > { %v1042_v42 = vpop.xlane.xlu1 %1041 }
 0x6a6   : > { %v1043_v44 = vsub.f32 %v1037_v33, %v1042_v42 }
 0x6a8   : > { %v1044_v45 = vmul.f32 1.442695, %v1043_v44 }
 0x6a9   : > { %v1053_v46 = vpop.permute.xlu1 %1052 }
 0x6aa   : > { %1633 = vpow2.f32 %v1044_v45  ;;  %v1058_v47 = vsel %vm686_vm5, %v1053_v46, 0 }
 0x6ab   : > { %1556 = vmatpush3.bf16.msra.mxu1 %v1058_v47 }
 0x6ac   : > { %1567 = vmatprep.subr.mxu1 %v1665_v9 }
 0x6ad   : > { %v1149_v55 = vpop.permute.xlu1 %1148 }
 0x6b7   : > { %v1634_v49 = vpop.eup %1633 }
 0x6b8   : > { %v1046_v50 = vsel %vm590_vm4, %v1634_v49, 0.0 }
 0x6b9   : > { %1047 = vadd.xlane.f32.xlu0 %v1046_v50 }
 0x6cf   : > { %1150 = vrot.lane.b32.xlu0 %v1799_v31, %s1672_s13  ;;  %v588_v31 = vld [vmem:[%s1928_s7 + $0x8] sm:$0xf] }
 0x6d0   : > { %v1105_v56 = vsel %vm686_vm5, %v588_v31, 0 }
 0x6d1   : > { %1562 = vmatpush3.bf16.msra.mxu0 %v1105_v56 }
 0x6d2   : > { %1572 = vmatprep.subr.bf16.mxu0 %v1665_v9 }
 0x742   : > { %v1048_v34 = vpop.xlane.xlu0 %1047 }
 0x743   : > { %1635 = vrcp.f32 %v1048_v34 }
 0x746   : > { %v1151_v54 = vpop.permute.xlu0 %1150 }
 0x750   : > { %v1636_v51 = vpop.eup %1635 }
 0x751   : > { %v1050_v52 = vmul.f32 %v1636_v51, %v1634_v49 }
 0x753   : > { %v1051_v53 = vpack.c.bf16 %v1050_v52, %v1050_v52 }
 0x755   : > { %1558 = vmatmul.mubr.msk.bf16.vlgmr.msra.gmra.mxu1 %vm590_vm4, %v1051_v53 }
 0x756   : > { %1568 = vmatpush3.xpose.msk.msra.mxu1 %vm590_vm4, %v1151_v54  ;;  %1569 = vmatprep.mubr.msk.f32.mxu1 %vm1666_vm1, %v1665_v9 }
 0x757   : > { %1578 = vmatprep.subr.bf16.mxu1 %v1665_v9 }
 0x75d   : > { %1570 = vmatmul.mubr.msk.f32.vlgmr.msra.gmra.mxu1 %vm590_vm4, %v1149_v55 }
 0x75e   : > { %1580 = vmatprep.mubr.msk.bf16.mxu1 %vm1666_vm1, %v1665_v9 }
 0x815   : > { %v1094_v57 = vpop.f32.mrf.mxu1 }
 0x816   : > { %v1100_v58 = vpack.c.bf16 %v1094_v57, %v1094_v57 }
 0x817   : > { %v1559_v59 = vpop.f32.mrf.mxu1 }
 0x818   : > { %1564 = vmatmul.mubr.msk.bf16.vlgmr.msra.gmra.mxu0 %vm590_vm4, %v1100_v58 }
 0x819   : > { %v1097_v60 = vpop.f32.mrf.mxu1  ;;  %1574 = vmatprep.mubr.msk.bf16.mxu0 %vm1666_vm1, %v1665_v9 }
 0x81b   : > { %v1560_v61 = vpop.f32.mrf.mxu1 }
 0x81d   : > { %v1222_v62 = vpop.f32.mrf.mxu1 }
 0x81e   : > { %v1223_v63 = vadd.f32 %v1222_v62, %v1821_v43 }
 0x81f   : > { %v1571_v1 = vpop.f32.mrf.mxu1 }
 0x820   : > { %v1226_v2 = vsel %vm590_vm4, %v1223_v63, -inf }
 0x821   : > { %1227 = vmax.xlane.f32.xlu1 %v1226_v2 }
 0x832   : > { %1238 = vrot.lane.b32.xlu1 %v1827_v48, %s1673_s20  ;;  %v1291_v48 = vsel %vm686_vm5, %v589_v12, 0 }
 0x833   : > { %1579 = vmatpush3.bf16.msra.mxu1 %v1291_v48 }
 0x8aa   : > { %v1228_v3 = vpop.xlane.xlu1 %1227 }
 0x8ab   : > { %v1229_v4 = vsub.f32 %v1223_v63, %v1228_v3 }
 0x8ad   : > { %v1230_v5 = vmul.f32 1.442695, %v1229_v4 }
 0x8ae   : > { %v1239_v6 = vpop.permute.xlu1 %1238 }
 0x8af   : > { %1637 = vpow2.f32 %v1230_v5  ;;  %v1244_v7 = vsel %vm686_vm5, %v1239_v6, 0 }
 0x8b0   : > { %1573 = vmatpush3.bf16.msra.mxu0 %v1244_v7 }
 0x8bc   : > { %v1638_v9 = vpop.eup %1637 }
 0x8bd   : > { %v1232_v8 = vsel %vm590_vm4, %v1638_v9, 0.0 }
 0x8be   : > { %1233 = vadd.xlane.f32.xlu0 %v1232_v8 }
 0x8d8   : > { %v1141_v43 = vpop.f32.mrf.mxu0 }
 0x8d9   : > { %v1147_v10 = vadd.f32 %v1141_v43, %v957_v38 }
 0x8da   : > { %v1565_v11 = vpop.f32.mrf.mxu0 }
 0x8dc   : > { %v1144_v13 = vpop.f32.mrf.mxu0 }
 0x8de   : > { %v1566_v14 = vpop.f32.mrf.mxu0 }
 0x947   : > { %v1234_v15 = vpop.xlane.xlu0 %1233 }
 0x948   : > { %1639 = vrcp.f32 %v1234_v15 }
 0x955   : > { %v1640_v16 = vpop.eup %1639 }
 0x956   : > { %v1236_v17 = vmul.f32 %v1640_v16, %v1638_v9 }
 0x958   : > { %v1237_v18 = vpack.c.bf16 %v1236_v17, %v1236_v17 }
 0x95a   : > { %1575 = vmatmul.mubr.msk.bf16.vlgmr.msra.gmra.mxu0 %vm590_vm4, %v1237_v18 }
 0xa1a   : > { %v1280_v19 = vpop.f32.mrf.mxu0 }
 0xa1b   : > { %v1286_v20 = vpack.c.bf16 %v1280_v19, %v1280_v19 }
 0xa1c   : > { %v1576_v21 = vpop.f32.mrf.mxu0 }
 0xa1d   : > { %1581 = vmatmul.mubr.msk.bf16.vlgmr.msra.gmra.mxu1 %vm590_vm4, %v1286_v20 }
 0xa1e   : > { %v1283_v22 = vpop.f32.mrf.mxu0 }
 0xa20   : > { %v1577_v23 = vpop.f32.mrf.mxu0 }
 0xadd   : > { %v1327_v24 = vpop.f32.mrf.mxu1 }
 0xade   : > { %v1333_v25 = vadd.f32 %v1327_v24, %v1147_v10 }
 0xadf   : > { %v1582_v27 = vpop.f32.mrf.mxu1 }
 0xae0   : > { %v1334_v28 = vadd.f32 %v1333_v25, %v1753_v0 }
 0xae1   : > { %v1330_v29 = vpop.f32.mrf.mxu1 }
 0xae2   : > { %v1342_v30 = vadd.f32 %v1467_v26, %v1334_v28 }
 0xae3   : > { %v1583_v32 = vpop.f32.mrf.mxu1 }
 0xae4   : > { %1343 = vst.msk [vmem:[%s413_s27] sm:$0xff] %vm418_vm0, %v1342_v30 }
 0xae5 PF: > { %s20_s15 = sadd.s32 1, %s1663_s15   ;;  %s1932_s13 = smov %s1659_s14 }
 0xae6   : > { %p17_p5 = scmp.ge.s32.totalorder %s20_s15, 4   ;;  %s1933_s14 = smov %s1935_s16 }
 0xae8   :  { %19 = sbr.rel (!%p17_p5) target bundleno = 2 (0x2), region = 93 }

// kernel: encoder_decoder_forward.18
= control target key start
LH: loop header
LB: loop body
LE: loop exit
PB: predicated region body
PF: predicated region fallthrough
CT: control target
= control target key end

     0   :  { %s1782_s17 = smov 0   ;;  %s1784_s18 = smov 0   ;;  %s1981_s0 = inlined_call_operand.vmem [shape: f32[2,8,32], index: 0, kind: input, shape index: {}, may-alias: {0,11}]   ;;  %s1982_s1 = inlined_call_operand.vmem [shape: f32[2,8,32], index: 1, kind: input, shape index: {}]   ;;  %s1983_s2 = inlined_call_operand.vmem [shape: f32[1,32], index: 2, kind: input, shape index: {}]   ;;  %s1984_s3 = inlined_call_operand.vmem [shape: f32[1,32], index: 3, kind: input, shape index: {}]   ;;  %s1985_s4 = inlined_call_operand.vmem [shape: bf16[32,32], index: 4, kind: input, shape index: {}]   ;;  %s1986_s5 = inlined_call_operand.vmem [shape: f32[1,32], index: 5, kind: input, shape index: {}]   ;;  %s1987_s6 = inlined_call_operand.vmem [shape: bf16[32,64], index: 6, kind: input, shape index: {}]   ;;  %s1988_s7 = inlined_call_operand.vmem [shape: f32[1,64], index: 7, kind: input, shape index: {}]   ;;  %s1989_s8 = inlined_call_operand.vmem [shape: bf16[32,32], index: 8, kind: input, shape index: {}]   ;;  %s1990_s9 = inlined_call_operand.vmem [shape: f32[1,32], index: 9, kind: input, shape index: {}]   ;;  %s1991_s10 = inlined_call_operand.vmem [shape: f32[2,1,8], index: 10, kind: input, shape index: {}]   ;;  %s1992_s11 = inlined_call_operand.vmem [shape: f32[2,8,32], index: 11, kind: output, shape index: {}, may-alias: {0,11}]  }
   0x1   :  { %s1786_s19 = smov 0  }
   0x2 LB: > { %s33_s20 = sadd.s32 1, %s1707_s18  ;;  %p1484_p0 = scmp.ge.s32.totalorder %s1711_s19, 1  ;;  %s1711_s19 = sphi %s1786_s19, %s21_s19   ;;  %s1707_s18 = sphi %s1784_s18, %s1994_s18   ;;  %s1703_s17 = sphi %s1782_s17, %s1993_s17  }
   0x3   : > { %p35_p1 = scmp.ge.s32.totalorder %s33_s20, 2  ;;  %p372_p2 = scmp.lt.s32.totalorder %s1711_s19, 3 }
   0x5   : > { %s1996_s20 = smov (%p35_p1, %s33_s20), 0  ;;  %p373_p3 = pnand %p1484_p0, %p372_p2 }
   0x6   : > { %p423_p4 = scmp.lt.s32.totalorder (!%p373_p3), %s1703_s17, 1  ;;  %s1715_s28 = smov (!%p373_p3), 120  }
   0x7   : > { %376 = sbr.rel (%p373_p3) target bundleno = 2785 (0xae1), region = 64  ;;  %s1716_s15 = smov (!%p373_p3), 88  }
   0x8   : > { %s1718_s16 = smov (!%p373_p3), 96   ;;  %s1719_s26 = smov (!%p373_p3), 80  }
   0x9   : > { %s1720_s27 = smov (!%p373_p3), 104   ;;  %s1721_s30 = smov (!%p373_p3), 72  }
   0xc   : > { %s1998_s17 = smov (!%p423_p4, %s1703_s17), 1  ;;  %vm448_vm0 = vcmask 261120   ;;  %v1665_v7 = vld [vmem:[%s1987_s6 + $0x8] sm:$0xff]   ;;  %v1713_v9 = vmov 0.0   ;;  %vm1714_vm1 = vmmov 0   ;;  %v1666_v10 = vld [vmem:[%s1987_s6] sm:$0xff]  }
   0xd   : > { %s1803_s21 = sshll.u32 %s1998_s17, 3  ;;  %v1667_v8 = vld [vmem:[%s1985_s4 + $0x8] sm:$0xff]   ;;  %1556 = vmatprep.subr.bf16.mxu1 %v1713_v9  ;;  %1560 = vmatprep.mubr.msk.bf16.mxu1 %vm1714_vm1, %v1713_v9  ;;  %v1668_v12 = vld [vmem:[%s1985_s4] sm:$0xff]   ;;  %vm631_vm4 = vcmask 64512   ;;  %s436_s14 = scalar_lea.vmem %s1991_s10, %s1998_s17  ;;  %vm727_vm5 = vcmask 1043456  }
   0xe   : > { %s429_s24 = scalar_lea.vmem %s1981_s0, %s1803_s21  ;;  %s433_s29 = scalar_lea.vmem %s1982_s1, %s1803_s21  ;;  %1557 = vmatpush3.bf16.msra.mxu1 %v1665_v7  ;;  %1548 = vmatprep.subr.bf16.mxu0 %v1713_v9  ;;  %v1488_v22 = vld [vmem:[%s1983_s2] ss:$0 sm:$0xff] }
   0xf   : > { %v1809_v0 = vld [vmem:[%s429_s24] sm:$0xff]  ;;  %1558 = vmatprep.subr.bf16.mxu1 %v1713_v9  ;;  %1549 = vmatpush3.bf16.msra.mxu0 %v1667_v8  ;;  %s1717_s17 = smov 112   ;;  %s443_s22 = scalar_lea.vmem %s1992_s11, %s1803_s21 }
  0x10   : > { %v449_v1 = vsel %vm448_vm0, %v1809_v0, 0.0  ;;  %v486_v11 = vld [vmem:[%s433_s29] sm:$0xff]  ;;  %1550 = vmatprep.subr.bf16.mxu0 %v1713_v9  ;;  %1552 = vmatprep.mubr.msk.bf16.mxu0 %vm1714_vm1, %v1713_v9 }
  0x11   : > { %450 = vadd.xlane.f32.xlu0 %v449_v1  ;;  %v487_v13 = vpack.c.bf16 %v486_v11, %v486_v11  ;;  %v1489_v25 = vld [vmem:[%s1984_s3] ss:$0 sm:$0xff]  ;;  %v622_v11 = vld [vmem:[%s1989_s8 + $0x4] sm:$0xf] }
  0x12   : > { %1559 = vmatpush3.bf16.msra.mxu1 %v1666_v10  ;;  %v1494_v29 = vld [vmem:[%s1988_s7] ss:$0 sm:$0xff] }
  0x13   : > { %1551 = vmatpush3.bf16.msra.mxu0 %v1668_v12  ;;  %1569 = vmatprep.subr.bf16.mxu1 %v1713_v9  ;;  %v1490_v35 = vld [vmem:[%s1986_s5] ss:$0 sm:$0xff] }
  0x14   : > { %1564 = vmatprep.subr.mxu0 %v1713_v9  ;;  %v1881_v45 = vld [vmem:[%s436_s14] ss:$0 sm:$0xff] }
  0x15   : > { %1561 = vmatmul.mubr.msk.bf16.vlgmr.msra.gmra.mxu1 %vm448_vm0, %v487_v13 }
  0x16   : > { %1571 = vmatprep.mubr.msk.bf16.mxu1 %vm1714_vm1, %v1713_v9 }
  0x9a   : > { %v451_v2 = vpop.xlane.xlu0 %450 }
  0x9b   : > { %v453_v3 = vmul.f32 0.03125, %v451_v2 }
  0x9d   : > { %v454_v4 = vsub.f32 %v1809_v0, %v453_v3 }
  0x9f   : > { %v455_v5 = vmul.f32 %v454_v4, %v454_v4  ;;  %v476_v23 = vmul.f32 %v1488_v22, %v454_v4 }
  0xa1   : > { %v456_v6 = vsel %vm448_vm0, %v455_v5, 0.0 }
  0xa2   : > { %457 = vadd.xlane.f32.xlu0 %v456_v6 }
  0xd5   : > { %v614_v30 = vpop.f32.mrf.mxu1 }
  0xd6   : > { %v1856_v31 = vadd.f32 %v1494_v29, %v614_v30 }
  0xd7   : > { %v1562_v32 = vpop.f32.mrf.mxu1 }
  0xd8   : > { %774 = vrot.lane.b32.xlu1 %v1856_v31, %s1715_s28  ;;  %v1887_v50 = vpack.c.bf16 %v1856_v31, %v1856_v31 }
  0xd9   : > { %v617_v33 = vpop.f32.mrf.mxu1 }
  0xdb   : > { %v1563_v34 = vpop.f32.mrf.mxu1 }
 0x12b   : > { %v458_v14 = vpop.xlane.xlu0 %457 }
 0x12c   : > { %v460_v15 = vmul.f32 0.032258064, %v458_v14  ;;  %v915_v14 = vsel %vm727_vm5, %v622_v11, 0 }
 0x12e   : > { %1669 = vrsqrt.f32 %v460_v15  ;;  %vm463_vm2 = vcmp.eq.f32.partialorder %v460_v15, inf  ;;  %v466_v18 = vand.u32 2147483648, %v460_v15  ;;  %vm465_vm3 = vcmp.eq.f32.partialorder %v460_v15, 0.0 }
 0x13b   : > { %v1670_v16 = vpop.eup %1669 }
 0x13c   : > { %v462_v17 = vmul.f32 %v1670_v16, %v460_v15 }
 0x13e   : > { %v464_v19 = vsel %vm463_vm2, %v460_v15, %v462_v17  ;;  %v621_v15 = vld [vmem:[%s1989_s8] sm:$0xf] }
 0x13f   : > { %v467_v20 = vsel %vm465_vm3, %v466_v18, %v464_v19  ;;  %v961_v16 = vsel %vm727_vm5, %v621_v15, 0 }
 0x140   : > { %v468_v21 = vadd.f32 1e-06, %v467_v20 }
 0x142   : > { %1671 = vrcp.f32 %v468_v21 }
 0x14a   : > { %v775_v38 = vpop.permute.xlu1 %774 }
 0x14f   : > { %v1672_v24 = vpop.eup %1671 }
 0x150   : > { %v477_v26 = vmul.f32 %v1672_v24, %v476_v23 }
 0x152   : > { %v484_v27 = vadd.f32 %v1489_v25, %v477_v26 }
 0x154   : > { %v485_v28 = vpack.c.bf16 %v484_v27, %v484_v27 }
 0x156   : > { %1553 = vmatmul.mubr.msk.bf16.vlgmr.msra.gmra.mxu0 %vm448_vm0, %v485_v28 }
 0x157   : > { %1566 = vmatprep.mubr.msk.f32.mxu0 %vm1714_vm1, %v1713_v9  ;;  %1565 = vmatpush3.xpose.msk.msra.mxu0 %vm631_vm4, %v1856_v31 }
 0x158   : > { %1575 = vmatprep.subr.mxu0 %v1713_v9 }
 0x216   : > { %v548_v36 = vpop.f32.mrf.mxu0 }
 0x217   : > { %v1865_v37 = vadd.f32 %v1490_v35, %v548_v36 }
 0x218   : > { %v1554_v39 = vpop.f32.mrf.mxu0 }
 0x219   : > { %772 = vrot.lane.b32.xlu1 %v1865_v37, %s1715_s28  ;;  %1567 = vmatmul.mubr.msk.f32.vlgmr.msra.gmra.mxu0 %vm631_vm4, %v1865_v37 }
 0x21a   : > { %v551_v40 = vpop.f32.mrf.mxu0  ;;  %1576 = vmatpush3.xpose.msk.msra.mxu0 %vm631_vm4, %v775_v38  ;;  %1577 = vmatprep.mubr.msk.f32.mxu0 %vm1714_vm1, %v1713_v9 }
 0x21b   : > { %1580 = vmatprep.subr.bf16.mxu0 %v1713_v9 }
 0x21c   : > { %v1555_v41 = vpop.f32.mrf.mxu0 }
 0x28b   : > { %v773_v42 = vpop.permute.xlu1 %772 }
 0x28c   : > { %1578 = vmatmul.mubr.msk.f32.vlgmr.msra.gmra.mxu0 %vm631_vm4, %v773_v42 }
 0x28d   : > { %1582 = vmatprep.mubr.msk.bf16.mxu0 %vm1714_vm1, %v1713_v9 }
 0x2d9   : > { %v704_v43 = vpop.f32.mrf.mxu0 }
 0x2da   : > { %v705_v51 = vadd.f32 %v1881_v45, %v704_v43 }
 0x2db   : > { %v1568_v44 = vpop.f32.mrf.mxu0 }
 0x2dc   : > { %v708_v52 = vsel %vm631_vm4, %v705_v51, -inf }
 0x34c   : > { %v846_v46 = vpop.f32.mrf.mxu0 }
 0x34d   : > { %v847_v47 = vadd.f32 %v1881_v45, %v846_v46 }
 0x34e   : > { %v1579_v48 = vpop.f32.mrf.mxu0 }
 0x34f   : > { %v850_v49 = vsel %vm631_vm4, %v847_v47, -inf }
 0x350   : > { %851 = vmax.xlane.f32.xlu0 %v850_v49 }
 0x366   : > { %862 = vrot.lane.b32.xlu0 %v1887_v50, %s1716_s15 }
 0x385   : > { %709 = vmax.xlane.f32.xlu0 %v708_v52 }
 0x39b   : > { %1005 = vrot.lane.b32.xlu0 %v1856_v31, %s1717_s17 }
 0x3d9   : > { %v852_v53 = vpop.xlane.xlu0 %851 }
 0x3da   : > { %v853_v54 = vsub.f32 %v847_v47, %v852_v53 }
 0x3dc   : > { %v854_v55 = vmul.f32 1.442695, %v853_v54 }
 0x3dd   : > { %v863_v56 = vpop.permute.xlu0 %862 }
 0x3de   : > { %1673 = vpow2.f32 %v854_v55  ;;  %v868_v57 = vsel %vm727_vm5, %v863_v56, 0 }
 0x3df   : > { %1581 = vmatpush3.bf16.msra.mxu0 %v868_v57 }
 0x3e0   : > { %1592 = vmatprep.subr.bf16.mxu0 %v1713_v9 }
 0x3eb   : > { %v1674_v58 = vpop.eup %1673 }
 0x3ec   : > { %v856_v59 = vsel %vm631_vm4, %v1674_v58, 0.0 }
 0x3ed   : > { %857 = vadd.xlane.f32.xlu1 %v856_v59 }
 0x40e   : > { %v710_v60 = vpop.xlane.xlu0 %709 }
 0x40f   : > { %v711_v61 = vsub.f32 %v705_v51, %v710_v60 }
 0x411   : > { %v712_v62 = vmul.f32 1.442695, %v711_v61 }
 0x412   : > { %v1006_v20 = vpop.permute.xlu0 %1005 }
 0x413   : > { %1675 = vpow2.f32 %v712_v62 }
 0x420   : > { %v1676_v63 = vpop.eup %1675 }
 0x421   : > { %v714_v1 = vsel %vm631_vm4, %v1676_v63, 0.0 }
 0x422   : > { %715 = vadd.xlane.f32.xlu1 %v714_v1 }
 0x433   : > { %722 = vrot.lane.b32.xlu1 %v1887_v50, %s1718_s16 }
 0x437   : > { %1003 = vrot.lane.b32.xlu1 %v1865_v37, %s1717_s17 }
 0x476   : > { %v858_v2 = vpop.xlane.xlu1 %857 }
 0x477   : > { %1677 = vrcp.f32 %v858_v2 }
 0x484   : > { %v1678_v3 = vpop.eup %1677 }
 0x485   : > { %v860_v4 = vmul.f32 %v1678_v3, %v1674_v58 }
 0x487   : > { %v861_v5 = vpack.c.bf16 %v860_v4, %v860_v4 }
 0x489   : > { %1583 = vmatmul.mubr.msk.bf16.vlgmr.msra.gmra.mxu0 %vm631_vm4, %v861_v5 }
 0x48a   : > { %1594 = vmatprep.mubr.msk.bf16.mxu0 %vm1714_vm1, %v1713_v9  ;;  %1593 = vmatpush3.bf16.msra.mxu0 %v961_v16 }
 0x48b   : > { %1609 = vmatprep.subr.bf16.mxu0 %v1713_v9 }
 0x4ab   : > { %v716_v6 = vpop.xlane.xlu1 %715 }
 0x4ac   : > { %1679 = vrcp.f32 %v716_v6 }
 0x4af   : > { %v723_v7 = vpop.permute.xlu1 %722 }
 0x4b0   : > { %v729_v8 = vsel %vm727_vm5, %v723_v7, 0 }
 0x4b1   : > { %1570 = vmatpush3.bf16.msra.mxu1 %v729_v8 }
 0x4b2   : > { %1586 = vmatprep.subr.bf16.mxu1 %v1713_v9 }
 0x4b3   : > { %v1004_v23 = vpop.permute.xlu1 %1003 }
 0x4b9   : > { %v1680_v10 = vpop.eup %1679 }
 0x4ba   : > { %v718_v12 = vmul.f32 %v1680_v10, %v1676_v63 }
 0x4bc   : > { %v719_v13 = vpack.c.bf16 %v718_v12, %v718_v12 }
 0x4be   : > { %1572 = vmatmul.mubr.msk.bf16.vlgmr.msra.gmra.mxu1 %vm631_vm4, %v719_v13 }
 0x4bf   : > { %1587 = vmatpush3.bf16.msra.mxu1 %v915_v14  ;;  %1588 = vmatprep.mubr.msk.bf16.mxu1 %vm1714_vm1, %v1713_v9  ;;  %v624_v14 = vld [vmem:[%s1989_s8 + $0xc] sm:$0xf] }
 0x4c0   : > { %1598 = vmatprep.subr.mxu1 %v1713_v9 }
 0x549   : > { %v904_v17 = vpop.f32.mrf.mxu0 }
 0x54a   : > { %v910_v18 = vpack.c.bf16 %v904_v17, %v904_v17 }
 0x54b   : > { %v1584_v19 = vpop.f32.mrf.mxu0 }
 0x54c   : > { %1589 = vmatmul.mubr.msk.bf16.vlgmr.msra.gmra.mxu1 %vm631_vm4, %v910_v18 }
 0x54d   : > { %1599 = vmatpush3.xpose.msk.msra.mxu1 %vm631_vm4, %v1006_v20  ;;  %v907_v21 = vpop.f32.mrf.mxu0  ;;  %1600 = vmatprep.mubr.msk.f32.mxu1 %vm1714_vm1, %v1713_v9 }
 0x54e   : > { %1603 = vmatprep.subr.bf16.mxu1 %v1713_v9 }
 0x54f   : > { %v1585_v22 = vpop.f32.mrf.mxu0 }
 0x554   : > { %1601 = vmatmul.mubr.msk.f32.vlgmr.msra.gmra.mxu1 %vm631_vm4, %v1004_v23 }
 0x555   : > { %1605 = vmatprep.mubr.msk.bf16.mxu1 %vm1714_vm1, %v1713_v9 }
 0x57e   : > { %v765_v24 = vpop.f32.mrf.mxu1 }
 0x57f   : > { %v771_v25 = vpack.c.bf16 %v765_v24, %v765_v24 }
 0x580   : > { %v1573_v26 = vpop.f32.mrf.mxu1 }
 0x581   : > { %1595 = vmatmul.mubr.msk.bf16.vlgmr.msra.gmra.mxu0 %vm631_vm4, %v771_v25 }
 0x582   : > { %v768_v27 = vpop.f32.mrf.mxu1  ;;  %1611 = vmatprep.mubr.msk.bf16.mxu0 %vm1714_vm1, %v1713_v9 }
 0x584   : > { %v1574_v28 = vpop.f32.mrf.mxu1 }
 0x585   : > { %v1515_v28 = vld [vmem:[%s1990_s9] ss:$0 sm:$0xff] }
 0x60c   : > { %v951_v29 = vpop.f32.mrf.mxu1 }
 0x60e   : > { %v1590_v30 = vpop.f32.mrf.mxu1 }
 0x610   : > { %v954_v32 = vpop.f32.mrf.mxu1 }
 0x612   : > { %v1591_v33 = vpop.f32.mrf.mxu1 }
 0x614   : > { %v1077_v34 = vpop.f32.mrf.mxu1 }
 0x615   : > { %v1078_v35 = vadd.f32 %v1881_v45, %v1077_v34 }
 0x616   : > { %v1602_v36 = vpop.f32.mrf.mxu1 }
 0x617   : > { %v1081_v38 = vsel %vm631_vm4, %v1078_v35, -inf }
 0x618   : > { %1082 = vmax.xlane.f32.xlu1 %v1081_v38 }
 0x629   : > { %1093 = vrot.lane.b32.xlu1 %v1887_v50, %s1719_s26 }
 0x62d   : > { %1189 = vrot.lane.b32.xlu1 %v1865_v37, %s1720_s27 }
 0x641   : > { %v997_v39 = vpop.f32.mrf.mxu0 }
 0x642   : > { %v998_v40 = vadd.f32 %v997_v39, %v951_v29 }
 0x643   : > { %v1596_v41 = vpop.f32.mrf.mxu0 }
 0x645   : > { %v1000_v42 = vpop.f32.mrf.mxu0 }
 0x647   : > { %v1597_v43 = vpop.f32.mrf.mxu0 }
 0x6a1   : > { %v1083_v44 = vpop.xlane.xlu1 %1082 }
 0x6a2   : > { %v1084_v46 = vsub.f32 %v1078_v35, %v1083_v44 }
 0x6a4   : > { %v1085_v47 = vmul.f32 1.442695, %v1084_v46 }
 0x6a5   : > { %v1094_v48 = vpop.permute.xlu1 %1093 }
 0x6a6   : > { %1681 = vpow2.f32 %v1085_v47  ;;  %v1099_v49 = vsel %vm727_vm5, %v1094_v48, 0 }
 0x6a7   : > { %1604 = vmatpush3.bf16.msra.mxu1 %v1099_v49 }
 0x6a8   : > { %1615 = vmatprep.subr.mxu1 %v1713_v9 }
 0x6a9   : > { %v1190_v57 = vpop.permute.xlu1 %1189 }
 0x6b3   : > { %v1682_v51 = vpop.eup %1681 }
 0x6b4   : > { %v1087_v52 = vsel %vm631_vm4, %v1682_v51, 0.0 }
 0x6b5   : > { %1088 = vadd.xlane.f32.xlu0 %v1087_v52 }
 0x6cb   : > { %1191 = vrot.lane.b32.xlu0 %v1856_v31, %s1720_s27  ;;  %v623_v31 = vld [vmem:[%s1989_s8 + $0x8] sm:$0xf] }
 0x6cc   : > { %v1146_v58 = vsel %vm727_vm5, %v623_v31, 0 }
 0x6cd   : > { %1610 = vmatpush3.bf16.msra.mxu0 %v1146_v58 }
 0x6ce   : > { %1620 = vmatprep.subr.bf16.mxu0 %v1713_v9 }
 0x73e   : > { %v1089_v37 = vpop.xlane.xlu0 %1088 }
 0x73f   : > { %1683 = vrcp.f32 %v1089_v37 }
 0x742   : > { %v1192_v56 = vpop.permute.xlu0 %1191 }
 0x74c   : > { %v1684_v53 = vpop.eup %1683 }
 0x74d   : > { %v1091_v54 = vmul.f32 %v1684_v53, %v1682_v51 }
 0x74f   : > { %v1092_v55 = vpack.c.bf16 %v1091_v54, %v1091_v54 }
 0x751   : > { %1606 = vmatmul.mubr.msk.bf16.vlgmr.msra.gmra.mxu1 %vm631_vm4, %v1092_v55 }
 0x752   : > { %1616 = vmatpush3.xpose.msk.msra.mxu1 %vm631_vm4, %v1192_v56  ;;  %1617 = vmatprep.mubr.msk.f32.mxu1 %vm1714_vm1, %v1713_v9 }
 0x753   : > { %1626 = vmatprep.subr.bf16.mxu1 %v1713_v9 }
 0x759   : > { %1618 = vmatmul.mubr.msk.f32.vlgmr.msra.gmra.mxu1 %vm631_vm4, %v1190_v57 }
 0x75a   : > { %1628 = vmatprep.mubr.msk.bf16.mxu1 %vm1714_vm1, %v1713_v9 }
 0x811   : > { %v1135_v59 = vpop.f32.mrf.mxu1 }
 0x812   : > { %v1141_v60 = vpack.c.bf16 %v1135_v59, %v1135_v59 }
 0x813   : > { %v1607_v61 = vpop.f32.mrf.mxu1 }
 0x814   : > { %1612 = vmatmul.mubr.msk.bf16.vlgmr.msra.gmra.mxu0 %vm631_vm4, %v1141_v60 }
 0x815   : > { %v1138_v62 = vpop.f32.mrf.mxu1  ;;  %1622 = vmatprep.mubr.msk.bf16.mxu0 %vm1714_vm1, %v1713_v9 }
 0x817   : > { %v1608_v63 = vpop.f32.mrf.mxu1 }
 0x819   : > { %v1263_v1 = vpop.f32.mrf.mxu1 }
 0x81a   : > { %v1264_v2 = vadd.f32 %v1881_v45, %v1263_v1 }
 0x81b   : > { %v1619_v3 = vpop.f32.mrf.mxu1 }
 0x81c   : > { %v1267_v4 = vsel %vm631_vm4, %v1264_v2, -inf }
 0x81d   : > { %1268 = vmax.xlane.f32.xlu1 %v1267_v4 }
 0x82e   : > { %1279 = vrot.lane.b32.xlu1 %v1887_v50, %s1721_s30  ;;  %v1332_v50 = vsel %vm727_vm5, %v624_v14, 0 }
 0x82f   : > { %1627 = vmatpush3.bf16.msra.mxu1 %v1332_v50 }
 0x8a6   : > { %v1269_v5 = vpop.xlane.xlu1 %1268 }
 0x8a7   : > { %v1270_v6 = vsub.f32 %v1264_v2, %v1269_v5 }
 0x8a9   : > { %v1271_v7 = vmul.f32 1.442695, %v1270_v6 }
 0x8aa   : > { %v1280_v8 = vpop.permute.xlu1 %1279 }
 0x8ab   : > { %1685 = vpow2.f32 %v1271_v7  ;;  %v1285_v10 = vsel %vm727_vm5, %v1280_v8, 0 }
 0x8ac   : > { %1621 = vmatpush3.bf16.msra.mxu0 %v1285_v10 }
 0x8b8   : > { %v1686_v9 = vpop.eup %1685 }
 0x8b9   : > { %v1273_v11 = vsel %vm631_vm4, %v1686_v9, 0.0 }
 0x8ba   : > { %1274 = vadd.xlane.f32.xlu0 %v1273_v11 }
 0x8d4   : > { %v1182_v45 = vpop.f32.mrf.mxu0 }
 0x8d5   : > { %v1188_v12 = vadd.f32 %v1182_v45, %v998_v40 }
 0x8d6   : > { %v1613_v13 = vpop.f32.mrf.mxu0 }
 0x8d8   : > { %v1185_v15 = vpop.f32.mrf.mxu0 }
 0x8da   : > { %v1614_v16 = vpop.f32.mrf.mxu0 }
 0x943   : > { %v1275_v17 = vpop.xlane.xlu0 %1274 }
 0x944   : > { %1687 = vrcp.f32 %v1275_v17 }
 0x951   : > { %v1688_v18 = vpop.eup %1687 }
 0x952   : > { %v1277_v19 = vmul.f32 %v1688_v18, %v1686_v9 }
 0x954   : > { %v1278_v20 = vpack.c.bf16 %v1277_v19, %v1277_v19 }
 0x956   : > { %1623 = vmatmul.mubr.msk.bf16.vlgmr.msra.gmra.mxu0 %vm631_vm4, %v1278_v20 }
 0xa16   : > { %v1321_v21 = vpop.f32.mrf.mxu0 }
 0xa17   : > { %v1327_v22 = vpack.c.bf16 %v1321_v21, %v1321_v21 }
 0xa18   : > { %v1624_v23 = vpop.f32.mrf.mxu0 }
 0xa19   : > { %1629 = vmatmul.mubr.msk.bf16.vlgmr.msra.gmra.mxu1 %vm631_vm4, %v1327_v22 }
 0xa1a   : > { %v1324_v24 = vpop.f32.mrf.mxu0 }
 0xa1c   : > { %v1625_v25 = vpop.f32.mrf.mxu0 }
 0xad9   : > { %v1368_v26 = vpop.f32.mrf.mxu1 }
 0xada   : > { %v1374_v27 = vadd.f32 %v1368_v26, %v1188_v12 }
 0xadb   : > { %v1630_v29 = vpop.f32.mrf.mxu1 }
 0xadc   : > { %v1375_v30 = vadd.f32 %v1374_v27, %v1809_v0 }
 0xadd   : > { %v1371_v32 = vpop.f32.mrf.mxu1 }
 0xade   : > { %v1383_v33 = vadd.f32 %v1515_v28, %v1375_v30 }
 0xadf   : > { %v1631_v34 = vpop.f32.mrf.mxu1 }
 0xae0   : > { %1384 = vst.msk [vmem:[%s443_s22] sm:$0xff] %vm448_vm0, %v1383_v33 }
 0xae1 PF: > { %s21_s19 = sadd.s32 1, %s1711_s19   ;;  %s1993_s17 = smov %s1707_s18 }
 0xae2   : > { %p18_p5 = scmp.ge.s32.totalorder %s21_s19, 4   ;;  %s1994_s18 = smov %s1996_s20 }
 0xae4   :  { %20 = sbr.rel (!%p18_p5) target bundleno = 2 (0x2), region = 100 }

</bundles_post_ra>
